<compile_context>
chip_gen: v7x
topology: tpu7x:2x2x1
jax: 0.10.0
libtpu: 0.0.40
codegen_flags: <defaults>
</compile_context>

<pallas_src>
import jax
import jax.numpy as jnp
from jax.experimental import pallas as pl
from jax.experimental.pallas import tpu as pltpu

# Logical sizes (from the PyTorch module).
D_RECON = 64
D_A = 10
D_POSE = 20
D_IN = D_RECON + D_A + D_POSE          # 94
H1, H2 = 512, 1024
D_OUT = 784
N_CLS = 10

# Lane-aligned (padded) sizes.
D_IN_PAD = 128                          # 94  -> 128
D_OUT_PAD = 896                         # 784 -> 896 = 7*128


def _round_up(n, m):
    return ((n + m - 1) // m) * m


# ----------------------------------------------------------------------------
# Pallas kernel: one batch tile of the reconstruction MLP
# ----------------------------------------------------------------------------
def _recon_kernel(rin_ref, w1_ref, b1_ref, w2_ref, b2_ref, w3_ref, b3_ref,
                  rec_ref):
    # bf16 MXU matmuls, f32 accumulation & elementwise math.
    h1 = jnp.dot(rin_ref[...], w1_ref[...],
                 preferred_element_type=jnp.float32)                 # (TB,512)
    h1 = jnp.maximum(h1 + b1_ref[...], 0.0)
    h2 = jnp.dot(h1.astype(jnp.bfloat16), w2_ref[...],
                 preferred_element_type=jnp.float32)                 # (TB,1024)
    h2 = jnp.maximum(h2 + b2_ref[...], 0.0)
    h3 = jnp.dot(h2.astype(jnp.bfloat16), w3_ref[...],
                 preferred_element_type=jnp.float32)                 # (TB,896)
    h3 = h3 + b3_ref[...]
    # sigmoid(x) = 0.5*tanh(0.5*x) + 0.5  ->  one EUP push per element
    # (vs exp + divide).  Note: the 112 padded output lanes also go through
    # tanh (zero-padded W3/b3 -> value 0.5, sliced off in the wrapper); this
    # is ~12.5% extra EUP work, acceptable per review.
    rec_ref[...] = (0.5 * jnp.tanh(0.5 * h3) + 0.5).astype(jnp.bfloat16)


# ----------------------------------------------------------------------------
# Wrapper
# ----------------------------------------------------------------------------
def _prepare_params(params):
    """Pad to lane-aligned shapes; weights -> bf16, biases stay f32."""
    w1, b1, w2, b2, w3, b3 = params
    w1p = jnp.pad(w1, ((0, D_IN_PAD - D_IN), (0, 0))).astype(jnp.bfloat16)
    w3p = jnp.pad(w3, ((0, 0), (0, D_OUT_PAD - D_OUT))).astype(jnp.bfloat16)
    b3p = jnp.pad(b3, ((0, 0), (0, D_OUT_PAD - D_OUT))).astype(jnp.float32)
    return (w1p, b1.astype(jnp.float32),
            w2.astype(jnp.bfloat16), b2.astype(jnp.float32),
            w3p, b3p)


def _pick_tile(B, tb):
    """Batch-tile selection: amortize per-step overhead, but guarantee >=2
    grid steps whenever possible so both v7x TensorCores get work."""
    if tb is None:
        tb = 512 if B >= 2048 else 256      # larger tile for big B (v6e win)
    tb = min(tb, 512)                        # cap for v7x's 64 MiB VMEM
    tb = min(tb, _round_up(B, 16))           # 16-row min keeps bf16 tiles clean
    b_pad = _round_up(B, tb)
    nb = b_pad // tb
    if nb == 1 and b_pad >= 32:              # split so megacore isn't idle
        tb = _round_up(b_pad // 2, 16)
        b_pad = _round_up(B, tb)
        nb = -(-b_pad // tb)
    return tb, b_pad, nb


def net_tail(x, a, pose, for_recon, params, *, tb=None):
    """Tail of Net.forward.

    x         : (B, 10)      class-capsule logits (output of pool5)
    a         : (B, 1, 1, 10) activations
    pose      : (B, 10, 2)   poses
    for_recon : (B, 64)      reconstruction features
    Returns (log_softmax(x), a.squeeze(1).squeeze(1), pose, rec).
    rec is returned in bf16 (review: halves the dominant HBM write stream;
    well inside the reconstruction tolerance).
    """
    B = x.shape[0]
    tb, b_pad, nb = _pick_tile(B, tb)

    # torch.cat([for_recon.view(-1,64), a.view(-1,10), pose.view(-1,20)], 1)
    rec_in = jnp.concatenate(
        [for_recon.reshape(-1, D_RECON),
         a.reshape(-1, D_A),
         pose.reshape(-1, D_POSE)], axis=1).astype(jnp.bfloat16)      # (B, 94)
    rin_pad = jnp.pad(rec_in, ((0, b_pad - B), (0, D_IN_PAD - D_IN)))

    w1p, b1, w2p, b2, w3p, b3p = _prepare_params(params)

    def row_spec(cols):
        return pl.BlockSpec((tb, cols), lambda i: (i, 0))

    def fixed(shape):                     # weight/bias stays VMEM-resident
        return pl.BlockSpec(shape, lambda i: (0, 0))

    flops = 2 * b_pad * (D_IN_PAD * H1 + H1 * H2 + H2 * D_OUT_PAD)
    transcendentals = b_pad * D_OUT_PAD                              # one tanh/elem
    bytes_accessed = (
        2 * (D_IN_PAD * H1 + H1 * H2 + H2 * D_OUT_PAD)               # bf16 weights
        + 4 * (H1 + H2 + D_OUT_PAD)                                  # f32 biases
        + 2 * b_pad * (D_IN_PAD + D_OUT_PAD))                        # bf16 acts io

    vmem_limit = (48 << 20) if tb > 256 else (32 << 20)

    rec_pad = pl.pallas_call(
        _recon_kernel,
        out_shape=jax.ShapeDtypeStruct((b_pad, D_OUT_PAD), jnp.bfloat16),
        grid_spec=pltpu.PrefetchScalarGridSpec(
            num_scalar_prefetch=0,
            grid=(nb,),
            in_specs=[
                row_spec(D_IN_PAD),                         # rec_in (bf16, padded)
                fixed((D_IN_PAD, H1)), fixed((1, H1)),      # recon1
                fixed((H1, H2)),       fixed((1, H2)),      # recon2
                fixed((H2, D_OUT_PAD)), fixed((1, D_OUT_PAD)),  # recon3
            ],
            out_specs=row_spec(D_OUT_PAD),
        ),
        compiler_params=pltpu.CompilerParams(
            dimension_semantics=("parallel",),
            vmem_limit_bytes=vmem_limit),
        cost_estimate=pl.CostEstimate(flops=flops,
                                      transcendentals=transcendentals,
                                      bytes_accessed=bytes_accessed),
    )(rin_pad, w1p, b1, w2p, b2, w3p, b3p)

    rec = rec_pad[:B, :D_OUT]                                  # bf16 (B, 784)

    # log_softmax hoisted to XLA on the unpadded (B, 10) logits (review item:
    # in-kernel it forced a 12.8x-inflated padded x/logp HBM stream).
    logp = jax.nn.log_softmax(x.astype(jnp.float32), axis=1)
    a_out = a.reshape(B, D_A)            # == a.squeeze(1).squeeze(1)
    return logp, a_out, pose, rec


# ----------------------------------------------------------------------------
# Pure-JAX reference (f32) for correctness checking
# ----------------------------------------------------------------------------
def ref_tail(x, a, pose, for_recon, params):
    w1, b1, w2, b2, w3, b3 = params
    B = x.shape[0]
    rec_in = jnp.concatenate(
        [for_recon.reshape(-1, D_RECON), a.reshape(-1, D_A),
         pose.reshape(-1, D_POSE)], axis=1).astype(jnp.float32)
    h = jax.nn.relu(rec_in @ w1 + b1)
    h = jax.nn.relu(h @ w2 + b2)
    rec = jax.nn.sigmoid(h @ w3 + b3)
    logp = jax.nn.log_softmax(x, axis=1)
    return logp, a.reshape(B, D_A), pose, rec


# ----------------------------------------------------------------------------
# Deterministic parameter init (PyTorch nn.Linear default: U(-1/sqrt(in), +)).
# Weights kept as (in, out) for  y = x @ W + b ;  biases as (1, out).
# ----------------------------------------------------------------------------
def init_params(key):
    dims = [(D_IN, H1), (H1, H2), (H2, D_OUT)]
    params = []
    for (din, dout) in dims:
        key, kw, kb = jax.random.split(key, 3)
        bound = 1.0 / jnp.sqrt(din)
        w = jax.random.uniform(kw, (din, dout), jnp.float32, -bound, bound)
        b = jax.random.uniform(kb, (1, dout), jnp.float32, -bound, bound)
        params += [w, b]
    return tuple(params)


if __name__ == "__main__":
    key = jax.random.PRNGKey(0)
    k_p, k_x, k_a, k_pose, k_fr = jax.random.split(key, 5)

    B = 2
    params = init_params(k_p)

    # Stand-ins for the (undefined) capsule front-end outputs.
    x = jax.random.normal(k_x, (B, N_CLS), jnp.float32)          # class logits
    a = jax.nn.relu(jax.random.normal(k_a, (B, 1, 1, N_CLS), jnp.float32))
    pose = jax.random.normal(k_pose, (B, N_CLS, 2), jnp.float32)
    for_recon = jax.random.normal(k_fr, (B, D_RECON), jnp.float32)

    logp, a_out, pose_out, rec = net_tail(x, a, pose, for_recon, params)
    jax.block_until_ready((logp, a_out, pose_out, rec))

    assert logp.shape == (B, N_CLS) and rec.shape == (B, D_OUT)
    assert a_out.shape == (B, N_CLS) and pose_out.shape == (B, N_CLS, 2)

    # Reference check (loose tol on rec: bf16 MXU + bf16 output storage).
    logp_r, a_r, pose_r, rec_r = ref_tail(x, a, pose, for_recon, params)
    assert jnp.max(jnp.abs(logp - logp_r)) < 1e-5
    assert jnp.max(jnp.abs(rec.astype(jnp.float32) - rec_r)) < 5e-2
    assert jnp.array_equal(a_out, a_r) and jnp.array_equal(pose_out, pose_r)

    print("KERNEL_OK")
</pallas_src>

<mosaic_0001>
module attributes {stable_mosaic.version = 11 : i64} {
  func.func @_recon_kernel(%arg0: i32, %arg1: memref<16x128xbf16, #tpu.memory_space<vmem>>, %arg2: memref<128x512xbf16, #tpu.memory_space<vmem>>, %arg3: memref<1x512xf32, #tpu.memory_space<vmem>>, %arg4: memref<512x1024xbf16, #tpu.memory_space<vmem>>, %arg5: memref<1x1024xf32, #tpu.memory_space<vmem>>, %arg6: memref<1024x896xbf16, #tpu.memory_space<vmem>>, %arg7: memref<1x896xf32, #tpu.memory_space<vmem>>, %arg8: memref<16x896xbf16, #tpu.memory_space<vmem>>) attributes {dimension_semantics = [#tpu.dimension_semantics<parallel>], iteration_bounds = array<i64: 1>, scalar_prefetch = 0 : i64, scratch_operands = 0 : i64, tpu.core_type = #tpu.core_type<tc>, window_params = [{transform_indices = @transform_0, window_bounds = array<i64: 16, 128>}, {pipeline_mode = #tpu.pipeline_mode<synchronous>, transform_indices = @transform_1, window_bounds = array<i64: 128, 512>}, {pipeline_mode = #tpu.pipeline_mode<synchronous>, transform_indices = @transform_2, window_bounds = array<i64: 1, 512>}, {pipeline_mode = #tpu.pipeline_mode<synchronous>, transform_indices = @transform_3, window_bounds = array<i64: 512, 1024>}, {pipeline_mode = #tpu.pipeline_mode<synchronous>, transform_indices = @transform_4, window_bounds = array<i64: 1, 1024>}, {pipeline_mode = #tpu.pipeline_mode<synchronous>, transform_indices = @transform_5, window_bounds = array<i64: 1024, 896>}, {pipeline_mode = #tpu.pipeline_mode<synchronous>, transform_indices = @transform_6, window_bounds = array<i64: 1, 896>}, {transform_indices = @transform_7, window_bounds = array<i64: 16, 896>}]} {
    %c0 = arith.constant 0 : index
    %c0_0 = arith.constant 0 : index
    %0 = vector.load %arg1[%c0, %c0_0] : memref<16x128xbf16, #tpu.memory_space<vmem>>, vector<16x128xbf16>
    %c0_1 = arith.constant 0 : index
    %c0_2 = arith.constant 0 : index
    %1 = vector.load %arg2[%c0_1, %c0_2] : memref<128x512xbf16, #tpu.memory_space<vmem>>, vector<128x512xbf16>
    %cst = arith.constant dense<0.000000e+00> : vector<16x512xf32>
    %2 = tpu.matmul %0, %1, %cst {dimension_numbers = #tpu.dot_dimension_numbers<[1], [0], [0], [1], [0, 0, 1, 1], [], []>} : vector<16x128xbf16>, vector<128x512xbf16>, vector<16x512xf32> -> vector<16x512xf32>
    %c0_3 = arith.constant 0 : index
    %c0_4 = arith.constant 0 : index
    %3 = vector.load %arg3[%c0_3, %c0_4] : memref<1x512xf32, #tpu.memory_space<vmem>>, vector<1x512xf32>
    %4 = vector.broadcast %3 : vector<1x512xf32> to vector<16x512xf32>
    %5 = arith.addf %2, %4 : vector<16x512xf32>
    %cst_5 = arith.constant 0.000000e+00 : f32
    %6 = vector.broadcast %cst_5 : f32 to vector<16x512xf32>
    %7 = arith.maximumf %5, %6 : vector<16x512xf32>
    %8 = arith.truncf %7 : vector<16x512xf32> to vector<16x512xbf16>
    %c0_6 = arith.constant 0 : index
    %c0_7 = arith.constant 0 : index
    %9 = vector.load %arg4[%c0_6, %c0_7] : memref<512x1024xbf16, #tpu.memory_space<vmem>>, vector<512x1024xbf16>
    %cst_8 = arith.constant dense<0.000000e+00> : vector<16x1024xf32>
    %10 = tpu.matmul %8, %9, %cst_8 {dimension_numbers = #tpu.dot_dimension_numbers<[1], [0], [0], [1], [0, 0, 1, 1], [], []>} : vector<16x512xbf16>, vector<512x1024xbf16>, vector<16x1024xf32> -> vector<16x1024xf32>
    %c0_9 = arith.constant 0 : index
    %c0_10 = arith.constant 0 : index
    %11 = vector.load %arg5[%c0_9, %c0_10] : memref<1x1024xf32, #tpu.memory_space<vmem>>, vector<1x1024xf32>
    %12 = vector.broadcast %11 : vector<1x1024xf32> to vector<16x1024xf32>
    %13 = arith.addf %10, %12 : vector<16x1024xf32>
    %cst_11 = arith.constant 0.000000e+00 : f32
    %14 = vector.broadcast %cst_11 : f32 to vector<16x1024xf32>
    %15 = arith.maximumf %13, %14 : vector<16x1024xf32>
    %16 = arith.truncf %15 : vector<16x1024xf32> to vector<16x1024xbf16>
    %c0_12 = arith.constant 0 : index
    %c0_13 = arith.constant 0 : index
    %17 = vector.load %arg6[%c0_12, %c0_13] : memref<1024x896xbf16, #tpu.memory_space<vmem>>, vector<1024x896xbf16>
    %cst_14 = arith.constant dense<0.000000e+00> : vector<16x896xf32>
    %18 = tpu.matmul %16, %17, %cst_14 {dimension_numbers = #tpu.dot_dimension_numbers<[1], [0], [0], [1], [0, 0, 1, 1], [], []>} : vector<16x1024xbf16>, vector<1024x896xbf16>, vector<16x896xf32> -> vector<16x896xf32>
    %c0_15 = arith.constant 0 : index
    %c0_16 = arith.constant 0 : index
    %19 = vector.load %arg7[%c0_15, %c0_16] : memref<1x896xf32, #tpu.memory_space<vmem>>, vector<1x896xf32>
    %20 = vector.broadcast %19 : vector<1x896xf32> to vector<16x896xf32>
    %21 = arith.addf %18, %20 : vector<16x896xf32>
    %cst_17 = arith.constant 5.000000e-01 : f32
    %22 = vector.broadcast %cst_17 : f32 to vector<16x896xf32>
    %23 = arith.mulf %22, %21 : vector<16x896xf32>
    %24 = math.tanh %23 : vector<16x896xf32>
    %cst_18 = arith.constant 5.000000e-01 : f32
    %25 = vector.broadcast %cst_18 : f32 to vector<16x896xf32>
    %26 = arith.mulf %25, %24 : vector<16x896xf32>
    %cst_19 = arith.constant 5.000000e-01 : f32
    %27 = vector.broadcast %cst_19 : f32 to vector<16x896xf32>
    %28 = arith.addf %26, %27 : vector<16x896xf32>
    %29 = arith.truncf %28 : vector<16x896xf32> to vector<16x896xbf16>
    %c0_20 = arith.constant 0 : index
    %c0_21 = arith.constant 0 : index
    %30 = vector.load %arg8[%c0_20, %c0_21] : memref<16x896xbf16, #tpu.memory_space<vmem>>, vector<16x896xbf16>
    tpu.vector_store %arg8[%c0_20, %c0_21], %29 {strides = array<i32>} : memref<16x896xbf16, #tpu.memory_space<vmem>>, vector<16x896xbf16>,
    return
  }
  func.func @transform_0(%arg0: i32) -> (i32, i32) {
    %c0_i32 = arith.constant 0 : i32
    %c0_i32_0 = arith.constant 0 : i32
    return %arg0, %c0_i32 : i32, i32
  }
  func.func @transform_1(%arg0: i32) -> (i32, i32) {
    %c0_i32 = arith.constant 0 : i32
    %c0_i32_0 = arith.constant 0 : i32
    %c0_i32_1 = arith.constant 0 : i32
    return %c0_i32, %c0_i32_0 : i32, i32
  }
  func.func @transform_2(%arg0: i32) -> (i32, i32) {
    %c0_i32 = arith.constant 0 : i32
    %c0_i32_0 = arith.constant 0 : i32
    %c0_i32_1 = arith.constant 0 : i32
    return %c0_i32, %c0_i32_0 : i32, i32
  }
  func.func @transform_3(%arg0: i32) -> (i32, i32) {
    %c0_i32 = arith.constant 0 : i32
    %c0_i32_0 = arith.constant 0 : i32
    %c0_i32_1 = arith.constant 0 : i32
    return %c0_i32, %c0_i32_0 : i32, i32
  }
  func.func @transform_4(%arg0: i32) -> (i32, i32) {
    %c0_i32 = arith.constant 0 : i32
    %c0_i32_0 = arith.constant 0 : i32
    %c0_i32_1 = arith.constant 0 : i32
    return %c0_i32, %c0_i32_0 : i32, i32
  }
  func.func @transform_5(%arg0: i32) -> (i32, i32) {
    %c0_i32 = arith.constant 0 : i32
    %c0_i32_0 = arith.constant 0 : i32
    %c0_i32_1 = arith.constant 0 : i32
    return %c0_i32, %c0_i32_0 : i32, i32
  }
  func.func @transform_6(%arg0: i32) -> (i32, i32) {
    %c0_i32 = arith.constant 0 : i32
    %c0_i32_0 = arith.constant 0 : i32
    %c0_i32_1 = arith.constant 0 : i32
    return %c0_i32, %c0_i32_0 : i32, i32
  }
  func.func @transform_7(%arg0: i32) -> (i32, i32) {
    %c0_i32 = arith.constant 0 : i32
    %c0_i32_0 = arith.constant 0 : i32
    return %arg0, %c0_i32 : i32, i32
  }
}

</mosaic_0001>

<bundles_post_ra>
// kernel: tpu_custom_call.1
= control target key start
LH: loop header
LB: loop body
LE: loop exit
PB: predicated region body
PF: predicated region fallthrough
CT: control target
= control target key end

     0   :  { %12 = vsyncpa [#allocation3], 0  ;;  %s8188_s0 = inlined_call_operand.hbm [shape: bf16[16,128], index: 0, kind: input, shape index: {}]   ;;  %s8189_s1 = inlined_call_operand.hbm [shape: bf16[128,512], index: 1, kind: input, shape index: {}]   ;;  %s8190_s2 = inlined_call_operand.hbm [shape: f32[1,512], index: 2, kind: input, shape index: {}]   ;;  %s8191_s3 = inlined_call_operand.hbm [shape: bf16[512,1024], index: 3, kind: input, shape index: {}]   ;;  %s8192_s4 = inlined_call_operand.hbm [shape: f32[1,1024], index: 4, kind: input, shape index: {}]   ;;  %s8193_s5 = inlined_call_operand.hbm [shape: bf16[1024,896], index: 5, kind: input, shape index: {}]   ;;  %s8194_s6 = inlined_call_operand.hbm [shape: f32[1,896], index: 6, kind: input, shape index: {}]   ;;  %s8195_s7 = inlined_call_operand.hbm [shape: bf16[16,896], index: 7, kind: output, shape index: {}]  }
   0x1   :  { %13 = vsyncpa [#allocation6], 0 }
   0x2   :  { %14 = vsyncpa [#allocation9], 0 }
   0x3   :  { %15 = vsyncpa [#allocation12], 0 }
   0x4   :  { %16 = vsyncpa [#allocation4], 0  ;;  %s7886_s24 = smov [#allocation5]   ;;  %s7700_s28 = scalar_lea.hbm %s8189_s1, 4096 }
   0x5   :  { %s34_s25 = sshll.u32 %s7886_s24, 4  ;;  %p7701_p0 = scmp.ne.s32.totalorder %s8189_s1, %s7700_s28  ;;  %s35_s25 = int_to_ptr.vmem [resolvable:$true] %s34_s25 }
   0x6   :  { %p7704_p1 = scmp.lt.u32.totalorder %s7700_s28, %s8189_s1 }
   0x8   :  { %p7706_p2 = pnand %p7704_p1, %p7701_p0 }
   0xa   :  { %7709 = shalt.err (!%p7706_p2)
}
   0xb   :  { %s7710_s10 = scalar_lea.vmem %s35_s25, 4096  ;;  %p7715_p4 = scmp.lt.s32.totalorder %s35_s25, %s35_s25 }
   0xc   :  { %p7711_p3 = scmp.ne.s32.totalorder %s35_s25, %s7710_s10  ;;  %p7716_p5 = scmp.lt.s32.totalorder %s7710_s10, %s7710_s10 }
   0xe   :  { %p7717_p6 = por %p7716_p5, %p7715_p4 }
  0x10   :  { %p7718_p7 = pnand %p7717_p6, %p7711_p3 }
  0x12   :  { %7721 = shalt.err (!%p7718_p7)
}
  0x13   :  { %s7887_s11 = smov 256   ;;  %s7888_s12 = smov 16  }
  0x14   :  { %40 = dma.hbm_to_vmem [thread:$0]  %s8189_s1, 4096, %s35_s25, [#allocation6], %s7887_s11, %s7887_s11, %s7888_s12  }
  0x15   :  { %s7889_s15 = smov [#allocation8]   ;;  %s7722_s19 = scalar_lea.hbm %s8191_s3, 32768 }
  0x16   :  { %s56_s16 = sshll.u32 %s7889_s15, 4  ;;  %p7723_p8 = scmp.ne.s32.totalorder %s8191_s3, %s7722_s19  ;;  %s57_s16 = int_to_ptr.vmem [resolvable:$true] %s56_s16 }
  0x17   :  { %p7726_p9 = scmp.lt.u32.totalorder %s7722_s19, %s8191_s3 }
  0x19   :  { %p7728_p10 = pnand %p7726_p9, %p7723_p8 }
  0x1b   :  { %7731 = shalt.err (!%p7728_p10)
}
  0x1c   :  { %s7732_s24 = scalar_lea.vmem %s57_s16, 32768  ;;  %p7737_p12 = scmp.lt.s32.totalorder %s57_s16, %s57_s16 }
  0x1d   :  { %p7733_p11 = scmp.ne.s32.totalorder %s57_s16, %s7732_s24  ;;  %p7738_p13 = scmp.lt.s32.totalorder %s7732_s24, %s7732_s24 }
  0x1f   :  { %p7739_p0 = por %p7738_p13, %p7737_p12 }
  0x21   :  { %p7740_p1 = pnand %p7739_p0, %p7733_p11 }
  0x23   :  { %7743 = shalt.err (!%p7740_p1)
}
  0x24   :  { %s7890_s1 = smov 512   ;;  %s7891_s25 = smov 32  }
  0x25   :  { %62 = dma.hbm_to_vmem [thread:$0]  %s8191_s3, 32768, %s57_s16, [#allocation9], %s7890_s1, %s7890_s1, %s7891_s25  }
  0x26   :  { %s7892_s28 = smov [#allocation11]   ;;  %s7744_s9 = scalar_lea.hbm %s8193_s5, 57344 }
  0x27   :  { %s78_s29 = sshll.u32 %s7892_s28, 4  ;;  %p7745_p2 = scmp.ne.s32.totalorder %s8193_s5, %s7744_s9  ;;  %s79_s29 = int_to_ptr.vmem [resolvable:$true] %s78_s29 }
  0x28   :  { %p7748_p3 = scmp.lt.u32.totalorder %s7744_s9, %s8193_s5 }
  0x2a   :  { %p7750_p4 = pnand %p7748_p3, %p7745_p2 }
  0x2c   :  { %7753 = shalt.err (!%p7750_p4)
}
  0x2d   :  { %s7754_s14 = scalar_lea.vmem %s79_s29, 57344  ;;  %p7759_p6 = scmp.lt.s32.totalorder %s79_s29, %s79_s29 }
  0x2e   :  { %p7755_p5 = scmp.ne.s32.totalorder %s79_s29, %s7754_s14  ;;  %p7760_p7 = scmp.lt.s32.totalorder %s7754_s14, %s7754_s14 }
  0x30   :  { %p7761_p8 = por %p7760_p7, %p7759_p6 }
  0x32   :  { %p7762_p9 = pnand %p7761_p8, %p7755_p5 }
  0x34   :  { %7765 = shalt.err (!%p7762_p9)
}
  0x35   :  { %s7893_s3 = smov 448   ;;  %s7894_s15 = smov 28  }
  0x36   :  { %84 = dma.hbm_to_vmem [thread:$0]  %s8193_s5, 57344, %s79_s29, [#allocation12], %s7893_s3, %s7893_s3, %s7894_s15  }
  0x37   :  { %s7895_s18 = smov [#allocation2]   ;;  %s7766_s22 = scalar_lea.hbm %s8188_s0, 128 }
  0x38   :  { %s22_s19 = sshll.u32 %s7895_s18, 4  ;;  %p7767_p10 = scmp.ne.s32.totalorder %s8188_s0, %s7766_s22  ;;  %s23_s19 = int_to_ptr.vmem [resolvable:$true] %s22_s19 }
  0x39   :  { %p7770_p11 = scmp.lt.u32.totalorder %s7766_s22, %s8188_s0 }
  0x3b   :  { %p7772_p12 = pnand %p7770_p11, %p7767_p10 }
  0x3d   :  { %7775 = shalt.err (!%p7772_p12)
}
  0x3e   :  { %s7776_s26 = scalar_lea.vmem %s23_s19, 128  ;;  %p7781_p0 = scmp.lt.s32.totalorder %s23_s19, %s23_s19 }
  0x3f   :  { %p7777_p13 = scmp.ne.s32.totalorder %s23_s19, %s7776_s26  ;;  %p7782_p1 = scmp.lt.s32.totalorder %s7776_s26, %s7776_s26 }
  0x41   :  { %p7783_p2 = por %p7782_p1, %p7781_p0 }
  0x43   :  { %p7784_p3 = pnand %p7783_p2, %p7777_p13 }
  0x45   :  { %7787 = shalt.err (!%p7784_p3)
}
  0x46   :  { %s7896_s5 = smov 64   ;;  %s7897_s27 = smov 4  }
  0x47   :  { %28 = dma.hbm_to_vmem [thread:$0]  %s8188_s0, 128, %s23_s19, [#allocation3], %s7896_s5, %s7896_s5, %s7897_s27  }
  0x48   :  { %s7898_s30 = smov [#allocation7]   ;;  %s7899_s9 = smov [#allocation10]  }
  0x49   :  { %s47_s8 = sshll.u32 %s7898_s30, 4  ;;  %s69_s10 = sshll.u32 %s7899_s9, 4  ;;  %s48_s8 = int_to_ptr.vmem [resolvable:$true] %s47_s8  ;;  %s70_s10 = int_to_ptr.vmem [resolvable:$true] %s69_s10 }
  0x4a   :  { %s7788_s13 = scalar_lea.hbm %s8190_s2, 64 }
  0x4b   :  { %p7789_p4 = scmp.ne.s32.totalorder %s8190_s2, %s7788_s13  ;;  %p7792_p5 = scmp.lt.u32.totalorder %s7788_s13, %s8190_s2 }
  0x4d   :  { %p7794_p6 = pnand %p7792_p5, %p7789_p4 }
  0x4f   :  { %7797 = shalt.err (!%p7794_p6)
}
  0x50   :  { %s7798_s0 = scalar_lea.vmem %s48_s8, 64  ;;  %p7803_p8 = scmp.lt.s32.totalorder %s48_s8, %s48_s8 }
  0x51   :  { %p7799_p7 = scmp.ne.s32.totalorder %s48_s8, %s7798_s0  ;;  %p7804_p9 = scmp.lt.s32.totalorder %s7798_s0, %s7798_s0 }
  0x53   :  { %p7805_p10 = por %p7804_p9, %p7803_p8 }
  0x55   :  { %p7806_p11 = pnand %p7805_p10, %p7799_p7 }
  0x57   :  { %7809 = shalt.err (!%p7806_p11)
}
  0x58   :  { %50 = dma.hbm_to_vmem [thread:$0]  %s8190_s2, 64, %s48_s8, [#allocation6]  }
  0x59   :  { %s7810_s23 = scalar_lea.hbm %s8192_s4, 128 }
  0x5a   :  { %p7811_p12 = scmp.ne.s32.totalorder %s8192_s4, %s7810_s23  ;;  %p7814_p13 = scmp.lt.u32.totalorder %s7810_s23, %s8192_s4 }
  0x5c   :  { %p7816_p0 = pnand %p7814_p13, %p7811_p12 }
  0x5e   :  { %7819 = shalt.err (!%p7816_p0)
}
  0x5f   :  { %s7820_s5 = scalar_lea.vmem %s70_s10, 128  ;;  %p7825_p2 = scmp.lt.s32.totalorder %s70_s10, %s70_s10 }
  0x60   :  { %p7821_p1 = scmp.ne.s32.totalorder %s70_s10, %s7820_s5  ;;  %p7826_p3 = scmp.lt.s32.totalorder %s7820_s5, %s7820_s5 }
  0x62   :  { %p7827_p4 = por %p7826_p3, %p7825_p2 }
  0x64   :  { %p7828_p5 = pnand %p7827_p4, %p7821_p1 }
  0x66   :  { %7831 = shalt.err (!%p7828_p5)
}
  0x67   :  { %72 = dma.hbm_to_vmem [thread:$0]  %s8192_s4, 128, %s70_s10, [#allocation9]  }
  0x68   :  { %s7900_s28 = smov [#allocation13]   ;;  %s7832_s9 = scalar_lea.hbm %s8194_s6, 112 }
  0x69   :  { %s91_s29 = sshll.u32 %s7900_s28, 4  ;;  %p7833_p6 = scmp.ne.s32.totalorder %s8194_s6, %s7832_s9  ;;  %s92_s29 = int_to_ptr.vmem [resolvable:$true] %s91_s29 }
  0x6a   :  { %p7836_p7 = scmp.lt.u32.totalorder %s7832_s9, %s8194_s6 }
  0x6c   :  { %p7838_p8 = pnand %p7836_p7, %p7833_p6 }
  0x6e   :  { %7841 = shalt.err (!%p7838_p8)
}
  0x6f   :  { %s7842_s16 = scalar_lea.vmem %s92_s29, 112  ;;  %s7846_s4 = scalar_lea.vmem %s92_s29, 128 }
  0x70   :  { %p7843_p9 = scmp.ne.s32.totalorder %s92_s29, %s7842_s16  ;;  %p7847_p10 = scmp.lt.s32.totalorder %s92_s29, %s92_s29 }
  0x71   :  { %p7848_p11 = scmp.lt.s32.totalorder %s7846_s4, %s7842_s16 }
  0x73   :  { %p7849_p12 = por %p7848_p11, %p7847_p10 }
  0x75   :  { %p7850_p13 = pnand %p7849_p12, %p7843_p9 }
  0x77   :  { %7853 = shalt.err (!%p7850_p13)
}
  0x78   :  { %94 = dma.hbm_to_vmem [thread:$0]  %s8194_s6, 112, %s92_s29, [#allocation12]  }
  0x79   :  { %7876 = dma.done.wait [#allocation3], 128  }
  0x7a   :  { %7877 = vsyncadd [#allocation3], 4294967168 }
  0x7b   :  { %7878 = dma.done.wait [#allocation6], 4160  }
  0x7c   :  { %7879 = vsyncadd [#allocation6], 4294963136 }
  0x7d   :  { %7880 = dma.done.wait [#allocation9], 32896  }
  0x7e   :  { %7881 = vsyncadd [#allocation9], 4294934400 }
  0x7f   :  { %7882 = dma.done.wait [#allocation12], 57456  }
  0x80   :  { %7883 = vsyncadd [#allocation12], 4294909840  ;;  %v7901_v0 = vmov 0   ;;  %v6982_v1 = vld [vmem:[#allocation5 + $0x4] ss:$16 sps:$4 sm:$0xff]   ;;  %v7030_v43 = vld [vmem:[#allocation2] sm:$0xff]  }
  0x81   :  { %371 = vmatprep.mubr.bf16.mxu0 %v7901_v0  ;;  %414 = vmatprep.mubr.bf16.mxu1 %v7901_v0  ;;  %v6984_v2 = vld [vmem:[#allocation5 + $0xc] ss:$16 sps:$4 sm:$0xff]   ;;  %v6986_v3 = vld [vmem:[#allocation5] ss:$16 sps:$4 sm:$0xff]   ;;  %v6987_v4 = vld [vmem:[#allocation5 + $0x8] ss:$16 sps:$4 sm:$0xff]  }
  0x82   :  { %339 = vmatprep.subr.bf16.mxu0 %v6982_v1  ;;  %382 = vmatprep.subr.bf16.mxu1 %v6984_v2  ;;  %v6988_v5 = vld [vmem:[#allocation5 + $0x24] ss:$16 sps:$4 sm:$0xff]   ;;  %v6990_v6 = vld [vmem:[#allocation5 + $0x2c] ss:$16 sps:$4 sm:$0xff]   ;;  %v6992_v7 = vld [vmem:[#allocation5 + $0x20] ss:$16 sps:$4 sm:$0xff]  }
  0x83   :  { %340 = vmatpush1.bf16.msra.mxu0 %v6986_v3  ;;  %383 = vmatpush1.bf16.msra.mxu1 %v6987_v4  ;;  %v6993_v8 = vld [vmem:[#allocation5 + $0x28] ss:$16 sps:$4 sm:$0xff]   ;;  %v6994_v9 = vld [vmem:[#allocation5 + $0x44] ss:$16 sps:$4 sm:$0xff]   ;;  %v6996_v10 = vld [vmem:[#allocation5 + $0x4c] ss:$16 sps:$4 sm:$0xff]  }
  0x84   :  { %341 = vmatprep.subr.bf16.mxu0 %v6988_v5  ;;  %384 = vmatprep.subr.bf16.mxu1 %v6990_v6  ;;  %v6998_v11 = vld [vmem:[#allocation5 + $0x40] ss:$16 sps:$4 sm:$0xff]   ;;  %v6999_v12 = vld [vmem:[#allocation5 + $0x48] ss:$16 sps:$4 sm:$0xff]   ;;  %v7000_v13 = vld [vmem:[#allocation5 + $0x64] ss:$16 sps:$4 sm:$0xff]  }
  0x85   :  { %v7002_v14 = vld [vmem:[#allocation5 + $0x6c] ss:$16 sps:$4 sm:$0xff]   ;;  %v7004_v15 = vld [vmem:[#allocation5 + $0x60] ss:$16 sps:$4 sm:$0xff]   ;;  %v7005_v16 = vld [vmem:[#allocation5 + $0x68] ss:$16 sps:$4 sm:$0xff]  }
  0x86   :  { %v7006_v17 = vld [vmem:[#allocation5 + $0x84] ss:$16 sps:$4 sm:$0xff]   ;;  %v7008_v18 = vld [vmem:[#allocation5 + $0x8c] ss:$16 sps:$4 sm:$0xff]   ;;  %v7010_v19 = vld [vmem:[#allocation5 + $0x80] ss:$16 sps:$4 sm:$0xff]  }
  0x87   :  { %342 = vmatpush1.bf16.msra.mxu0 %v6992_v7  ;;  %385 = vmatpush1.bf16.msra.mxu1 %v6993_v8  ;;  %v7011_v20 = vld [vmem:[#allocation5 + $0x88] ss:$16 sps:$4 sm:$0xff]   ;;  %v7012_v21 = vld [vmem:[#allocation5 + $0xa4] ss:$16 sps:$4 sm:$0xff]   ;;  %v7014_v22 = vld [vmem:[#allocation5 + $0xac] ss:$16 sps:$4 sm:$0xff]  }
  0x88   :  { %343 = vmatprep.subr.bf16.mxu0 %v6994_v9  ;;  %386 = vmatprep.subr.bf16.mxu1 %v6996_v10  ;;  %v7016_v23 = vld [vmem:[#allocation5 + $0xa0] ss:$16 sps:$4 sm:$0xff]   ;;  %v7017_v24 = vld [vmem:[#allocation5 + $0xa8] ss:$16 sps:$4 sm:$0xff]   ;;  %v7018_v25 = vld [vmem:[#allocation5 + $0xc4] ss:$16 sps:$4 sm:$0xff]  }
  0x89   :  { %v7020_v26 = vld [vmem:[#allocation5 + $0xcc] ss:$16 sps:$4 sm:$0xff]   ;;  %v7022_v27 = vld [vmem:[#allocation5 + $0xc0] ss:$16 sps:$4 sm:$0xff]   ;;  %v7023_v28 = vld [vmem:[#allocation5 + $0xc8] ss:$16 sps:$4 sm:$0xff]  }
  0x8a   :  { %v7024_v29 = vld [vmem:[#allocation5 + $0xe4] ss:$16 sps:$4 sm:$0xff]   ;;  %v7026_v30 = vld [vmem:[#allocation5 + $0xec] ss:$16 sps:$4 sm:$0xff]   ;;  %v7028_v35 = vld [vmem:[#allocation5 + $0xe0] ss:$16 sps:$4 sm:$0xff]  }
  0x8b   :  { %344 = vmatpush1.bf16.msra.mxu0 %v6998_v11  ;;  %387 = vmatpush1.bf16.msra.mxu1 %v6999_v12  ;;  %v437_v31 = vld [vmem:[#allocation8] sm:$0xff]  ;;  %s7902_s6 = smov [#allocation14]  }
  0x8c   :  { %345 = vmatprep.subr.bf16.mxu0 %v7000_v13  ;;  %388 = vmatprep.subr.bf16.mxu1 %v7002_v14  ;;  %v441_v32 = vld [vmem:[#allocation8 + $0x20] sm:$0xff]  ;;  %s6029_s18 = sshll.u32 %s7902_s6, 4  ;;  %s6030_s18 = int_to_ptr.vmem [resolvable:$true] %s6029_s18 }
  0x8d   :  { %v565_v33 = vld [vmem:[#allocation8 + $0x400] sm:$0xff]  ;;  %v6078_v37 = vcombine.high %v437_v31, %v441_v32  ;;  %v6077_v44 = vcombine.low %v437_v31, %v441_v32  ;;  %s7854_s0 = scalar_lea.vmem %s6030_s18, 896  ;;  %p7859_p1 = scmp.lt.s32.totalorder %s6030_s18, %s6030_s18 }
  0x8e   :  { %v569_v34 = vld [vmem:[#allocation8 + $0x420] sm:$0xff]  ;;  %p7855_p0 = scmp.ne.s32.totalorder %s6030_s18, %s7854_s0  ;;  %p7860_p2 = scmp.lt.s32.totalorder %s7854_s0, %s7854_s0 }
  0x8f   :  { %346 = vmatpush1.bf16.msra.mxu0 %v7004_v15  ;;  %389 = vmatpush1.bf16.msra.mxu1 %v7005_v16  ;;  %v7029_v36 = vld [vmem:[#allocation5 + $0xe8] ss:$16 sps:$4 sm:$0xff]   ;;  %v6206_v38 = vcombine.high %v565_v33, %v569_v34  ;;  %v6205_v45 = vcombine.low %v565_v33, %v569_v34 }
  0x90   :  { %347 = vmatprep.subr.bf16.mxu0 %v7006_v17  ;;  %390 = vmatprep.subr.bf16.mxu1 %v7008_v18  ;;  %v445_v39 = vld [vmem:[#allocation8 + $0x40] sm:$0xff]  ;;  %p7861_p3 = por %p7860_p2, %p7859_p1 }
  0x91   :  { %v449_v40 = vld [vmem:[#allocation8 + $0x60] sm:$0xff] }
  0x92   :  { %v573_v41 = vld [vmem:[#allocation8 + $0x440] sm:$0xff]  ;;  %v6086_v46 = vcombine.high %v445_v39, %v449_v40  ;;  %v6085_v52 = vcombine.low %v445_v39, %v449_v40  ;;  %p7862_p4 = pnand %p7861_p3, %p7855_p0 }
  0x93   :  { %348 = vmatpush1.bf16.msra.mxu0 %v7010_v19  ;;  %391 = vmatpush1.bf16.msra.mxu1 %v7011_v20  ;;  %v577_v42 = vld [vmem:[#allocation8 + $0x460] sm:$0xff] }
  0x94   :  { %349 = vmatprep.subr.bf16.mxu0 %v7012_v21  ;;  %392 = vmatprep.subr.bf16.mxu1 %v7014_v22  ;;  %v6214_v47 = vcombine.high %v573_v41, %v577_v42  ;;  %v453_v48 = vld [vmem:[#allocation8 + $0x80] sm:$0xff]  ;;  %v6213_v53 = vcombine.low %v573_v41, %v577_v42 }
  0x95   :  { %v457_v49 = vld [vmem:[#allocation8 + $0xa0] sm:$0xff] }
  0x96   :  { %v581_v50 = vld [vmem:[#allocation8 + $0x480] sm:$0xff]  ;;  %v6094_v54 = vcombine.high %v453_v48, %v457_v49  ;;  %v6093_v60 = vcombine.low %v453_v48, %v457_v49 }
  0x97   :  { %350 = vmatpush1.bf16.msra.mxu0 %v7016_v23  ;;  %393 = vmatpush1.bf16.msra.mxu1 %v7017_v24  ;;  %v585_v51 = vld [vmem:[#allocation8 + $0x4a0] sm:$0xff] }
  0x98   :  { %351 = vmatprep.subr.bf16.mxu0 %v7018_v25  ;;  %394 = vmatprep.subr.bf16.mxu1 %v7020_v26  ;;  %v6222_v55 = vcombine.high %v581_v50, %v585_v51  ;;  %v461_v56 = vld [vmem:[#allocation8 + $0xc0] sm:$0xff]  ;;  %v6221_v61 = vcombine.low %v581_v50, %v585_v51 }
  0x99   :  { %v465_v57 = vld [vmem:[#allocation8 + $0xe0] sm:$0xff] }
  0x9a   :  { %v589_v58 = vld [vmem:[#allocation8 + $0x4c0] sm:$0xff]  ;;  %v6102_v1 = vcombine.high %v461_v56, %v465_v57  ;;  %v6101_v4 = vcombine.low %v461_v56, %v465_v57 }
  0x9b   :  { %352 = vmatpush1.bf16.msra.mxu0 %v7022_v27  ;;  %395 = vmatpush1.bf16.msra.mxu1 %v7023_v28  ;;  %v593_v59 = vld [vmem:[#allocation8 + $0x4e0] sm:$0xff] }
  0x9c   :  { %353 = vmatprep.subr.bf16.mxu0 %v7024_v29  ;;  %396 = vmatprep.subr.bf16.mxu1 %v7026_v30  ;;  %v469_v62 = vld [vmem:[#allocation8 + $0x100] sm:$0xff]  ;;  %v6230_v2 = vcombine.high %v589_v58, %v593_v59  ;;  %v6229_v5 = vcombine.low %v589_v58, %v593_v59 }
  0x9d   :  { %v473_v63 = vld [vmem:[#allocation8 + $0x120] sm:$0xff] }
  0x9e   :  { %v597_v0 = vld [vmem:[#allocation8 + $0x500] sm:$0xff]  ;;  %v6110_v10 = vcombine.high %v469_v62, %v473_v63  ;;  %v6109_v12 = vcombine.low %v469_v62, %v473_v63 }
  0x9f   :  { %354 = vmatpush1.bf16.msra.mxu0 %v7028_v35  ;;  %397 = vmatpush1.bf16.msra.mxu1 %v7029_v36  ;;  %v601_v3 = vld [vmem:[#allocation8 + $0x520] sm:$0xff] }
  0xa0   :  { %2015 = vmatprep.subr.bf16.mxu1 %v6078_v37  ;;  %2058 = vmatprep.subr.bf16.mxu0 %v6206_v38  ;;  %v477_v6 = vld [vmem:[#allocation8 + $0x140] sm:$0xff]  ;;  %v6238_v11 = vcombine.high %v597_v0, %v601_v3  ;;  %v6237_v13 = vcombine.low %v597_v0, %v601_v3 }
  0xa1   :  { %v481_v7 = vld [vmem:[#allocation8 + $0x160] sm:$0xff] }
  0xa2   :  { %372 = vmatmul.mubr.bf16.vlgmr.msra.gmra.mrb[0].mxu0 %v7030_v43  ;;  %415 = vmatmul.mubr.bf16.vlgmr.msra.gmra.mrb[0].mxu1 %v7030_v43  ;;  %v605_v8 = vld [vmem:[#allocation8 + $0x540] sm:$0xff]  ;;  %v6118_v18 = vcombine.high %v477_v6, %v481_v7  ;;  %v6117_v20 = vcombine.low %v477_v6, %v481_v7 }
  0xa3   :  { %2016 = vmatpush1.bf16.msra.mxu1 %v6077_v44  ;;  %2059 = vmatpush1.bf16.msra.mxu0 %v6205_v45  ;;  %v609_v9 = vld [vmem:[#allocation8 + $0x560] sm:$0xff] }
  0xa4   :  { %2017 = vmatprep.subr.bf16.mxu1 %v6086_v46  ;;  %2060 = vmatprep.subr.bf16.mxu0 %v6214_v47  ;;  %v485_v14 = vld [vmem:[#allocation8 + $0x180] sm:$0xff]  ;;  %v6246_v19 = vcombine.high %v605_v8, %v609_v9  ;;  %v6245_v21 = vcombine.low %v605_v8, %v609_v9 }
  0xa5   :  { %v489_v15 = vld [vmem:[#allocation8 + $0x1a0] sm:$0xff] }
  0xa6   :  { %v613_v16 = vld [vmem:[#allocation8 + $0x580] sm:$0xff]  ;;  %v6126_v26 = vcombine.high %v485_v14, %v489_v15  ;;  %v6125_v28 = vcombine.low %v485_v14, %v489_v15 }
  0xa7   :  { %2018 = vmatpush1.bf16.msra.mxu1 %v6085_v52  ;;  %2061 = vmatpush1.bf16.msra.mxu0 %v6213_v53  ;;  %v617_v17 = vld [vmem:[#allocation8 + $0x5a0] sm:$0xff] }
  0xa8   :  { %2019 = vmatprep.subr.bf16.mxu1 %v6094_v54  ;;  %2062 = vmatprep.subr.bf16.mxu0 %v6222_v55  ;;  %v493_v22 = vld [vmem:[#allocation8 + $0x1c0] sm:$0xff]  ;;  %v6254_v27 = vcombine.high %v613_v16, %v617_v17  ;;  %v6253_v29 = vcombine.low %v613_v16, %v617_v17 }
  0xa9   :  { %v497_v23 = vld [vmem:[#allocation8 + $0x1e0] sm:$0xff] }
  0xaa   :  { %v621_v24 = vld [vmem:[#allocation8 + $0x5c0] sm:$0xff]  ;;  %v6134_v34 = vcombine.high %v493_v22, %v497_v23  ;;  %v6133_v36 = vcombine.low %v493_v22, %v497_v23 }
  0xab   :  { %2020 = vmatpush1.bf16.msra.mxu1 %v6093_v60  ;;  %2063 = vmatpush1.bf16.msra.mxu0 %v6221_v61  ;;  %v625_v25 = vld [vmem:[#allocation8 + $0x5e0] sm:$0xff] }
  0xac   :  { %2021 = vmatprep.subr.bf16.mxu1 %v6102_v1  ;;  %2064 = vmatprep.subr.bf16.mxu0 %v6230_v2  ;;  %v501_v30 = vld [vmem:[#allocation8 + $0x200] sm:$0xff]  ;;  %v6262_v35 = vcombine.high %v621_v24, %v625_v25  ;;  %v6261_v37 = vcombine.low %v621_v24, %v625_v25 }
  0xad   :  { %v505_v31 = vld [vmem:[#allocation8 + $0x220] sm:$0xff] }
  0xae   :  { %v629_v32 = vld [vmem:[#allocation8 + $0x600] sm:$0xff]  ;;  %v6142_v42 = vcombine.high %v501_v30, %v505_v31  ;;  %v6141_v44 = vcombine.low %v501_v30, %v505_v31 }
  0xaf   :  { %2022 = vmatpush1.bf16.msra.mxu1 %v6101_v4  ;;  %2065 = vmatpush1.bf16.msra.mxu0 %v6229_v5  ;;  %v633_v33 = vld [vmem:[#allocation8 + $0x620] sm:$0xff] }
  0xb0   :  { %2023 = vmatprep.subr.bf16.mxu1 %v6110_v10  ;;  %2066 = vmatprep.subr.bf16.mxu0 %v6238_v11  ;;  %v509_v38 = vld [vmem:[#allocation8 + $0x240] sm:$0xff]  ;;  %v6270_v43 = vcombine.high %v629_v32, %v633_v33  ;;  %v6269_v45 = vcombine.low %v629_v32, %v633_v33 }
  0xb1   :  { %v513_v39 = vld [vmem:[#allocation8 + $0x260] sm:$0xff] }
  0xb2   :  { %v637_v40 = vld [vmem:[#allocation8 + $0x640] sm:$0xff]  ;;  %v6150_v50 = vcombine.high %v509_v38, %v513_v39  ;;  %v6149_v52 = vcombine.low %v509_v38, %v513_v39  ;;  %v443_v38 = vld [vmem:[#allocation8 + $0x30] sm:$0xff] }
  0xb3   :  { %2024 = vmatpush1.bf16.msra.mxu1 %v6109_v12  ;;  %2067 = vmatpush1.bf16.msra.mxu0 %v6237_v13  ;;  %v641_v41 = vld [vmem:[#allocation8 + $0x660] sm:$0xff] }
  0xb4   :  { %2025 = vmatprep.subr.bf16.mxu1 %v6118_v18  ;;  %2068 = vmatprep.subr.bf16.mxu0 %v6246_v19  ;;  %v517_v46 = vld [vmem:[#allocation8 + $0x280] sm:$0xff]  ;;  %v6278_v51 = vcombine.high %v637_v40, %v641_v41  ;;  %v6277_v53 = vcombine.low %v637_v40, %v641_v41 }
  0xb5   :  { %v521_v47 = vld [vmem:[#allocation8 + $0x2a0] sm:$0xff] }
  0xb6   :  { %v645_v48 = vld [vmem:[#allocation8 + $0x680] sm:$0xff]  ;;  %v6158_v58 = vcombine.high %v517_v46, %v521_v47  ;;  %v6157_v60 = vcombine.low %v517_v46, %v521_v47  ;;  %v151_v46 = vld [vmem:[#allocation7] sm:$0xf] }
  0xb7   :  { %2026 = vmatpush1.bf16.msra.mxu1 %v6117_v20  ;;  %2069 = vmatpush1.bf16.msra.mxu0 %v6245_v21  ;;  %v649_v49 = vld [vmem:[#allocation8 + $0x6a0] sm:$0xff] }
  0xb8   :  { %2027 = vmatprep.subr.bf16.mxu1 %v6126_v26  ;;  %2070 = vmatprep.subr.bf16.mxu0 %v6254_v27  ;;  %v525_v54 = vld [vmem:[#allocation8 + $0x2c0] sm:$0xff]  ;;  %v6286_v59 = vcombine.high %v645_v48, %v649_v49  ;;  %v6285_v61 = vcombine.low %v645_v48, %v649_v49 }
  0xb9   :  { %v529_v55 = vld [vmem:[#allocation8 + $0x2e0] sm:$0xff] }
  0xba   :  { %v653_v56 = vld [vmem:[#allocation8 + $0x6c0] sm:$0xff]  ;;  %v6166_v2 = vcombine.high %v525_v54, %v529_v55  ;;  %v6165_v4 = vcombine.low %v525_v54, %v529_v55 }
  0xbb   :  { %2028 = vmatpush1.bf16.msra.mxu1 %v6125_v28  ;;  %2071 = vmatpush1.bf16.msra.mxu0 %v6253_v29  ;;  %v657_v57 = vld [vmem:[#allocation8 + $0x6e0] sm:$0xff] }
  0xbc   :  { %2029 = vmatprep.subr.bf16.mxu1 %v6134_v34  ;;  %2072 = vmatprep.subr.bf16.mxu0 %v6262_v35  ;;  %v533_v62 = vld [vmem:[#allocation8 + $0x300] sm:$0xff]  ;;  %v6294_v3 = vcombine.high %v653_v56, %v657_v57  ;;  %v6293_v5 = vcombine.low %v653_v56, %v657_v57  ;;  %v8030_v34 = vld [vmem:[#allocation8 + $0x8] sm:$0xff] }
  0xbd   :  { %v537_v63 = vld [vmem:[#allocation8 + $0x320] sm:$0xff]  ;;  %v8032_v35 = vld [vmem:[#allocation8 + $0x28] sm:$0xff] }
  0xbe   :  { %v661_v0 = vld [vmem:[#allocation8 + $0x700] sm:$0xff]  ;;  %v6174_v10 = vcombine.high %v533_v62, %v537_v63  ;;  %v6173_v12 = vcombine.low %v533_v62, %v537_v63  ;;  %v6079_v39 = vcombine.low %v8030_v34, %v8032_v35 }
  0xbf   :  { %2030 = vmatpush1.bf16.msra.mxu1 %v6133_v36  ;;  %2073 = vmatpush1.bf16.msra.mxu0 %v6261_v37  ;;  %v665_v1 = vld [vmem:[#allocation8 + $0x720] sm:$0xff]  ;;  %v8034_v36 = vld [vmem:[#allocation8 + $0x10] sm:$0xff]  ;;  %v6080_v37 = vcombine.high %v8030_v34, %v8032_v35 }
  0xc0   :  { %2031 = vmatprep.subr.bf16.mxu1 %v6142_v42  ;;  %2074 = vmatprep.subr.bf16.mxu0 %v6270_v43  ;;  %v541_v6 = vld [vmem:[#allocation8 + $0x340] sm:$0xff]  ;;  %v6302_v11 = vcombine.high %v661_v0, %v665_v1  ;;  %v6301_v13 = vcombine.low %v661_v0, %v665_v1  ;;  %v6081_v40 = vcombine.low %v8034_v36, %v443_v38  ;;  %v153_v42 = vlaneseq  ;;  %v467_v34 = vld [vmem:[#allocation8 + $0xf0] sm:$0xff] }
  0xc1   :  { %v545_v7 = vld [vmem:[#allocation8 + $0x360] sm:$0xff]  ;;  %v6082_v41 = vcombine.high %v8034_v36, %v443_v38 }
  0xc2   :  { %v669_v8 = vld [vmem:[#allocation8 + $0x740] sm:$0xff]  ;;  %v6182_v14 = vcombine.high %v541_v6, %v545_v7  ;;  %v6181_v16 = vcombine.low %v541_v6, %v545_v7  ;;  %v8042_v43 = vshrl.u32 %v153_v42, 7  ;;  %v475_v42 = vld [vmem:[#allocation8 + $0x130] sm:$0xff] }
  0xc3   :  { %2032 = vmatpush1.bf16.msra.mxu1 %v6141_v44  ;;  %2075 = vmatpush1.bf16.msra.mxu0 %v6269_v45  ;;  %v673_v9 = vld [vmem:[#allocation8 + $0x760] sm:$0xff] }
  0xc4   :  { %2033 = vmatprep.subr.bf16.mxu1 %v6150_v50  ;;  %2076 = vmatprep.subr.bf16.mxu0 %v6278_v51  ;;  %v6310_v15 = vcombine.high %v669_v8, %v673_v9  ;;  %v6309_v17 = vcombine.low %v669_v8, %v673_v9  ;;  %v549_v18 = vld [vmem:[#allocation8 + $0x380] sm:$0xff]  ;;  %v8045_v44 = vsub.s32 0, %v8042_v43  ;;  %v8048_v45 = vsub.s32 2, %v8042_v43 }
  0xc5   :  { %v553_v19 = vld [vmem:[#allocation8 + $0x3a0] sm:$0xff]  ;;  %v8051_v47 = vsub.s32 1, %v8042_v43  ;;  %v8054_v48 = vsub.s32 3, %v8042_v43 }
  0xc6   :  { %v677_v20 = vld [vmem:[#allocation8 + $0x780] sm:$0xff]  ;;  %v6190_v21 = vcombine.high %v549_v18, %v553_v19  ;;  %v6189_v23 = vcombine.low %v549_v18, %v553_v19  ;;  %v156_v49 = vrot.slane %v151_v46, %v8045_v44  ;;  %v164_v50 = vrot.slane %v151_v46, %v8048_v45 }
  0xc7   :  { %2034 = vmatpush1.bf16.msra.mxu1 %v6149_v52  ;;  %2077 = vmatpush1.bf16.msra.mxu0 %v6277_v53  ;;  %v681_v22 = vld [vmem:[#allocation8 + $0x7a0] sm:$0xff]  ;;  %v160_v51 = vrot.slane %v151_v46, %v8051_v47  ;;  %v168_v52 = vrot.slane %v151_v46, %v8054_v48 }
  0xc8   :  { %2035 = vmatprep.subr.bf16.mxu1 %v6158_v58  ;;  %2078 = vmatprep.subr.bf16.mxu0 %v6286_v59  ;;  %v6317_v24 = vcombine.low %v677_v20, %v681_v22  ;;  %v6318_v25 = vcombine.high %v677_v20, %v681_v22  ;;  %v557_v26 = vld [vmem:[#allocation8 + $0x3c0] sm:$0xff]  ;;  %v458_v22 = vld [vmem:[#allocation8 + $0xa8] sm:$0xff] }
  0xc9   :  { %v561_v27 = vld [vmem:[#allocation8 + $0x3e0] sm:$0xff] }
  0xca   :  { %v685_v28 = vld [vmem:[#allocation8 + $0x7c0] sm:$0xff]  ;;  %v6198_v29 = vcombine.high %v557_v26, %v561_v27  ;;  %v6197_v31 = vcombine.low %v557_v26, %v561_v27 }
  0xcb   :  { %2036 = vmatpush1.bf16.msra.mxu1 %v6157_v60  ;;  %2079 = vmatpush1.bf16.msra.mxu0 %v6285_v61  ;;  %v689_v30 = vld [vmem:[#allocation8 + $0x7e0] sm:$0xff] }
  0xcc   :  { %2037 = vmatprep.subr.bf16.mxu1 %v6166_v2  ;;  %2080 = vmatprep.subr.bf16.mxu0 %v6294_v3  ;;  %v6325_v32 = vcombine.low %v685_v28, %v689_v30  ;;  %v6326_v33 = vcombine.high %v685_v28, %v689_v30 }
  0xcf   :  { %2038 = vmatpush1.bf16.msra.mxu1 %v6165_v4  ;;  %2081 = vmatpush1.bf16.msra.mxu0 %v6293_v5 }
  0xd0   :  { %2039 = vmatprep.subr.bf16.mxu1 %v6174_v10  ;;  %2082 = vmatprep.subr.bf16.mxu0 %v6302_v11  ;;  %v446_v10 = vld [vmem:[#allocation8 + $0x48] sm:$0xff] }
  0xd1   :  { %v450_v11 = vld [vmem:[#allocation8 + $0x68] sm:$0xff] }
  0xd2   :  { %v6087_v27 = vcombine.low %v446_v10, %v450_v11 }
  0xd3   :  { %2040 = vmatpush1.bf16.msra.mxu1 %v6173_v12  ;;  %2083 = vmatpush1.bf16.msra.mxu0 %v6301_v13  ;;  %v447_v12 = vld [vmem:[#allocation8 + $0x50] sm:$0xff] }
  0xd4   :  { %2041 = vmatprep.subr.bf16.mxu1 %v6182_v14  ;;  %2084 = vmatprep.subr.bf16.mxu0 %v6310_v15 }
  0xd7   :  { %2042 = vmatpush1.bf16.msra.mxu1 %v6181_v16  ;;  %2085 = vmatpush1.bf16.msra.mxu0 %v6309_v17  ;;  %v451_v16 = vld [vmem:[#allocation8 + $0x70] sm:$0xff] }
  0xd8   :  { %2043 = vmatprep.subr.bf16.mxu1 %v6190_v21  ;;  %2086 = vmatprep.subr.bf16.mxu0 %v6318_v25  ;;  %v454_v21 = vld [vmem:[#allocation8 + $0x88] sm:$0xff]  ;;  %v6088_v25 = vcombine.high %v446_v10, %v450_v11  ;;  %v6090_v26 = vcombine.high %v447_v12, %v451_v16  ;;  %v6089_v28 = vcombine.low %v447_v12, %v451_v16 }
  0xd9   :  { %v6095_v35 = vcombine.low %v454_v21, %v458_v22  ;;  %v502_v12 = vld [vmem:[#allocation8 + $0x208] sm:$0xff] }
  0xdb   :  { %2044 = vmatpush1.bf16.msra.mxu1 %v6189_v23  ;;  %2087 = vmatpush1.bf16.msra.mxu0 %v6317_v24  ;;  %v455_v23 = vld [vmem:[#allocation8 + $0x90] sm:$0xff] }
  0xdc   :  { %2045 = vmatprep.subr.bf16.mxu1 %v6198_v29  ;;  %2088 = vmatprep.subr.bf16.mxu0 %v6326_v33  ;;  %v459_v24 = vld [vmem:[#allocation8 + $0xb0] sm:$0xff]  ;;  %v6096_v29 = vcombine.high %v454_v21, %v458_v22 }
  0xdd   :  { %v6098_v30 = vcombine.high %v455_v23, %v459_v24  ;;  %v463_v33 = vld [vmem:[#allocation8 + $0xd0] sm:$0xff]  ;;  %v6097_v36 = vcombine.low %v455_v23, %v459_v24  ;;  %v510_v24 = vld [vmem:[#allocation8 + $0x248] sm:$0xff] }
  0xde   :  { %v6106_v38 = vcombine.high %v463_v33, %v467_v34 }
  0xdf   :  { %2046 = vmatpush1.bf16.msra.mxu1 %v6197_v31  ;;  %2089 = vmatpush1.bf16.msra.mxu0 %v6325_v32  ;;  %v462_v31 = vld [vmem:[#allocation8 + $0xc8] sm:$0xff] }
  0xe0   :  { %2101 = vmatprep.subr.bf16.mxu1 %v6080_v37  ;;  %2187 = vmatprep.subr.bf16.mxu0 %v6082_v41  ;;  %v466_v32 = vld [vmem:[#allocation8 + $0xe8] sm:$0xff]  ;;  %v471_v41 = vld [vmem:[#allocation8 + $0x110] sm:$0xff] }
  0xe1   :  { %v6104_v37 = vcombine.high %v462_v31, %v466_v32  ;;  %v6103_v46 = vcombine.low %v462_v31, %v466_v32  ;;  %v518_v32 = vld [vmem:[#allocation8 + $0x288] sm:$0xff] }
 0x175   :  { %v373_v53 = vpop.f32.mrb[0].mxu0  ;;  %v416_v54 = vpop.f32.mrb[0].mxu1 }
 0x176   :  { %v374_v55 = vadd.f32 %v373_v53, %v156_v49  ;;  %v417_v56 = vadd.f32 %v416_v54, %v164_v50  ;;  %v375_v57 = vpop.f32.mrb[1].mxu0  ;;  %v418_v58 = vpop.f32.mrb[1].mxu1  ;;  %v482_v53 = vld [vmem:[#allocation8 + $0x168] sm:$0xff]  ;;  %v479_v54 = vld [vmem:[#allocation8 + $0x150] sm:$0xff] }
 0x177   :  { %v376_v59 = vadd.f32 %v375_v57, %v160_v51  ;;  %v419_v60 = vadd.f32 %v418_v58, %v168_v52  ;;  %v377_v61 = vpop.f32.mrb[2].mxu0  ;;  %v420_v62 = vpop.f32.mrb[2].mxu1  ;;  %v6113_v57 = vcombine.low %v471_v41, %v475_v42 }
 0x178   :  { %v427_v63 = vmax.f32 %v417_v56, 0.0  ;;  %v378_v0 = vadd.f32 %v377_v61, %v156_v49  ;;  %v421_v1 = vadd.f32 %v420_v62, %v164_v50  ;;  %v379_v2 = vpop.f32.mrb[3].mxu0  ;;  %v422_v3 = vpop.f32.mrb[3].mxu1  ;;  %v425_v7 = vmax.f32 %v374_v55, 0.0  ;;  %v483_v55 = vld [vmem:[#allocation8 + $0x170] sm:$0xff]  ;;  %v490_v61 = vld [vmem:[#allocation8 + $0x1a8] sm:$0xff] }
 0x179   :  { %v428_v4 = vmax.f32 %v419_v60, 0.0  ;;  %v380_v5 = vadd.f32 %v379_v2, %v160_v51  ;;  %v423_v6 = vadd.f32 %v422_v3, %v168_v52  ;;  %v426_v13 = vmax.f32 %v376_v59, 0.0  ;;  %v478_v52 = vld [vmem:[#allocation8 + $0x148] sm:$0xff]  ;;  %v487_v62 = vld [vmem:[#allocation8 + $0x190] sm:$0xff] }
 0x17a   :  { %v429_v8 = vmax.f32 %v378_v0, 0.0  ;;  %v431_v9 = vmax.f32 %v421_v1, 0.0  ;;  %v6105_v49 = vcombine.low %v463_v33, %v467_v34  ;;  %v6114_v51 = vcombine.high %v471_v41, %v475_v42  ;;  %v486_v60 = vld [vmem:[#allocation8 + $0x188] sm:$0xff]  ;;  %v519_v34 = vld [vmem:[#allocation8 + $0x290] sm:$0xff] }
 0x17b   :  { %v430_v14 = vmax.f32 %v380_v5, 0.0  ;;  %v432_v15 = vmax.f32 %v423_v6, 0.0  ;;  %v6120_v58 = vcombine.high %v478_v52, %v482_v53  ;;  %v6122_v59 = vcombine.high %v479_v54, %v483_v55  ;;  %v498_v5 = vld [vmem:[#allocation8 + $0x1e8] sm:$0xff]  ;;  %v495_v6 = vld [vmem:[#allocation8 + $0x1d0] sm:$0xff] }
 0x17c   :  { %v8060_v17 = vpack.c.bf16 %v429_v8, %v425_v7  ;;  %v8062_v18 = vpack.c.bf16 %v431_v9, %v427_v63  ;;  %v491_v63 = vld [vmem:[#allocation8 + $0x1b0] sm:$0xff]  ;;  %v6119_v0 = vcombine.low %v478_v52, %v482_v53  ;;  %v6121_v1 = vcombine.low %v479_v54, %v483_v55  ;;  %v522_v33 = vld [vmem:[#allocation8 + $0x2a8] sm:$0xff] }
 0x17d   :  { %v8064_v19 = vpack.c.bf16 %v430_v14, %v426_v13  ;;  %v8066_v20 = vpack.c.bf16 %v432_v15, %v428_v4  ;;  %v6128_v2 = vcombine.high %v486_v60, %v490_v61  ;;  %v6130_v3 = vcombine.high %v487_v62, %v491_v63  ;;  %v494_v4 = vld [vmem:[#allocation8 + $0x1c8] sm:$0xff]  ;;  %v499_v7 = vld [vmem:[#allocation8 + $0x1f0] sm:$0xff] }
 0x17e   :  { %v6127_v8 = vcombine.low %v486_v60, %v490_v61  ;;  %v6129_v9 = vcombine.low %v487_v62, %v491_v63  ;;  %v6136_v10 = vcombine.high %v494_v4, %v498_v5  ;;  %v6138_v11 = vcombine.high %v495_v6, %v499_v7  ;;  %v506_v13 = vld [vmem:[#allocation8 + $0x228] sm:$0xff]  ;;  %v503_v14 = vld [vmem:[#allocation8 + $0x210] sm:$0xff] }
 0x17f   :  { %2047 = vmatprep.mubr.bf16.mxu1 %v8064_v19  ;;  %2090 = vmatprep.mubr.bf16.mxu0 %v8066_v20  ;;  %v507_v15 = vld [vmem:[#allocation8 + $0x230] sm:$0xff]  ;;  %v6135_v16 = vcombine.low %v494_v4, %v498_v5  ;;  %v6137_v21 = vcombine.low %v495_v6, %v499_v7  ;;  %v6144_v22 = vcombine.high %v502_v12, %v506_v13  ;;  %v530_v41 = vld [vmem:[#allocation8 + $0x2e8] sm:$0xff] }
 0x180   :  { %2048 = vmatmul.mubr.bf16.vlgmr.msra.gmra.mrb[4].mxu1 %v8060_v17  ;;  %2091 = vmatmul.mubr.bf16.vlgmr.msra.gmra.mrb[4].mxu0 %v8062_v18  ;;  %v6146_v23 = vcombine.high %v503_v14, %v507_v15  ;;  %v527_v42 = vld [vmem:[#allocation8 + $0x2d0] sm:$0xff]  ;;  %v534_v53 = vld [vmem:[#allocation8 + $0x308] sm:$0xff] }
 0x181   :  { %2102 = vmatpush1.bf16.msra.mxu1 %v6079_v39  ;;  %2188 = vmatpush1.bf16.msra.mxu0 %v6081_v40  ;;  %v470_v39 = vld [vmem:[#allocation8 + $0x108] sm:$0xff]  ;;  %v535_v55 = vld [vmem:[#allocation8 + $0x310] sm:$0xff] }
 0x182   :  { %2133 = vmatprep.mubr.bf16.mxu1 %v8064_v19  ;;  %2219 = vmatprep.mubr.bf16.mxu0 %v8064_v19  ;;  %v474_v40 = vld [vmem:[#allocation8 + $0x128] sm:$0xff]  ;;  %v543_v63 = vld [vmem:[#allocation8 + $0x350] sm:$0xff] }
 0x183   :  { %2103 = vmatprep.subr.bf16.mxu1 %v6088_v25  ;;  %2189 = vmatprep.subr.bf16.mxu0 %v6090_v26  ;;  %v6112_v50 = vcombine.high %v470_v39, %v474_v40  ;;  %v6111_v56 = vcombine.low %v470_v39, %v474_v40  ;;  %v514_v25 = vld [vmem:[#allocation8 + $0x268] sm:$0xff]  ;;  %v511_v26 = vld [vmem:[#allocation8 + $0x250] sm:$0xff] }
 0x184   :  { %v526_v40 = vld [vmem:[#allocation8 + $0x2c8] sm:$0xff]  ;;  %v551_v7 = vld [vmem:[#allocation8 + $0x390] sm:$0xff] }
 0x185   :  { %2104 = vmatpush1.bf16.msra.mxu1 %v6087_v27  ;;  %2190 = vmatpush1.bf16.msra.mxu0 %v6089_v28  ;;  %v515_v27 = vld [vmem:[#allocation8 + $0x270] sm:$0xff]  ;;  %v6143_v28 = vcombine.low %v502_v12, %v506_v13  ;;  %v538_v54 = vld [vmem:[#allocation8 + $0x328] sm:$0xff] }
 0x186   :  { %2105 = vmatprep.subr.bf16.mxu1 %v6096_v29  ;;  %2191 = vmatprep.subr.bf16.mxu0 %v6098_v30  ;;  %v6145_v29 = vcombine.low %v503_v14, %v507_v15  ;;  %v6152_v30 = vcombine.high %v510_v24, %v514_v25  ;;  %v6154_v31 = vcombine.high %v511_v26, %v515_v27  ;;  %v542_v61 = vld [vmem:[#allocation8 + $0x348] sm:$0xff]  ;;  %v559_v15 = vld [vmem:[#allocation8 + $0x3d0] sm:$0xff] }
 0x187   :  { %v546_v62 = vld [vmem:[#allocation8 + $0x368] sm:$0xff] }
 0x188   :  { %v550_v5 = vld [vmem:[#allocation8 + $0x388] sm:$0xff] }
 0x189   :  { %2106 = vmatpush1.bf16.msra.mxu1 %v6095_v35  ;;  %2192 = vmatpush1.bf16.msra.mxu0 %v6097_v36  ;;  %v523_v35 = vld [vmem:[#allocation8 + $0x2b0] sm:$0xff]  ;;  %v6151_v36 = vcombine.low %v510_v24, %v514_v25  ;;  %v554_v6 = vld [vmem:[#allocation8 + $0x3a8] sm:$0xff] }
 0x18a   :  { %2107 = vmatprep.subr.bf16.mxu1 %v6104_v37  ;;  %2193 = vmatprep.subr.bf16.mxu0 %v6106_v38  ;;  %v6153_v37 = vcombine.low %v511_v26, %v515_v27  ;;  %v6160_v38 = vcombine.high %v518_v32, %v522_v33  ;;  %v6162_v39 = vcombine.high %v519_v34, %v523_v35  ;;  %v558_v13 = vld [vmem:[#allocation8 + $0x3c8] sm:$0xff]  ;;  %v567_v27 = vld [vmem:[#allocation8 + $0x410] sm:$0xff] }
 0x18b   :  { %v562_v14 = vld [vmem:[#allocation8 + $0x3e8] sm:$0xff] }
 0x18c   :  { %v566_v25 = vld [vmem:[#allocation8 + $0x408] sm:$0xff] }
 0x18d   :  { %2108 = vmatpush1.bf16.msra.mxu1 %v6103_v46  ;;  %2194 = vmatpush1.bf16.msra.mxu0 %v6105_v49  ;;  %v531_v46 = vld [vmem:[#allocation8 + $0x2f0] sm:$0xff]  ;;  %v6159_v49 = vcombine.low %v518_v32, %v522_v33  ;;  %v570_v26 = vld [vmem:[#allocation8 + $0x428] sm:$0xff] }
 0x18e   :  { %2109 = vmatprep.subr.bf16.mxu1 %v6112_v50  ;;  %2195 = vmatprep.subr.bf16.mxu0 %v6114_v51  ;;  %v6161_v50 = vcombine.low %v519_v34, %v523_v35  ;;  %v6168_v51 = vcombine.high %v526_v40, %v530_v41  ;;  %v6170_v52 = vcombine.high %v527_v42, %v531_v46  ;;  %v574_v33 = vld [vmem:[#allocation8 + $0x448] sm:$0xff]  ;;  %v575_v35 = vld [vmem:[#allocation8 + $0x450] sm:$0xff] }
 0x18f   :  { %v578_v34 = vld [vmem:[#allocation8 + $0x468] sm:$0xff] }
 0x191   :  { %2110 = vmatpush1.bf16.msra.mxu1 %v6111_v56  ;;  %2196 = vmatpush1.bf16.msra.mxu0 %v6113_v57  ;;  %v539_v56 = vld [vmem:[#allocation8 + $0x330] sm:$0xff]  ;;  %v6167_v57 = vcombine.low %v526_v40, %v530_v41  ;;  %v582_v41 = vld [vmem:[#allocation8 + $0x488] sm:$0xff] }
 0x192   :  { %2111 = vmatprep.subr.bf16.mxu1 %v6120_v58  ;;  %2197 = vmatprep.subr.bf16.mxu0 %v6122_v59  ;;  %v6169_v58 = vcombine.low %v527_v42, %v531_v46  ;;  %v6176_v59 = vcombine.high %v534_v53, %v538_v54  ;;  %v6178_v60 = vcombine.high %v535_v55, %v539_v56  ;;  %v586_v42 = vld [vmem:[#allocation8 + $0x4a8] sm:$0xff]  ;;  %v583_v46 = vld [vmem:[#allocation8 + $0x490] sm:$0xff] }
 0x195   :  { %2112 = vmatpush1.bf16.msra.mxu1 %v6119_v0  ;;  %2198 = vmatpush1.bf16.msra.mxu0 %v6121_v1  ;;  %v547_v0 = vld [vmem:[#allocation8 + $0x370] sm:$0xff]  ;;  %v6175_v1 = vcombine.low %v534_v53, %v538_v54  ;;  %v590_v54 = vld [vmem:[#allocation8 + $0x4c8] sm:$0xff] }
 0x196   :  { %2113 = vmatprep.subr.bf16.mxu1 %v6128_v2  ;;  %2199 = vmatprep.subr.bf16.mxu0 %v6130_v3  ;;  %v6177_v2 = vcombine.low %v535_v55, %v539_v56  ;;  %v6184_v3 = vcombine.high %v542_v61, %v546_v62  ;;  %v6186_v4 = vcombine.high %v543_v63, %v547_v0  ;;  %v594_v55 = vld [vmem:[#allocation8 + $0x4e8] sm:$0xff]  ;;  %v591_v56 = vld [vmem:[#allocation8 + $0x4d0] sm:$0xff] }
 0x199   :  { %2114 = vmatpush1.bf16.msra.mxu1 %v6127_v8  ;;  %2200 = vmatpush1.bf16.msra.mxu0 %v6129_v9  ;;  %v555_v8 = vld [vmem:[#allocation8 + $0x3b0] sm:$0xff]  ;;  %v6183_v9 = vcombine.low %v542_v61, %v546_v62  ;;  %v598_v62 = vld [vmem:[#allocation8 + $0x508] sm:$0xff] }
 0x19a   :  { %2115 = vmatprep.subr.bf16.mxu1 %v6136_v10  ;;  %2201 = vmatprep.subr.bf16.mxu0 %v6138_v11  ;;  %v6185_v10 = vcombine.low %v543_v63, %v547_v0  ;;  %v6192_v11 = vcombine.high %v550_v5, %v554_v6  ;;  %v6194_v12 = vcombine.high %v551_v7, %v555_v8  ;;  %v602_v63 = vld [vmem:[#allocation8 + $0x528] sm:$0xff]  ;;  %v599_v0 = vld [vmem:[#allocation8 + $0x510] sm:$0xff] }
 0x19d   :  { %2116 = vmatpush1.bf16.msra.mxu1 %v6135_v16  ;;  %2202 = vmatpush1.bf16.msra.mxu0 %v6137_v21  ;;  %v563_v16 = vld [vmem:[#allocation8 + $0x3f0] sm:$0xff]  ;;  %v6191_v21 = vcombine.low %v550_v5, %v554_v6  ;;  %v606_v6 = vld [vmem:[#allocation8 + $0x548] sm:$0xff] }
 0x19e   :  { %2117 = vmatprep.subr.bf16.mxu1 %v6144_v22  ;;  %2203 = vmatprep.subr.bf16.mxu0 %v6146_v23  ;;  %v6193_v22 = vcombine.low %v551_v7, %v555_v8  ;;  %v6200_v23 = vcombine.high %v558_v13, %v562_v14  ;;  %v6202_v24 = vcombine.high %v559_v15, %v563_v16  ;;  %v610_v7 = vld [vmem:[#allocation8 + $0x568] sm:$0xff]  ;;  %v607_v8 = vld [vmem:[#allocation8 + $0x550] sm:$0xff] }
 0x1a1   :  { %2118 = vmatpush1.bf16.msra.mxu1 %v6143_v28  ;;  %2204 = vmatpush1.bf16.msra.mxu0 %v6145_v29  ;;  %v571_v28 = vld [vmem:[#allocation8 + $0x430] sm:$0xff]  ;;  %v6199_v29 = vcombine.low %v558_v13, %v562_v14  ;;  %v614_v14 = vld [vmem:[#allocation8 + $0x588] sm:$0xff] }
 0x1a2   :  { %2119 = vmatprep.subr.bf16.mxu1 %v6152_v30  ;;  %2205 = vmatprep.subr.bf16.mxu0 %v6154_v31  ;;  %v6201_v30 = vcombine.low %v559_v15, %v563_v16  ;;  %v6208_v31 = vcombine.high %v566_v25, %v570_v26  ;;  %v6210_v32 = vcombine.high %v567_v27, %v571_v28  ;;  %v618_v15 = vld [vmem:[#allocation8 + $0x5a8] sm:$0xff]  ;;  %v615_v16 = vld [vmem:[#allocation8 + $0x590] sm:$0xff] }
 0x1a5   :  { %2120 = vmatpush1.bf16.msra.mxu1 %v6151_v36  ;;  %2206 = vmatpush1.bf16.msra.mxu0 %v6153_v37  ;;  %v579_v36 = vld [vmem:[#allocation8 + $0x470] sm:$0xff]  ;;  %v6207_v37 = vcombine.low %v566_v25, %v570_v26  ;;  %v622_v26 = vld [vmem:[#allocation8 + $0x5c8] sm:$0xff] }
 0x1a6   :  { %2121 = vmatprep.subr.bf16.mxu1 %v6160_v38  ;;  %2207 = vmatprep.subr.bf16.mxu0 %v6162_v39  ;;  %v6209_v38 = vcombine.low %v567_v27, %v571_v28  ;;  %v6216_v39 = vcombine.high %v574_v33, %v578_v34  ;;  %v6218_v40 = vcombine.high %v575_v35, %v579_v36  ;;  %v626_v27 = vld [vmem:[#allocation8 + $0x5e8] sm:$0xff]  ;;  %v623_v28 = vld [vmem:[#allocation8 + $0x5d0] sm:$0xff] }
 0x1a9   :  { %2122 = vmatpush1.bf16.msra.mxu1 %v6159_v49  ;;  %2208 = vmatpush1.bf16.msra.mxu0 %v6161_v50  ;;  %v587_v49 = vld [vmem:[#allocation8 + $0x4b0] sm:$0xff]  ;;  %v6215_v50 = vcombine.low %v574_v33, %v578_v34  ;;  %v630_v34 = vld [vmem:[#allocation8 + $0x608] sm:$0xff] }
 0x1aa   :  { %2123 = vmatprep.subr.bf16.mxu1 %v6168_v51  ;;  %2209 = vmatprep.subr.bf16.mxu0 %v6170_v52  ;;  %v6217_v51 = vcombine.low %v575_v35, %v579_v36  ;;  %v6224_v52 = vcombine.high %v582_v41, %v586_v42  ;;  %v6226_v53 = vcombine.high %v583_v46, %v587_v49  ;;  %v634_v35 = vld [vmem:[#allocation8 + $0x628] sm:$0xff]  ;;  %v631_v36 = vld [vmem:[#allocation8 + $0x610] sm:$0xff] }
 0x1ad   :  { %2124 = vmatpush1.bf16.msra.mxu1 %v6167_v57  ;;  %2210 = vmatpush1.bf16.msra.mxu0 %v6169_v58  ;;  %v595_v57 = vld [vmem:[#allocation8 + $0x4f0] sm:$0xff]  ;;  %v6223_v58 = vcombine.low %v582_v41, %v586_v42  ;;  %v638_v42 = vld [vmem:[#allocation8 + $0x648] sm:$0xff] }
 0x1ae   :  { %2125 = vmatprep.subr.bf16.mxu1 %v6176_v59  ;;  %2211 = vmatprep.subr.bf16.mxu0 %v6178_v60  ;;  %v6225_v59 = vcombine.low %v583_v46, %v587_v49  ;;  %v6232_v60 = vcombine.high %v590_v54, %v594_v55  ;;  %v6234_v61 = vcombine.high %v591_v56, %v595_v57  ;;  %v642_v46 = vld [vmem:[#allocation8 + $0x668] sm:$0xff]  ;;  %v639_v49 = vld [vmem:[#allocation8 + $0x650] sm:$0xff] }
 0x1b1   :  { %2126 = vmatpush1.bf16.msra.mxu1 %v6175_v1  ;;  %2212 = vmatpush1.bf16.msra.mxu0 %v6177_v2  ;;  %v603_v1 = vld [vmem:[#allocation8 + $0x530] sm:$0xff]  ;;  %v6231_v2 = vcombine.low %v590_v54, %v594_v55  ;;  %v646_v55 = vld [vmem:[#allocation8 + $0x688] sm:$0xff] }
 0x1b2   :  { %2127 = vmatprep.subr.bf16.mxu1 %v6184_v3  ;;  %2213 = vmatprep.subr.bf16.mxu0 %v6186_v4  ;;  %v6233_v3 = vcombine.low %v591_v56, %v595_v57  ;;  %v6240_v4 = vcombine.high %v598_v62, %v602_v63  ;;  %v6242_v5 = vcombine.high %v599_v0, %v603_v1  ;;  %v650_v56 = vld [vmem:[#allocation8 + $0x6a8] sm:$0xff]  ;;  %v647_v57 = vld [vmem:[#allocation8 + $0x690] sm:$0xff] }
 0x1b5   :  { %2128 = vmatpush1.bf16.msra.mxu1 %v6183_v9  ;;  %2214 = vmatpush1.bf16.msra.mxu0 %v6185_v10  ;;  %v611_v9 = vld [vmem:[#allocation8 + $0x570] sm:$0xff]  ;;  %v6239_v10 = vcombine.low %v598_v62, %v602_v63  ;;  %v654_v63 = vld [vmem:[#allocation8 + $0x6c8] sm:$0xff] }
 0x1b6   :  { %2129 = vmatprep.subr.bf16.mxu1 %v6192_v11  ;;  %2215 = vmatprep.subr.bf16.mxu0 %v6194_v12  ;;  %v6241_v11 = vcombine.low %v599_v0, %v603_v1  ;;  %v6248_v12 = vcombine.high %v606_v6, %v610_v7  ;;  %v6250_v13 = vcombine.high %v607_v8, %v611_v9  ;;  %v658_v0 = vld [vmem:[#allocation8 + $0x6e8] sm:$0xff]  ;;  %v655_v1 = vld [vmem:[#allocation8 + $0x6d0] sm:$0xff] }
 0x1b9   :  { %2130 = vmatpush1.bf16.msra.mxu1 %v6191_v21  ;;  %2216 = vmatpush1.bf16.msra.mxu0 %v6193_v22  ;;  %v619_v21 = vld [vmem:[#allocation8 + $0x5b0] sm:$0xff]  ;;  %v6247_v22 = vcombine.low %v606_v6, %v610_v7  ;;  %v662_v7 = vld [vmem:[#allocation8 + $0x708] sm:$0xff] }
 0x1ba   :  { %2131 = vmatprep.subr.bf16.mxu1 %v6200_v23  ;;  %2217 = vmatprep.subr.bf16.mxu0 %v6202_v24  ;;  %v6249_v23 = vcombine.low %v607_v8, %v611_v9  ;;  %v6256_v24 = vcombine.high %v614_v14, %v618_v15  ;;  %v6258_v25 = vcombine.high %v615_v16, %v619_v21  ;;  %v666_v8 = vld [vmem:[#allocation8 + $0x728] sm:$0xff]  ;;  %v663_v9 = vld [vmem:[#allocation8 + $0x710] sm:$0xff] }
 0x1bd   :  { %2132 = vmatpush1.bf16.msra.mxu1 %v6199_v29  ;;  %2218 = vmatpush1.bf16.msra.mxu0 %v6201_v30  ;;  %v627_v29 = vld [vmem:[#allocation8 + $0x5f0] sm:$0xff]  ;;  %v6255_v30 = vcombine.low %v614_v14, %v618_v15  ;;  %v670_v15 = vld [vmem:[#allocation8 + $0x748] sm:$0xff] }
 0x1be   :  { %2144 = vmatprep.subr.bf16.mxu1 %v6208_v31  ;;  %2230 = vmatprep.subr.bf16.mxu0 %v6210_v32  ;;  %v6257_v31 = vcombine.low %v615_v16, %v619_v21  ;;  %v6264_v32 = vcombine.high %v622_v26, %v626_v27  ;;  %v6266_v33 = vcombine.high %v623_v28, %v627_v29  ;;  %v674_v16 = vld [vmem:[#allocation8 + $0x768] sm:$0xff]  ;;  %v671_v21 = vld [vmem:[#allocation8 + $0x750] sm:$0xff] }
 0x1c0   :  { %2134 = vmatmul.mubr.bf16.vlgmr.msra.gmra.mrb[8].mxu1 %v8060_v17  ;;  %2220 = vmatmul.mubr.bf16.vlgmr.msra.gmra.mrb[8].mxu0 %v8060_v17 }
 0x1c1   :  { %2145 = vmatpush1.bf16.msra.mxu1 %v6207_v37  ;;  %2176 = vmatprep.mubr.bf16.mxu1 %v8066_v20  ;;  %v635_v37 = vld [vmem:[#allocation8 + $0x630] sm:$0xff] }
 0x1c2   :  { %2231 = vmatpush1.bf16.msra.mxu0 %v6209_v38  ;;  %2262 = vmatprep.mubr.bf16.mxu0 %v8066_v20  ;;  %v6263_v38 = vcombine.low %v622_v26, %v626_v27  ;;  %v6274_v41 = vcombine.high %v631_v36, %v635_v37  ;;  %v678_v27 = vld [vmem:[#allocation8 + $0x788] sm:$0xff] }
 0x1c3   :  { %2146 = vmatprep.subr.bf16.mxu1 %v6216_v39  ;;  %2232 = vmatprep.subr.bf16.mxu0 %v6218_v40  ;;  %v6265_v39 = vcombine.low %v623_v28, %v627_v29  ;;  %v6272_v40 = vcombine.high %v630_v34, %v634_v35  ;;  %v682_v28 = vld [vmem:[#allocation8 + $0x7a8] sm:$0xff]  ;;  %v679_v29 = vld [vmem:[#allocation8 + $0x790] sm:$0xff] }
 0x1c5   :  { %2147 = vmatpush1.bf16.msra.mxu1 %v6215_v50  ;;  %v643_v50 = vld [vmem:[#allocation8 + $0x670] sm:$0xff] }
 0x1c6   :  { %2233 = vmatpush1.bf16.msra.mxu0 %v6217_v51  ;;  %2148 = vmatprep.subr.bf16.mxu1 %v6224_v52  ;;  %v6271_v51 = vcombine.low %v630_v34, %v634_v35  ;;  %v6273_v52 = vcombine.low %v631_v36, %v635_v37  ;;  %v6282_v54 = vcombine.high %v639_v49, %v643_v50  ;;  %v686_v35 = vld [vmem:[#allocation8 + $0x7c8] sm:$0xff]  ;;  %v687_v37 = vld [vmem:[#allocation8 + $0x7d0] sm:$0xff] }
 0x1c7   :  { %2234 = vmatprep.subr.bf16.mxu0 %v6226_v53  ;;  %v6280_v53 = vcombine.high %v638_v42, %v642_v46  ;;  %v690_v36 = vld [vmem:[#allocation8 + $0x7e8] sm:$0xff] }
 0x1c9   :  { %2149 = vmatpush1.bf16.msra.mxu1 %v6223_v58  ;;  %v651_v58 = vld [vmem:[#allocation8 + $0x6b0] sm:$0xff] }
 0x1ca   :  { %2235 = vmatpush1.bf16.msra.mxu0 %v6225_v59  ;;  %2150 = vmatprep.subr.bf16.mxu1 %v6232_v60  ;;  %v6279_v59 = vcombine.low %v638_v42, %v642_v46  ;;  %v6281_v60 = vcombine.low %v639_v49, %v643_v50  ;;  %v6290_v62 = vcombine.high %v647_v57, %v651_v58  ;;  %v440_v46 = vld [vmem:[#allocation8 + $0x18] sm:$0xff] }
 0x1cb   :  { %2236 = vmatprep.subr.bf16.mxu0 %v6234_v61  ;;  %v6288_v61 = vcombine.high %v646_v55, %v650_v56  ;;  %v444_v49 = vld [vmem:[#allocation8 + $0x38] sm:$0xff]  ;;  %v6327_v50 = vcombine.low %v686_v35, %v690_v36 }
 0x1cd   :  { %2151 = vmatpush1.bf16.msra.mxu1 %v6231_v2  ;;  %v659_v2 = vld [vmem:[#allocation8 + $0x6f0] sm:$0xff] }
 0x1ce   :  { %2237 = vmatpush1.bf16.msra.mxu0 %v6233_v3  ;;  %2152 = vmatprep.subr.bf16.mxu1 %v6240_v4  ;;  %v6287_v3 = vcombine.low %v646_v55, %v650_v56  ;;  %v6289_v4 = vcombine.low %v647_v57, %v651_v58  ;;  %v6298_v6 = vcombine.high %v655_v1, %v659_v2  ;;  %v7033_v55 = vld [vmem:[#allocation11 + $0x4] ss:$28 sps:$4 sm:$0xff]   ;;  %v456_v58 = vld [vmem:[#allocation8 + $0x98] sm:$0xff] }
 0x1cf   :  { %2238 = vmatprep.subr.bf16.mxu0 %v6242_v5  ;;  %v6296_v5 = vcombine.high %v654_v63, %v658_v0  ;;  %v6083_v56 = vcombine.low %v440_v46, %v444_v49 }
 0x1d1   :  { %2153 = vmatpush1.bf16.msra.mxu1 %v6239_v10  ;;  %v667_v10 = vld [vmem:[#allocation8 + $0x730] sm:$0xff] }
 0x1d2   :  { %2239 = vmatpush1.bf16.msra.mxu0 %v6241_v11  ;;  %2154 = vmatprep.subr.bf16.mxu1 %v6248_v12  ;;  %v6295_v11 = vcombine.low %v654_v63, %v658_v0  ;;  %v6297_v12 = vcombine.low %v655_v1, %v659_v2  ;;  %v6306_v14 = vcombine.high %v663_v9, %v667_v10  ;;  %v464_v0 = vld [vmem:[#allocation8 + $0xd8] sm:$0xff] }
 0x1d3   :  { %2240 = vmatprep.subr.bf16.mxu0 %v6250_v13  ;;  %v6304_v13 = vcombine.high %v662_v7, %v666_v8  ;;  %v468_v1 = vld [vmem:[#allocation8 + $0xf8] sm:$0xff] }
 0x1d4   :  { %v7034_v2 = vld [vmem:[#allocation11 + $0x38] ss:$28 sps:$4 sm:$0xff]  }
 0x1d5   :  { %2155 = vmatpush1.bf16.msra.mxu1 %v6247_v22  ;;  %v675_v22 = vld [vmem:[#allocation8 + $0x770] sm:$0xff] }
 0x1d6   :  { %2241 = vmatpush1.bf16.msra.mxu0 %v6249_v23  ;;  %2156 = vmatprep.subr.bf16.mxu1 %v6256_v24  ;;  %v6303_v23 = vcombine.low %v662_v7, %v666_v8  ;;  %v6305_v24 = vcombine.low %v663_v9, %v667_v10  ;;  %v6314_v26 = vcombine.high %v671_v21, %v675_v22  ;;  %v476_v7 = vld [vmem:[#allocation8 + $0x138] sm:$0xff]  ;;  %v7042_v9 = vld [vmem:[#allocation11 + $0xac] ss:$28 sps:$4 sm:$0xff]  }
 0x1d7   :  { %2242 = vmatprep.subr.bf16.mxu0 %v6258_v25  ;;  %v6312_v25 = vcombine.high %v670_v15, %v674_v16  ;;  %v7037_v8 = vld [vmem:[#allocation11 + $0x70] ss:$28 sps:$4 sm:$0xff]  }
 0x1d9   :  { %2157 = vmatpush1.bf16.msra.mxu1 %v6255_v30  ;;  %v683_v30 = vld [vmem:[#allocation8 + $0x7b0] sm:$0xff] }
 0x1da   :  { %2243 = vmatpush1.bf16.msra.mxu0 %v6257_v31  ;;  %2158 = vmatprep.subr.bf16.mxu1 %v6264_v32  ;;  %v6311_v31 = vcombine.low %v670_v15, %v674_v16  ;;  %v6313_v32 = vcombine.low %v671_v21, %v675_v22  ;;  %v6322_v34 = vcombine.high %v679_v29, %v683_v30  ;;  %v488_v21 = vld [vmem:[#allocation8 + $0x198] sm:$0xff] }
 0x1db   :  { %2244 = vmatprep.subr.bf16.mxu0 %v6266_v33  ;;  %v6320_v33 = vcombine.high %v678_v27, %v682_v28  ;;  %v492_v22 = vld [vmem:[#allocation8 + $0x1b8] sm:$0xff] }
 0x1dd   :  { %2159 = vmatpush1.bf16.msra.mxu1 %v6263_v38  ;;  %v691_v38 = vld [vmem:[#allocation8 + $0x7f0] sm:$0xff] }
 0x1de   :  { %2245 = vmatpush1.bf16.msra.mxu0 %v6265_v39  ;;  %2160 = vmatprep.subr.bf16.mxu1 %v6272_v40  ;;  %v6319_v39 = vcombine.low %v678_v27, %v682_v28  ;;  %v6321_v40 = vcombine.low %v679_v29, %v683_v30  ;;  %v6330_v42 = vcombine.high %v687_v37, %v691_v38  ;;  %v496_v27 = vld [vmem:[#allocation8 + $0x1d8] sm:$0xff] }
 0x1df   :  { %2246 = vmatprep.subr.bf16.mxu0 %v6274_v41  ;;  %v6328_v41 = vcombine.high %v686_v35, %v690_v36  ;;  %v500_v28 = vld [vmem:[#allocation8 + $0x1f8] sm:$0xff]  ;;  %v7054_v36 = vld [vmem:[#allocation11 + $0x18c] ss:$28 sps:$4 sm:$0xff]  }
 0x1e0   :  { %v7046_v29 = vld [vmem:[#allocation11 + $0x118] ss:$28 sps:$4 sm:$0xff]   ;;  %v7049_v35 = vld [vmem:[#allocation11 + $0x150] ss:$28 sps:$4 sm:$0xff]  }
 0x1e1   :  { %2161 = vmatpush1.bf16.msra.mxu1 %v6271_v51  ;;  %v6329_v51 = vcombine.low %v687_v37, %v691_v38  ;;  %v7051_v30 = vld [vmem:[#allocation11 + $0x154] ss:$28 sps:$4 sm:$0xff]   ;;  %v6139_v37 = vcombine.low %v496_v27, %v500_v28 }
 0x1e2   :  { %2247 = vmatpush1.bf16.msra.mxu0 %v6273_v52  ;;  %2162 = vmatprep.subr.bf16.mxu1 %v6280_v53  ;;  %v6084_v52 = vcombine.high %v440_v46, %v444_v49  ;;  %v448_v53 = vld [vmem:[#allocation8 + $0x58] sm:$0xff] }
 0x1e3   :  { %2248 = vmatprep.subr.bf16.mxu0 %v6282_v54  ;;  %v452_v54 = vld [vmem:[#allocation8 + $0x78] sm:$0xff] }
 0x1e4   :  { %v6092_v57 = vcombine.high %v448_v53, %v452_v54 }
 0x1e5   :  { %2163 = vmatpush1.bf16.msra.mxu1 %v6279_v59  ;;  %v460_v59 = vld [vmem:[#allocation8 + $0xb8] sm:$0xff] }
 0x1e6   :  { %2249 = vmatpush1.bf16.msra.mxu0 %v6281_v60  ;;  %2164 = vmatprep.subr.bf16.mxu1 %v6288_v61  ;;  %v7031_v60 = vld [vmem:[#allocation11] ss:$28 sps:$4 sm:$0xff]   ;;  %v6100_v63 = vcombine.high %v456_v58, %v460_v59 }
 0x1e7   :  { %2250 = vmatprep.subr.bf16.mxu0 %v6290_v62  ;;  %v7036_v61 = vld [vmem:[#allocation11 + $0x3c] ss:$28 sps:$4 sm:$0xff]   ;;  %v6091_v62 = vcombine.low %v448_v53, %v452_v54 }
 0x1e8   :  { %v7060_v53 = vld [vmem:[#allocation11 + $0x1fc] ss:$28 sps:$4 sm:$0xff]  }
 0x1e9   :  { %2165 = vmatpush1.bf16.msra.mxu1 %v6287_v3  ;;  %v7039_v3 = vld [vmem:[#allocation11 + $0x74] ss:$28 sps:$4 sm:$0xff]  }
 0x1ea   :  { %2251 = vmatpush1.bf16.msra.mxu0 %v6289_v4  ;;  %2166 = vmatprep.subr.bf16.mxu1 %v6296_v5  ;;  %v6099_v4 = vcombine.low %v456_v58, %v460_v59  ;;  %v6108_v5 = vcombine.high %v464_v0, %v468_v1  ;;  %v7058_v58 = vld [vmem:[#allocation11 + $0x1f8] ss:$28 sps:$4 sm:$0xff]  }
 0x1eb   :  { %2252 = vmatprep.subr.bf16.mxu0 %v6298_v6  ;;  %v472_v6 = vld [vmem:[#allocation8 + $0x118] sm:$0xff] }
 0x1ec   :  { %v6116_v10 = vcombine.high %v472_v6, %v476_v7  ;;  %v6115_v15 = vcombine.low %v472_v6, %v476_v7  ;;  %v7063_v59 = vld [vmem:[#allocation11 + $0x234] ss:$28 sps:$4 sm:$0xff]   ;;  %v7064_v6 = vld [vmem:[#allocation11 + $0x268] ss:$28 sps:$4 sm:$0xff]  }
 0x1ed   :  { %2167 = vmatpush1.bf16.msra.mxu1 %v6295_v11  ;;  %v480_v11 = vld [vmem:[#allocation8 + $0x158] sm:$0xff]  ;;  %v7069_v7 = vld [vmem:[#allocation11 + $0x2a4] ss:$28 sps:$4 sm:$0xff]  }
 0x1ee   :  { %2253 = vmatpush1.bf16.msra.mxu0 %v6297_v12  ;;  %2168 = vmatprep.subr.bf16.mxu1 %v6304_v13  ;;  %v484_v12 = vld [vmem:[#allocation8 + $0x178] sm:$0xff]  ;;  %v7040_v13 = vld [vmem:[#allocation11 + $0xa8] ss:$28 sps:$4 sm:$0xff]  }
 0x1ef   :  { %2254 = vmatprep.subr.bf16.mxu0 %v6306_v14  ;;  %v7045_v14 = vld [vmem:[#allocation11 + $0xe4] ss:$28 sps:$4 sm:$0xff]   ;;  %v6124_v16 = vcombine.high %v480_v11, %v484_v12 }
 0x1f1   :  { %2169 = vmatpush1.bf16.msra.mxu1 %v6303_v23  ;;  %v7043_v23 = vld [vmem:[#allocation11 + $0xe0] ss:$28 sps:$4 sm:$0xff]  }
 0x1f2   :  { %2255 = vmatpush1.bf16.msra.mxu0 %v6305_v24  ;;  %2170 = vmatprep.subr.bf16.mxu1 %v6312_v25  ;;  %v7048_v24 = vld [vmem:[#allocation11 + $0x11c] ss:$28 sps:$4 sm:$0xff]   ;;  %v6123_v25 = vcombine.low %v480_v11, %v484_v12 }
 0x1f3   :  { %2256 = vmatprep.subr.bf16.mxu0 %v6314_v26  ;;  %v6132_v26 = vcombine.high %v488_v21, %v492_v22  ;;  %v7067_v11 = vld [vmem:[#allocation11 + $0x2a0] ss:$28 sps:$4 sm:$0xff]  }
 0x1f4   :  { %v7072_v12 = vld [vmem:[#allocation11 + $0x2dc] ss:$28 sps:$4 sm:$0xff]  }
 0x1f5   :  { %2171 = vmatpush1.bf16.msra.mxu1 %v6311_v31  ;;  %v6131_v31 = vcombine.low %v488_v21, %v492_v22  ;;  %v7070_v21 = vld [vmem:[#allocation11 + $0x2d8] ss:$28 sps:$4 sm:$0xff]  }
 0x1f6   :  { %2257 = vmatpush1.bf16.msra.mxu0 %v6313_v32  ;;  %2172 = vmatprep.subr.bf16.mxu1 %v6320_v33  ;;  %v6140_v32 = vcombine.high %v496_v27, %v500_v28  ;;  %v504_v33 = vld [vmem:[#allocation8 + $0x218] sm:$0xff]  ;;  %v7078_v28 = vld [vmem:[#allocation11 + $0x34c] ss:$28 sps:$4 sm:$0xff]  }
 0x1f7   :  { %2258 = vmatprep.subr.bf16.mxu0 %v6322_v34  ;;  %v508_v34 = vld [vmem:[#allocation8 + $0x238] sm:$0xff] }
 0x1f8   :  { %v6148_v38 = vcombine.high %v504_v33, %v508_v34  ;;  %v6147_v46 = vcombine.low %v504_v33, %v508_v34  ;;  %v7075_v22 = vld [vmem:[#allocation11 + $0x314] ss:$28 sps:$4 sm:$0xff]   ;;  %v7076_v33 = vld [vmem:[#allocation11 + $0x348] ss:$28 sps:$4 sm:$0xff]  }
 0x1f9   :  { %2173 = vmatpush1.bf16.msra.mxu1 %v6319_v39  ;;  %v512_v39 = vld [vmem:[#allocation8 + $0x258] sm:$0xff]  ;;  %v7105_v34 = vld [vmem:[#allocation11 + $0x384] ss:$28 sps:$4 sm:$0xff]  }
 0x1fa   :  { %2259 = vmatpush1.bf16.msra.mxu0 %v6321_v40  ;;  %2174 = vmatprep.subr.bf16.mxu1 %v6328_v41  ;;  %v516_v40 = vld [vmem:[#allocation8 + $0x278] sm:$0xff]  ;;  %v7052_v41 = vld [vmem:[#allocation11 + $0x188] ss:$28 sps:$4 sm:$0xff]  }
 0x1fb   :  { %2260 = vmatprep.subr.bf16.mxu0 %v6330_v42  ;;  %v7057_v42 = vld [vmem:[#allocation11 + $0x1c4] ss:$28 sps:$4 sm:$0xff]   ;;  %v6156_v49 = vcombine.high %v512_v39, %v516_v40  ;;  %v6155_v54 = vcombine.low %v512_v39, %v516_v40  ;;  %v7073_v27 = vld [vmem:[#allocation11 + $0x310] ss:$28 sps:$4 sm:$0xff]  }
 0x1fd   :  { %2175 = vmatpush1.bf16.msra.mxu1 %v6327_v50  ;;  %v520_v50 = vld [vmem:[#allocation8 + $0x298] sm:$0xff] }
 0x1fe   :  { %2261 = vmatpush1.bf16.msra.mxu0 %v6329_v51  ;;  %2273 = vmatprep.subr.bf16.mxu1 %v6084_v52  ;;  %v524_v51 = vld [vmem:[#allocation8 + $0x2b8] sm:$0xff]  ;;  %v7055_v52 = vld [vmem:[#allocation11 + $0x1c0] ss:$28 sps:$4 sm:$0xff]  }
 0x1ff   :  { %5236 = vmatprep.subr.bf16.mxu0 %v7033_v55  ;;  %v6164_v55 = vcombine.high %v520_v50, %v524_v51 }
 0x200   :  { %2177 = vmatmul.mubr.bf16.vlgmr.msra.gmra.mrb[8].mxu1 %v8062_v18 }
 0x201   :  { %2263 = vmatmul.mubr.bf16.vlgmr.msra.gmra.mrb[8].mxu0 %v8062_v18  ;;  %2274 = vmatpush1.bf16.msra.mxu1 %v6083_v56  ;;  %v528_v56 = vld [vmem:[#allocation8 + $0x2d8] sm:$0xff] }
 0x202   :  { %2305 = vmatprep.mubr.bf16.mxu1 %v8064_v19  ;;  %2275 = vmatprep.subr.bf16.mxu1 %v6092_v57  ;;  %v6107_v19 = vcombine.low %v464_v0, %v468_v1  ;;  %v532_v57 = vld [vmem:[#allocation8 + $0x2f8] sm:$0xff]  ;;  %v7066_v1 = vld [vmem:[#allocation11 + $0x26c] ss:$28 sps:$4 sm:$0xff]  }
 0x203   :  { %5237 = vmatpush1.bf16.msra.mxu0 %v7031_v60  ;;  %v6163_v60 = vcombine.low %v520_v50, %v524_v51  ;;  %v7061_v0 = vld [vmem:[#allocation11 + $0x230] ss:$28 sps:$4 sm:$0xff]  }
 0x204   :  { %5238 = vmatprep.subr.bf16.mxu0 %v7036_v61  ;;  %v6172_v61 = vcombine.high %v528_v56, %v532_v57  ;;  %v600_v50 = vld [vmem:[#allocation8 + $0x518] sm:$0xff] }
 0x205   :  { %2276 = vmatpush1.bf16.msra.mxu1 %v6091_v62  ;;  %v536_v62 = vld [vmem:[#allocation8 + $0x318] sm:$0xff] }
 0x206   :  { %2277 = vmatprep.subr.bf16.mxu1 %v6100_v63  ;;  %v540_v63 = vld [vmem:[#allocation8 + $0x338] sm:$0xff] }
 0x207   :  { %5239 = vmatpush1.bf16.msra.mxu0 %v7034_v2  ;;  %v6171_v2 = vcombine.low %v528_v56, %v532_v57  ;;  %v604_v51 = vld [vmem:[#allocation8 + $0x538] sm:$0xff] }
 0x208   :  { %5240 = vmatprep.subr.bf16.mxu0 %v7039_v3  ;;  %v6180_v3 = vcombine.high %v536_v62, %v540_v63  ;;  %v616_v57 = vld [vmem:[#allocation8 + $0x598] sm:$0xff] }
 0x209   :  { %2278 = vmatpush1.bf16.msra.mxu1 %v6099_v4  ;;  %v544_v4 = vld [vmem:[#allocation8 + $0x358] sm:$0xff] }
 0x20a   :  { %2279 = vmatprep.subr.bf16.mxu1 %v6108_v5  ;;  %v548_v5 = vld [vmem:[#allocation8 + $0x378] sm:$0xff] }
 0x20b   :  { %5241 = vmatpush1.bf16.msra.mxu0 %v7037_v8  ;;  %v6179_v8 = vcombine.low %v536_v62, %v540_v63 }
 0x20c   :  { %5242 = vmatprep.subr.bf16.mxu0 %v7042_v9  ;;  %v6188_v9 = vcombine.high %v544_v4, %v548_v5 }
 0x20d   :  { %2280 = vmatpush1.bf16.msra.mxu1 %v6107_v19  ;;  %v552_v19 = vld [vmem:[#allocation8 + $0x398] sm:$0xff] }
 0x20e   :  { %2281 = vmatprep.subr.bf16.mxu1 %v6116_v10  ;;  %v556_v10 = vld [vmem:[#allocation8 + $0x3b8] sm:$0xff] }
 0x20f   :  { %5243 = vmatpush1.bf16.msra.mxu0 %v7040_v13  ;;  %v6187_v13 = vcombine.low %v544_v4, %v548_v5 }
 0x210   :  { %5244 = vmatprep.subr.bf16.mxu0 %v7045_v14  ;;  %v6196_v14 = vcombine.high %v552_v19, %v556_v10 }
 0x211   :  { %2282 = vmatpush1.bf16.msra.mxu1 %v6115_v15  ;;  %v560_v15 = vld [vmem:[#allocation8 + $0x3d8] sm:$0xff] }
 0x212   :  { %2283 = vmatprep.subr.bf16.mxu1 %v6124_v16  ;;  %v564_v16 = vld [vmem:[#allocation8 + $0x3f8] sm:$0xff] }
 0x213   :  { %5245 = vmatpush1.bf16.msra.mxu0 %v7043_v23  ;;  %v6195_v23 = vcombine.low %v552_v19, %v556_v10 }
 0x214   :  { %5246 = vmatprep.subr.bf16.mxu0 %v7048_v24  ;;  %v6204_v24 = vcombine.high %v560_v15, %v564_v16 }
 0x215   :  { %2284 = vmatpush1.bf16.msra.mxu1 %v6123_v25  ;;  %v568_v25 = vld [vmem:[#allocation8 + $0x418] sm:$0xff] }
 0x216   :  { %2285 = vmatprep.subr.bf16.mxu1 %v6132_v26  ;;  %v572_v26 = vld [vmem:[#allocation8 + $0x438] sm:$0xff] }
 0x217   :  { %5247 = vmatpush1.bf16.msra.mxu0 %v7046_v29  ;;  %v6203_v29 = vcombine.low %v560_v15, %v564_v16  ;;  %v632_v16 = vld [vmem:[#allocation8 + $0x618] sm:$0xff] }
 0x218   :  { %5248 = vmatprep.subr.bf16.mxu0 %v7051_v30  ;;  %v6212_v30 = vcombine.high %v568_v25, %v572_v26 }
 0x219   :  { %2286 = vmatpush1.bf16.msra.mxu1 %v6131_v31  ;;  %v576_v31 = vld [vmem:[#allocation8 + $0x458] sm:$0xff] }
 0x21a   :  { %2287 = vmatprep.subr.bf16.mxu1 %v6140_v32  ;;  %v580_v32 = vld [vmem:[#allocation8 + $0x478] sm:$0xff] }
 0x21b   :  { %5249 = vmatpush1.bf16.msra.mxu0 %v7049_v35  ;;  %v6211_v35 = vcombine.low %v568_v25, %v572_v26  ;;  %v6219_v39 = vcombine.low %v576_v31, %v580_v32 }
 0x21c   :  { %5250 = vmatprep.subr.bf16.mxu0 %v7054_v36  ;;  %v6220_v36 = vcombine.high %v576_v31, %v580_v32  ;;  %v644_v31 = vld [vmem:[#allocation8 + $0x678] sm:$0xff] }
 0x21d   :  { %2288 = vmatpush1.bf16.msra.mxu1 %v6139_v37  ;;  %v584_v37 = vld [vmem:[#allocation8 + $0x498] sm:$0xff] }
 0x21e   :  { %2289 = vmatprep.subr.bf16.mxu1 %v6148_v38  ;;  %v588_v38 = vld [vmem:[#allocation8 + $0x4b8] sm:$0xff] }
 0x21f   :  { %5251 = vmatpush1.bf16.msra.mxu0 %v7052_v41  ;;  %v6228_v40 = vcombine.high %v584_v37, %v588_v38  ;;  %v592_v41 = vld [vmem:[#allocation8 + $0x4d8] sm:$0xff] }
 0x220   :  { %5252 = vmatprep.subr.bf16.mxu0 %v7057_v42  ;;  %v596_v42 = vld [vmem:[#allocation8 + $0x4f8] sm:$0xff] }
 0x221   :  { %2290 = vmatpush1.bf16.msra.mxu1 %v6147_v46  ;;  %v6227_v46 = vcombine.low %v584_v37, %v588_v38  ;;  %v7111_v37 = vld [vmem:[#allocation11 + $0x3bc] ss:$28 sps:$4 sm:$0xff]   ;;  %v648_v38 = vld [vmem:[#allocation8 + $0x698] sm:$0xff] }
 0x222   :  { %2291 = vmatprep.subr.bf16.mxu1 %v6156_v49  ;;  %v6236_v49 = vcombine.high %v592_v41, %v596_v42 }
 0x223   :  { %5253 = vmatpush1.bf16.msra.mxu0 %v7055_v52  ;;  %v6235_v52 = vcombine.low %v592_v41, %v596_v42  ;;  %v7109_v41 = vld [vmem:[#allocation11 + $0x3b8] ss:$28 sps:$4 sm:$0xff]  }
 0x224   :  { %5254 = vmatprep.subr.bf16.mxu0 %v7060_v53  ;;  %v6244_v53 = vcombine.high %v600_v50, %v604_v51 }
 0x225   :  { %2292 = vmatpush1.bf16.msra.mxu1 %v6155_v54  ;;  %v612_v54 = vld [vmem:[#allocation8 + $0x578] sm:$0xff] }
 0x226   :  { %2293 = vmatprep.subr.bf16.mxu1 %v6164_v55  ;;  %v6243_v55 = vcombine.low %v600_v50, %v604_v51  ;;  %v660_v50 = vld [vmem:[#allocation8 + $0x6f8] sm:$0xff] }
 0x227   :  { %5255 = vmatpush1.bf16.msra.mxu0 %v7058_v58  ;;  %v620_v58 = vld [vmem:[#allocation8 + $0x5b8] sm:$0xff] }
 0x228   :  { %5256 = vmatprep.subr.bf16.mxu0 %v7063_v59  ;;  %v6260_v62 = vcombine.high %v616_v57, %v620_v58 }
 0x229   :  { %2294 = vmatpush1.bf16.msra.mxu1 %v6163_v60 }
 0x22a   :  { %2295 = vmatprep.subr.bf16.mxu1 %v6172_v61 }
 0x22b   :  { %5257 = vmatpush1.bf16.msra.mxu0 %v7061_v0 }
 0x22c   :  { %5258 = vmatprep.subr.bf16.mxu0 %v7066_v1  ;;  %v624_v1 = vld [vmem:[#allocation8 + $0x5d8] sm:$0xff] }
 0x22d   :  { %2296 = vmatpush1.bf16.msra.mxu1 %v6171_v2  ;;  %v628_v2 = vld [vmem:[#allocation8 + $0x5f8] sm:$0xff] }
 0x22e   :  { %2297 = vmatprep.subr.bf16.mxu1 %v6180_v3 }
 0x22f   :  { %5259 = vmatpush1.bf16.msra.mxu0 %v7064_v6 }
 0x230   :  { %5260 = vmatprep.subr.bf16.mxu0 %v7069_v7 }
 0x231   :  { %2298 = vmatpush1.bf16.msra.mxu1 %v6179_v8 }
 0x232   :  { %2299 = vmatprep.subr.bf16.mxu1 %v6188_v9  ;;  %v6259_v9 = vcombine.low %v616_v57, %v620_v58  ;;  %v7121_v57 = vld [vmem:[#allocation11 + $0x428] ss:$28 sps:$4 sm:$0xff]  }
 0x233   :  { %5261 = vmatpush1.bf16.msra.mxu0 %v7067_v11 }
 0x234   :  { %5262 = vmatprep.subr.bf16.mxu0 %v7072_v12 }
 0x235   :  { %2300 = vmatpush1.bf16.msra.mxu1 %v6187_v13  ;;  %v6268_v13 = vcombine.high %v624_v1, %v628_v2 }
 0x236   :  { %2301 = vmatprep.subr.bf16.mxu1 %v6196_v14 }
 0x237   :  { %5263 = vmatpush1.bf16.msra.mxu0 %v7070_v21  ;;  %v636_v21 = vld [vmem:[#allocation8 + $0x638] sm:$0xff] }
 0x238   :  { %5264 = vmatprep.subr.bf16.mxu0 %v7075_v22 }
 0x239   :  { %2302 = vmatpush1.bf16.msra.mxu1 %v6195_v23 }
 0x23a   :  { %2303 = vmatprep.subr.bf16.mxu1 %v6204_v24  ;;  %v6267_v24 = vcombine.low %v624_v1, %v628_v2  ;;  %v7135_v1 = vld [vmem:[#allocation11 + $0x49c] ss:$28 sps:$4 sm:$0xff]   ;;  %v680_v2 = vld [vmem:[#allocation8 + $0x798] sm:$0xff] }
 0x23b   :  { %5265 = vmatpush1.bf16.msra.mxu0 %v7073_v27  ;;  %v6276_v27 = vcombine.high %v632_v16, %v636_v21 }
 0x23c   :  { %5266 = vmatprep.subr.bf16.mxu0 %v7078_v28 }
 0x23d   :  { %2304 = vmatpush1.bf16.msra.mxu1 %v6203_v29 }
 0x23e   :  { %2316 = vmatprep.subr.bf16.mxu1 %v6212_v30  ;;  %v640_v30 = vld [vmem:[#allocation8 + $0x658] sm:$0xff] }
 0x23f   :  { %5267 = vmatpush1.bf16.msra.mxu0 %v7076_v33 }
 0x240   :  { %2306 = vmatmul.mubr.bf16.vlgmr.msra.gmra.mrb[12].mxu1 %v8060_v17  ;;  %5279 = vmatprep.subr.bf16.mxu0 %v7105_v34  ;;  %v608_v17 = vld [vmem:[#allocation8 + $0x558] sm:$0xff]  ;;  %v6275_v34 = vcombine.low %v632_v16, %v636_v21  ;;  %v7153_v16 = vld [vmem:[#allocation11 + $0x544] ss:$28 sps:$4 sm:$0xff]  }
 0x241   :  { %2317 = vmatpush1.bf16.msra.mxu1 %v6211_v35  ;;  %2348 = vmatprep.mubr.bf16.mxu1 %v8066_v20  ;;  %v8083_v20 = vld [vmem:[#allocation10] sm:$0xff]  ;;  %v6252_v56 = vcombine.high %v608_v17, %v612_v54  ;;  %v6251_v60 = vcombine.low %v608_v17, %v612_v54  ;;  %v7123_v17 = vld [vmem:[#allocation11 + $0x42c] ss:$28 sps:$4 sm:$0xff]   ;;  %v664_v54 = vld [vmem:[#allocation8 + $0x718] sm:$0xff] }
 0x242   :  { %2318 = vmatprep.subr.bf16.mxu1 %v6220_v36  ;;  %v698_v59 = vrot.slane %v8083_v20, %v8045_v44  ;;  %v702_v61 = vrot.slane %v8083_v20, %v8051_v47  ;;  %v7103_v35 = vld [vmem:[#allocation11 + $0x380] ss:$28 sps:$4 sm:$0xff]   ;;  %v6284_v36 = vcombine.high %v640_v30, %v644_v31  ;;  %v7079_v21 = vld [vmem:[#allocation11 + $0x8] ss:$28 sps:$4 sm:$0xff]  }
 0x245   :  { %2319 = vmatpush1.bf16.msra.mxu1 %v6219_v39  ;;  %v652_v39 = vld [vmem:[#allocation8 + $0x6b8] sm:$0xff] }
 0x246   :  { %2320 = vmatprep.subr.bf16.mxu1 %v6228_v40  ;;  %v6283_v40 = vcombine.low %v640_v30, %v644_v31  ;;  %v6292_v42 = vcombine.high %v648_v38, %v652_v39  ;;  %v6291_v51 = vcombine.low %v648_v38, %v652_v39  ;;  %v7090_v30 = vld [vmem:[#allocation11 + $0xb4] ss:$28 sps:$4 sm:$0xff]   ;;  %v7091_v38 = vld [vmem:[#allocation11 + $0xe8] ss:$28 sps:$4 sm:$0xff]  }
 0x247   :  { %v7163_v31 = vld [vmem:[#allocation11 + $0x5b0] ss:$28 sps:$4 sm:$0xff]   ;;  %v7096_v39 = vld [vmem:[#allocation11 + $0x124] ss:$28 sps:$4 sm:$0xff]  }
 0x249   :  { %2321 = vmatpush1.bf16.msra.mxu1 %v6227_v46  ;;  %v7117_v46 = vld [vmem:[#allocation11 + $0x3f4] ss:$28 sps:$4 sm:$0xff]  }
 0x24a   :  { %2322 = vmatprep.subr.bf16.mxu1 %v6236_v49  ;;  %v656_v49 = vld [vmem:[#allocation8 + $0x6d8] sm:$0xff] }
 0x24d   :  { %2323 = vmatpush1.bf16.msra.mxu1 %v6235_v52  ;;  %v7115_v52 = vld [vmem:[#allocation11 + $0x3f0] ss:$28 sps:$4 sm:$0xff]  }
 0x24e   :  { %2324 = vmatprep.subr.bf16.mxu1 %v6244_v53  ;;  %v6300_v53 = vcombine.high %v656_v49, %v660_v50 }
 0x251   :  { %2325 = vmatpush1.bf16.msra.mxu1 %v6243_v55  ;;  %v668_v55 = vld [vmem:[#allocation8 + $0x738] sm:$0xff] }
 0x252   :  { %2326 = vmatprep.subr.bf16.mxu1 %v6252_v56  ;;  %v6299_v56 = vcombine.low %v656_v49, %v660_v50  ;;  %v6308_v58 = vcombine.high %v664_v54, %v668_v55  ;;  %v7181_v49 = vld [vmem:[#allocation11 + $0x658] ss:$28 sps:$4 sm:$0xff]  }
 0x253   :  { %v2049_v63 = vpop.f32.mrb[4].mxu1  ;;  %v2092_v0 = vpop.f32.mrb[4].mxu0  ;;  %v7189_v50 = vld [vmem:[#allocation11 + $0x694] ss:$28 sps:$4 sm:$0xff]  }
 0x254   :  { %v2050_v3 = vadd.f32 %v2049_v63, %v698_v59  ;;  %v2051_v4 = vpop.f32.mrb[5].mxu1  ;;  %v2094_v5 = vpop.f32.mrb[5].mxu0  ;;  %v7127_v63 = vld [vmem:[#allocation11 + $0x460] ss:$28 sps:$4 sm:$0xff]  }
 0x255   :  { %v2052_v6 = vadd.f32 %v2051_v4, %v702_v61  ;;  %2327 = vmatpush1.bf16.msra.mxu1 %v6251_v60  ;;  %v2053_v7 = vpop.f32.mrb[6].mxu1  ;;  %v2096_v8 = vpop.f32.mrb[6].mxu0  ;;  %v672_v60 = vld [vmem:[#allocation8 + $0x758] sm:$0xff] }
 0x256   :  { %v2054_v19 = vadd.f32 %v2053_v7, %v698_v59  ;;  %v2093_v10 = vadd.f32 %v2092_v0, %v2050_v3  ;;  %v2055_v11 = vpop.f32.mrb[7].mxu1  ;;  %2328 = vmatprep.subr.bf16.mxu1 %v6260_v62  ;;  %v2098_v12 = vpop.f32.mrb[7].mxu0  ;;  %v7129_v59 = vld [vmem:[#allocation11 + $0x464] ss:$28 sps:$4 sm:$0xff]   ;;  %v6307_v62 = vcombine.low %v664_v54, %v668_v55  ;;  %v684_v3 = vld [vmem:[#allocation8 + $0x7b8] sm:$0xff] }
 0x257   :  { %v2056_v14 = vadd.f32 %v2055_v11, %v702_v61  ;;  %v2095_v15 = vadd.f32 %v2094_v5, %v2052_v6  ;;  %v676_v61 = vld [vmem:[#allocation8 + $0x778] sm:$0xff]  ;;  %v6324_v6 = vcombine.high %v680_v2, %v684_v3  ;;  %v7108_v55 = vld [vmem:[#allocation11 + $0x1cc] ss:$28 sps:$4 sm:$0xff]  }
 0x258   :  { %v2097_v22 = vadd.f32 %v2096_v8, %v2054_v19  ;;  %v2359_v25 = vmax.f32 %v2093_v10, 0.0  ;;  %v6316_v0 = vcombine.high %v672_v60, %v676_v61  ;;  %v6315_v4 = vcombine.low %v672_v60, %v676_v61  ;;  %v7133_v5 = vld [vmem:[#allocation11 + $0x498] ss:$28 sps:$4 sm:$0xff]   ;;  %v7139_v10 = vld [vmem:[#allocation11 + $0x4d0] ss:$28 sps:$4 sm:$0xff]  }
 0x259   :  { %v2099_v23 = vadd.f32 %v2098_v12, %v2056_v14  ;;  %2329 = vmatpush1.bf16.msra.mxu1 %v6259_v9  ;;  %v2360_v28 = vmax.f32 %v2095_v15, 0.0  ;;  %v7141_v7 = vld [vmem:[#allocation11 + $0x4d4] ss:$28 sps:$4 sm:$0xff]   ;;  %v6323_v19 = vcombine.low %v680_v2, %v684_v3  ;;  %v7147_v12 = vld [vmem:[#allocation11 + $0x50c] ss:$28 sps:$4 sm:$0xff]  }
 0x25a   :  { %v2367_v26 = vmax.f32 %v2097_v22, 0.0  ;;  %2330 = vmatprep.subr.bf16.mxu1 %v6268_v13  ;;  %v688_v8 = vld [vmem:[#allocation8 + $0x7d8] sm:$0xff]  ;;  %v7145_v14 = vld [vmem:[#allocation11 + $0x508] ss:$28 sps:$4 sm:$0xff]   ;;  %v7112_v60 = vld [vmem:[#allocation11 + $0x200] ss:$28 sps:$4 sm:$0xff]  }
 0x25b   :  { %v2368_v29 = vmax.f32 %v2099_v23, 0.0  ;;  %v692_v9 = vld [vmem:[#allocation8 + $0x7f8] sm:$0xff]  ;;  %v7081_v15 = vld [vmem:[#allocation11 + $0xc] ss:$28 sps:$4 sm:$0xff]   ;;  %v7084_v22 = vld [vmem:[#allocation11 + $0x44] ss:$28 sps:$4 sm:$0xff]  }
 0x25c   :  { %v8089_v32 = vpack.c.bf16 %v2367_v26, %v2359_v25  ;;  %v6332_v11 = vcombine.high %v688_v8, %v692_v9  ;;  %v6331_v13 = vcombine.low %v688_v8, %v692_v9  ;;  %v7151_v23 = vld [vmem:[#allocation11 + $0x540] ss:$28 sps:$4 sm:$0xff]   ;;  %v7100_v54 = vld [vmem:[#allocation11 + $0x190] ss:$28 sps:$4 sm:$0xff]   ;;  %v7130_v2 = vld [vmem:[#allocation11 + $0x2a8] ss:$28 sps:$4 sm:$0xff]  }
 0x25d   :  { %v8091_v33 = vpack.c.bf16 %v2368_v29, %v2360_v28  ;;  %2331 = vmatpush1.bf16.msra.mxu1 %v6267_v24  ;;  %v7159_v24 = vld [vmem:[#allocation11 + $0x57c] ss:$28 sps:$4 sm:$0xff]   ;;  %v7165_v28 = vld [vmem:[#allocation11 + $0x5b4] ss:$28 sps:$4 sm:$0xff]   ;;  %v7138_v3 = vld [vmem:[#allocation11 + $0x2e4] ss:$28 sps:$4 sm:$0xff]  }
 0x25e   :  { %2332 = vmatprep.subr.bf16.mxu1 %v6276_v27  ;;  %v7082_v25 = vld [vmem:[#allocation11 + $0x40] ss:$28 sps:$4 sm:$0xff]   ;;  %v7157_v27 = vld [vmem:[#allocation11 + $0x578] ss:$28 sps:$4 sm:$0xff]   ;;  %v7148_v8 = vld [vmem:[#allocation11 + $0x350] ss:$28 sps:$4 sm:$0xff]  }
 0x25f   :  { %5268 = vmatprep.mubr.bf16.mxu0 %v8091_v33  ;;  %v7087_v26 = vld [vmem:[#allocation11 + $0x7c] ss:$28 sps:$4 sm:$0xff]   ;;  %v7156_v9 = vld [vmem:[#allocation11 + $0x38c] ss:$28 sps:$4 sm:$0xff]  }
 0x260   :  { %5269 = vmatmul.mubr.bf16.vlgmr.msra.gmra.mrb[12].mxu0 %v8089_v32  ;;  %v7085_v29 = vld [vmem:[#allocation11 + $0x78] ss:$28 sps:$4 sm:$0xff]  }
 0x261   :  { %2333 = vmatpush1.bf16.msra.mxu1 %v6275_v34  ;;  %5280 = vmatpush1.bf16.msra.mxu0 %v7103_v35  ;;  %v7171_v34 = vld [vmem:[#allocation11 + $0x5ec] ss:$28 sps:$4 sm:$0xff]   ;;  %v7120_v61 = vld [vmem:[#allocation11 + $0x23c] ss:$28 sps:$4 sm:$0xff]  }
 0x262   :  { %2334 = vmatprep.subr.bf16.mxu1 %v6284_v36  ;;  %5281 = vmatprep.subr.bf16.mxu0 %v7111_v37  ;;  %v7093_v35 = vld [vmem:[#allocation11 + $0xec] ss:$28 sps:$4 sm:$0xff]   ;;  %v7177_v37 = vld [vmem:[#allocation11 + $0x624] ss:$28 sps:$4 sm:$0xff]  }
 0x263   :  { %v7169_v36 = vld [vmem:[#allocation11 + $0x5e8] ss:$28 sps:$4 sm:$0xff]  }
 0x265   :  { %2335 = vmatpush1.bf16.msra.mxu1 %v6283_v40  ;;  %5282 = vmatpush1.bf16.msra.mxu0 %v7109_v41  ;;  %v7175_v40 = vld [vmem:[#allocation11 + $0x620] ss:$28 sps:$4 sm:$0xff]  }
 0x266   :  { %2336 = vmatprep.subr.bf16.mxu1 %v6292_v42  ;;  %5283 = vmatprep.subr.bf16.mxu0 %v7117_v46  ;;  %v7183_v41 = vld [vmem:[#allocation11 + $0x65c] ss:$28 sps:$4 sm:$0xff]  }
 0x267   :  { %v7094_v42 = vld [vmem:[#allocation11 + $0x120] ss:$28 sps:$4 sm:$0xff]  }
 0x268   :  { %v7099_v46 = vld [vmem:[#allocation11 + $0x15c] ss:$28 sps:$4 sm:$0xff]  }
 0x269   :  { %2337 = vmatpush1.bf16.msra.mxu1 %v6291_v51  ;;  %5284 = vmatpush1.bf16.msra.mxu0 %v7115_v52  ;;  %v7097_v51 = vld [vmem:[#allocation11 + $0x158] ss:$28 sps:$4 sm:$0xff]  }
 0x26a   :  { %2338 = vmatprep.subr.bf16.mxu1 %v6300_v53  ;;  %5285 = vmatprep.subr.bf16.mxu0 %v7123_v17  ;;  %v7102_v52 = vld [vmem:[#allocation11 + $0x194] ss:$28 sps:$4 sm:$0xff]   ;;  %v7195_v17 = vld [vmem:[#allocation11 + $0x6cc] ss:$28 sps:$4 sm:$0xff]  }
 0x26b   :  { %v7187_v53 = vld [vmem:[#allocation11 + $0x690] ss:$28 sps:$4 sm:$0xff]  }
 0x26d   :  { %2339 = vmatpush1.bf16.msra.mxu1 %v6299_v56  ;;  %5286 = vmatpush1.bf16.msra.mxu0 %v7121_v57  ;;  %v7193_v56 = vld [vmem:[#allocation11 + $0x6c8] ss:$28 sps:$4 sm:$0xff]  }
 0x26e   :  { %2340 = vmatprep.subr.bf16.mxu1 %v6308_v58  ;;  %5287 = vmatprep.subr.bf16.mxu0 %v7129_v59  ;;  %v7201_v57 = vld [vmem:[#allocation11 + $0x704] ss:$28 sps:$4 sm:$0xff]  }
 0x26f   :  { %v7106_v58 = vld [vmem:[#allocation11 + $0x1c8] ss:$28 sps:$4 sm:$0xff]  }
 0x270   :  { %v7114_v59 = vld [vmem:[#allocation11 + $0x204] ss:$28 sps:$4 sm:$0xff]  }
 0x271   :  { %2341 = vmatpush1.bf16.msra.mxu1 %v6307_v62  ;;  %5288 = vmatpush1.bf16.msra.mxu0 %v7127_v63  ;;  %v7118_v62 = vld [vmem:[#allocation11 + $0x238] ss:$28 sps:$4 sm:$0xff]  }
 0x272   :  { %2342 = vmatprep.subr.bf16.mxu1 %v6316_v0  ;;  %5289 = vmatprep.subr.bf16.mxu0 %v7135_v1  ;;  %v7126_v63 = vld [vmem:[#allocation11 + $0x274] ss:$28 sps:$4 sm:$0xff]   ;;  %v7132_v1 = vld [vmem:[#allocation11 + $0x2ac] ss:$28 sps:$4 sm:$0xff]  }
 0x273   :  { %v7124_v0 = vld [vmem:[#allocation11 + $0x270] ss:$28 sps:$4 sm:$0xff]  }
 0x275   :  { %2343 = vmatpush1.bf16.msra.mxu1 %v6315_v4  ;;  %5290 = vmatpush1.bf16.msra.mxu0 %v7133_v5  ;;  %v7136_v4 = vld [vmem:[#allocation11 + $0x2e0] ss:$28 sps:$4 sm:$0xff]  }
 0x276   :  { %2344 = vmatprep.subr.bf16.mxu1 %v6324_v6  ;;  %5291 = vmatprep.subr.bf16.mxu0 %v7141_v7  ;;  %v7144_v5 = vld [vmem:[#allocation11 + $0x31c] ss:$28 sps:$4 sm:$0xff]   ;;  %v7150_v7 = vld [vmem:[#allocation11 + $0x354] ss:$28 sps:$4 sm:$0xff]  }
 0x277   :  { %v7142_v6 = vld [vmem:[#allocation11 + $0x318] ss:$28 sps:$4 sm:$0xff]  }
 0x279   :  { %2345 = vmatpush1.bf16.msra.mxu1 %v6323_v19  ;;  %5292 = vmatpush1.bf16.msra.mxu0 %v7139_v10  ;;  %v7154_v19 = vld [vmem:[#allocation11 + $0x388] ss:$28 sps:$4 sm:$0xff]  }
 0x27a   :  { %2346 = vmatprep.subr.bf16.mxu1 %v6332_v11  ;;  %5293 = vmatprep.subr.bf16.mxu0 %v7147_v12  ;;  %v7162_v10 = vld [vmem:[#allocation11 + $0x3c4] ss:$28 sps:$4 sm:$0xff]   ;;  %v7168_v12 = vld [vmem:[#allocation11 + $0x3fc] ss:$28 sps:$4 sm:$0xff]  }
 0x27b   :  { %v7160_v11 = vld [vmem:[#allocation11 + $0x3c0] ss:$28 sps:$4 sm:$0xff]  }
 0x27d   :  { %2347 = vmatpush1.bf16.msra.mxu1 %v6331_v13  ;;  %5294 = vmatpush1.bf16.msra.mxu0 %v7145_v14  ;;  %v7166_v13 = vld [vmem:[#allocation11 + $0x3f8] ss:$28 sps:$4 sm:$0xff]  }
 0x27e   :  { %5408 = vmatprep.subr.bf16.mxu1 %v7081_v15  ;;  %5295 = vmatprep.subr.bf16.mxu0 %v7153_v16  ;;  %v7174_v14 = vld [vmem:[#allocation11 + $0x434] ss:$28 sps:$4 sm:$0xff]   ;;  %v7180_v16 = vld [vmem:[#allocation11 + $0x46c] ss:$28 sps:$4 sm:$0xff]  }
 0x27f   :  { %v7172_v15 = vld [vmem:[#allocation11 + $0x430] ss:$28 sps:$4 sm:$0xff]  }
 0x280   :  { %2349 = vmatmul.mubr.bf16.vlgmr.msra.gmra.mrb[12].mxu1 %v8062_v18  ;;  %v7088_v18 = vld [vmem:[#allocation11 + $0xb0] ss:$28 sps:$4 sm:$0xff]  }
 0x281   :  { %5409 = vmatpush1.bf16.msra.mxu1 %v7079_v21  ;;  %5440 = vmatprep.mubr.bf16.mxu1 %v8091_v33  ;;  %v7178_v21 = vld [vmem:[#allocation11 + $0x468] ss:$28 sps:$4 sm:$0xff]  }
 0x282   :  { %5410 = vmatprep.subr.bf16.mxu1 %v7084_v22  ;;  %5296 = vmatpush1.bf16.msra.mxu0 %v7151_v23  ;;  %v713_v22 = vsub.s32 4, %v8042_v43  ;;  %v717_v23 = vsub.s32 5, %v8042_v43 }
 0x283   :  { %5297 = vmatprep.subr.bf16.mxu0 %v7159_v24  ;;  %v7186_v24 = vld [vmem:[#allocation11 + $0x4a4] ss:$28 sps:$4 sm:$0xff]  }
 0x285   :  { %5411 = vmatpush1.bf16.msra.mxu1 %v7082_v25  ;;  %v706_v25 = vrot.slane %v8083_v20, %v8048_v45 }
 0x286   :  { %5412 = vmatprep.subr.bf16.mxu1 %v7087_v26  ;;  %5298 = vmatpush1.bf16.msra.mxu0 %v7157_v27  ;;  %v714_v26 = vrot.slane %v8083_v20, %v713_v22  ;;  %v710_v27 = vrot.slane %v8083_v20, %v8054_v48 }
 0x287   :  { %5299 = vmatprep.subr.bf16.mxu0 %v7165_v28  ;;  %v7184_v28 = vld [vmem:[#allocation11 + $0x4a0] ss:$28 sps:$4 sm:$0xff]  }
 0x289   :  { %5413 = vmatpush1.bf16.msra.mxu1 %v7085_v29  ;;  %v718_v29 = vrot.slane %v8083_v20, %v717_v23 }
 0x28a   :  { %5414 = vmatprep.subr.bf16.mxu1 %v7090_v30  ;;  %5300 = vmatpush1.bf16.msra.mxu0 %v7163_v31  ;;  %v7192_v30 = vld [vmem:[#allocation11 + $0x4dc] ss:$28 sps:$4 sm:$0xff]  }
 0x28b   :  { %5301 = vmatprep.subr.bf16.mxu0 %v7171_v34 }
 0x28d   :  { %5415 = vmatpush1.bf16.msra.mxu1 %v7088_v18 }
 0x28e   :  { %5416 = vmatprep.subr.bf16.mxu1 %v7093_v35  ;;  %5302 = vmatpush1.bf16.msra.mxu0 %v7169_v36 }
 0x28f   :  { %5303 = vmatprep.subr.bf16.mxu0 %v7177_v37 }
 0x291   :  { %5417 = vmatpush1.bf16.msra.mxu1 %v7091_v38 }
 0x292   :  { %5418 = vmatprep.subr.bf16.mxu1 %v7096_v39  ;;  %5304 = vmatpush1.bf16.msra.mxu0 %v7175_v40  ;;  %v7190_v40 = vld [vmem:[#allocation11 + $0x4d8] ss:$28 sps:$4 sm:$0xff]  }
 0x293   :  { %5305 = vmatprep.subr.bf16.mxu0 %v7183_v41 }
 0x295   :  { %5419 = vmatpush1.bf16.msra.mxu1 %v7094_v42 }
 0x296   :  { %5420 = vmatprep.subr.bf16.mxu1 %v7099_v46  ;;  %5306 = vmatpush1.bf16.msra.mxu0 %v7181_v49 }
 0x297   :  { %5307 = vmatprep.subr.bf16.mxu0 %v7189_v50  ;;  %v7198_v50 = vld [vmem:[#allocation11 + $0x514] ss:$28 sps:$4 sm:$0xff]  }
 0x299   :  { %5421 = vmatpush1.bf16.msra.mxu1 %v7097_v51 }
 0x29a   :  { %5422 = vmatprep.subr.bf16.mxu1 %v7102_v52  ;;  %5308 = vmatpush1.bf16.msra.mxu0 %v7187_v53 }
 0x29b   :  { %5309 = vmatprep.subr.bf16.mxu0 %v7195_v17 }
 0x29d   :  { %5423 = vmatpush1.bf16.msra.mxu1 %v7100_v54 }
 0x29e   :  { %5424 = vmatprep.subr.bf16.mxu1 %v7108_v55  ;;  %5310 = vmatpush1.bf16.msra.mxu0 %v7193_v56 }
 0x29f   :  { %5322 = vmatprep.subr.bf16.mxu0 %v7201_v57 }
 0x2a1   :  { %5425 = vmatpush1.bf16.msra.mxu1 %v7106_v58 }
 0x2a2   :  { %5426 = vmatprep.subr.bf16.mxu1 %v7114_v59  ;;  %v7196_v59 = vld [vmem:[#allocation11 + $0x510] ss:$28 sps:$4 sm:$0xff]  }
 0x2a5   :  { %5427 = vmatpush1.bf16.msra.mxu1 %v7112_v60 }
 0x2a6   :  { %5428 = vmatprep.subr.bf16.mxu1 %v7120_v61 }
 0x2a9   :  { %5429 = vmatpush1.bf16.msra.mxu1 %v7118_v62 }
 0x2aa   :  { %5430 = vmatprep.subr.bf16.mxu1 %v7126_v63 }
 0x2ad   :  { %5431 = vmatpush1.bf16.msra.mxu1 %v7124_v0 }
 0x2ae   :  { %5432 = vmatprep.subr.bf16.mxu1 %v7132_v1  ;;  %v7199_v1 = vld [vmem:[#allocation11 + $0x700] ss:$28 sps:$4 sm:$0xff]  }
 0x2b1   :  { %5433 = vmatpush1.bf16.msra.mxu1 %v7130_v2 }
 0x2b2   :  { %5434 = vmatprep.subr.bf16.mxu1 %v7138_v3  ;;  %v7204_v3 = vld [vmem:[#allocation11 + $0x54c] ss:$28 sps:$4 sm:$0xff]  }
 0x2b5   :  { %5435 = vmatpush1.bf16.msra.mxu1 %v7136_v4  ;;  %v7207_v4 = vld [vmem:[#allocation11 + $0x73c] ss:$28 sps:$4 sm:$0xff]  }
 0x2b6   :  { %5436 = vmatprep.subr.bf16.mxu1 %v7144_v5  ;;  %v7202_v5 = vld [vmem:[#allocation11 + $0x548] ss:$28 sps:$4 sm:$0xff]  }
 0x2b9   :  { %5437 = vmatpush1.bf16.msra.mxu1 %v7142_v6  ;;  %v7210_v6 = vld [vmem:[#allocation11 + $0x584] ss:$28 sps:$4 sm:$0xff]  }
 0x2ba   :  { %5438 = vmatprep.subr.bf16.mxu1 %v7150_v7  ;;  %v7205_v7 = vld [vmem:[#allocation11 + $0x738] ss:$28 sps:$4 sm:$0xff]  }
 0x2bd   :  { %5439 = vmatpush1.bf16.msra.mxu1 %v7148_v8  ;;  %v7213_v8 = vld [vmem:[#allocation11 + $0x774] ss:$28 sps:$4 sm:$0xff]  }
 0x2be   :  { %5451 = vmatprep.subr.bf16.mxu1 %v7156_v9  ;;  %v7208_v9 = vld [vmem:[#allocation11 + $0x580] ss:$28 sps:$4 sm:$0xff]  }
 0x2c0   :  { %5441 = vmatmul.mubr.bf16.vlgmr.msra.gmra.mrb[16].mxu1 %v8089_v32 }
 0x2c1   :  { %5452 = vmatpush1.bf16.msra.mxu1 %v7154_v19  ;;  %v7216_v19 = vld [vmem:[#allocation11 + $0x5bc] ss:$28 sps:$4 sm:$0xff]  }
 0x2c2   :  { %5453 = vmatprep.subr.bf16.mxu1 %v7162_v10  ;;  %v7211_v10 = vld [vmem:[#allocation11 + $0x770] ss:$28 sps:$4 sm:$0xff]  }
 0x2c5   :  { %5454 = vmatpush1.bf16.msra.mxu1 %v7160_v11  ;;  %v7219_v11 = vld [vmem:[#allocation11 + $0x7ac] ss:$28 sps:$4 sm:$0xff]  }
 0x2c6   :  { %5455 = vmatprep.subr.bf16.mxu1 %v7168_v12  ;;  %v7214_v12 = vld [vmem:[#allocation11 + $0x5b8] ss:$28 sps:$4 sm:$0xff]  }
 0x2c9   :  { %5456 = vmatpush1.bf16.msra.mxu1 %v7166_v13  ;;  %v7222_v13 = vld [vmem:[#allocation11 + $0x5f4] ss:$28 sps:$4 sm:$0xff]  }
 0x2ca   :  { %5457 = vmatprep.subr.bf16.mxu1 %v7174_v14  ;;  %v7217_v14 = vld [vmem:[#allocation11 + $0x7a8] ss:$28 sps:$4 sm:$0xff]  }
 0x2cd   :  { %5458 = vmatpush1.bf16.msra.mxu1 %v7172_v15  ;;  %v7225_v15 = vld [vmem:[#allocation11 + $0x7e4] ss:$28 sps:$4 sm:$0xff]  }
 0x2ce   :  { %5459 = vmatprep.subr.bf16.mxu1 %v7180_v16  ;;  %v7220_v16 = vld [vmem:[#allocation11 + $0x5f0] ss:$28 sps:$4 sm:$0xff]  }
 0x2d1   :  { %5460 = vmatpush1.bf16.msra.mxu1 %v7178_v21  ;;  %v7228_v21 = vld [vmem:[#allocation11 + $0x62c] ss:$28 sps:$4 sm:$0xff]  }
 0x2d2   :  { %5461 = vmatprep.subr.bf16.mxu1 %v7186_v24  ;;  %v7223_v24 = vld [vmem:[#allocation11 + $0x7e0] ss:$28 sps:$4 sm:$0xff]  }
 0x2d3   :  { %v2178_v31 = vpop.f32.mrb[8].mxu1 }
 0x2d4   :  { %v6893_v34 = vadd.f32 %v2178_v31, %v706_v25  ;;  %v2264_v18 = vpop.f32.mrb[8].mxu0  ;;  %v2180_v35 = vpop.f32.mrb[9].mxu1  ;;  %v7240_v31 = vld [vmem:[#allocation11 + $0x69c] ss:$28 sps:$4 sm:$0xff]  }
 0x2d5   :  { %v6897_v36 = vadd.f32 %v2264_v18, %v714_v26  ;;  %v6894_v37 = vadd.f32 %v2180_v35, %v710_v27  ;;  %v2266_v38 = vpop.f32.mrb[9].mxu0  ;;  %v2182_v39 = vpop.f32.mrb[10].mxu1  ;;  %5462 = vmatpush1.bf16.msra.mxu1 %v7184_v28  ;;  %v7229_v28 = vld [vmem:[#allocation11 + $0x818] ss:$28 sps:$4 sm:$0xff]   ;;  %v7243_v18 = vld [vmem:[#allocation11 + $0x88c] ss:$28 sps:$4 sm:$0xff]  }
 0x2d6   :  { %v6898_v41 = vadd.f32 %v2266_v38, %v718_v29  ;;  %v6895_v42 = vadd.f32 %v2182_v39, %v706_v25  ;;  %v2268_v46 = vpop.f32.mrb[10].mxu0  ;;  %v2184_v49 = vpop.f32.mrb[11].mxu1  ;;  %5463 = vmatprep.subr.bf16.mxu1 %v7192_v30  ;;  %v2361_v53 = vmax.f32 %v6893_v34, 0.0  ;;  %v7231_v25 = vld [vmem:[#allocation11 + $0x81c] ss:$28 sps:$4 sm:$0xff]  }
 0x2d7   :  { %v6899_v51 = vadd.f32 %v2268_v46, %v714_v26  ;;  %v6896_v20 = vadd.f32 %v2184_v49, %v710_v27  ;;  %v2270_v52 = vpop.f32.mrb[11].mxu0  ;;  %v2363_v55 = vmax.f32 %v6897_v36, 0.0  ;;  %v2362_v56 = vmax.f32 %v6894_v37, 0.0  ;;  %v7226_v26 = vld [vmem:[#allocation11 + $0x628] ss:$28 sps:$4 sm:$0xff]  }
 0x2d8   :  { %v2369_v17 = vmax.f32 %v6895_v42, 0.0  ;;  %v6900_v54 = vadd.f32 %v2270_v52, %v718_v29  ;;  %v2364_v60 = vmax.f32 %v6898_v41, 0.0  ;;  %v7234_v27 = vld [vmem:[#allocation11 + $0x664] ss:$28 sps:$4 sm:$0xff]   ;;  %v7237_v29 = vld [vmem:[#allocation11 + $0x854] ss:$28 sps:$4 sm:$0xff]  }
 0x2d9   :  { %v2371_v57 = vmax.f32 %v6899_v51, 0.0  ;;  %v2370_v58 = vmax.f32 %v6896_v20, 0.0  ;;  %5464 = vmatpush1.bf16.msra.mxu1 %v7190_v40  ;;  %v7232_v30 = vld [vmem:[#allocation11 + $0x660] ss:$28 sps:$4 sm:$0xff]   ;;  %v7235_v34 = vld [vmem:[#allocation11 + $0x850] ss:$28 sps:$4 sm:$0xff]  }
 0x2da   :  { %v8110_v61 = vpack.c.bf16 %v2369_v17, %v2361_v53  ;;  %v2372_v62 = vmax.f32 %v6900_v54, 0.0  ;;  %5465 = vmatprep.subr.bf16.mxu1 %v7198_v50  ;;  %v7238_v35 = vld [vmem:[#allocation11 + $0x698] ss:$28 sps:$4 sm:$0xff]   ;;  %v7241_v37 = vld [vmem:[#allocation11 + $0x888] ss:$28 sps:$4 sm:$0xff]  }
 0x2db   :  { %v8112_v63 = vpack.c.bf16 %v2371_v57, %v2363_v55  ;;  %v8114_v0 = vpack.c.bf16 %v2370_v58, %v2362_v56  ;;  %v7246_v36 = vld [vmem:[#allocation11 + $0x6d4] ss:$28 sps:$4 sm:$0xff]   ;;  %v7249_v38 = vld [vmem:[#allocation11 + $0x8c4] ss:$28 sps:$4 sm:$0xff]   ;;  %v7252_v40 = vld [vmem:[#allocation11 + $0x70c] ss:$28 sps:$4 sm:$0xff]  }
 0x2dc   :  { %v8116_v2 = vpack.c.bf16 %v2372_v62, %v2364_v60  ;;  %v7244_v39 = vld [vmem:[#allocation11 + $0x6d0] ss:$28 sps:$4 sm:$0xff]   ;;  %v7247_v41 = vld [vmem:[#allocation11 + $0x8c0] ss:$28 sps:$4 sm:$0xff]   ;;  %v7250_v46 = vld [vmem:[#allocation11 + $0x708] ss:$28 sps:$4 sm:$0xff]  }
 0x2dd   :  { %5311 = vmatprep.mubr.bf16.mxu0 %v8114_v0  ;;  %5466 = vmatpush1.bf16.msra.mxu1 %v7196_v59  ;;  %v7255_v42 = vld [vmem:[#allocation11 + $0x8fc] ss:$28 sps:$4 sm:$0xff]   ;;  %v7258_v49 = vld [vmem:[#allocation11 + $0x744] ss:$28 sps:$4 sm:$0xff]   ;;  %v7261_v51 = vld [vmem:[#allocation11 + $0x934] ss:$28 sps:$4 sm:$0xff]  }
 0x2de   :  { %5483 = vmatprep.mubr.bf16.mxu1 %v8114_v0  ;;  %5312 = vmatmul.mubr.bf16.vlgmr.msra.gmra.mrb[12].mxu0 %v8110_v61  ;;  %v7253_v50 = vld [vmem:[#allocation11 + $0x8f8] ss:$28 sps:$4 sm:$0xff]   ;;  %v7256_v20 = vld [vmem:[#allocation11 + $0x740] ss:$28 sps:$4 sm:$0xff]   ;;  %v7259_v53 = vld [vmem:[#allocation11 + $0x930] ss:$28 sps:$4 sm:$0xff]  }
 0x2df   :  { %5323 = vmatpush1.bf16.msra.mxu0 %v7199_v1  ;;  %5354 = vmatprep.mubr.bf16.mxu0 %v8116_v2  ;;  %v7264_v52 = vld [vmem:[#allocation11 + $0x77c] ss:$28 sps:$4 sm:$0xff]   ;;  %v7267_v17 = vld [vmem:[#allocation11 + $0x96c] ss:$28 sps:$4 sm:$0xff]   ;;  %v7270_v55 = vld [vmem:[#allocation11 + $0x7b4] ss:$28 sps:$4 sm:$0xff]  }
 0x2e0   :  { %5467 = vmatprep.subr.bf16.mxu1 %v7204_v3  ;;  %5324 = vmatprep.subr.bf16.mxu0 %v7207_v4  ;;  %v7262_v54 = vld [vmem:[#allocation11 + $0x778] ss:$28 sps:$4 sm:$0xff]   ;;  %v7265_v56 = vld [vmem:[#allocation11 + $0x968] ss:$28 sps:$4 sm:$0xff]   ;;  %v7268_v58 = vld [vmem:[#allocation11 + $0x7b0] ss:$28 sps:$4 sm:$0xff]  }
 0x2e1   :  { %5468 = vmatpush1.bf16.msra.mxu1 %v7202_v5  ;;  %v7273_v57 = vld [vmem:[#allocation11 + $0x9a4] ss:$28 sps:$4 sm:$0xff]   ;;  %v7276_v59 = vld [vmem:[#allocation11 + $0x7ec] ss:$28 sps:$4 sm:$0xff]   ;;  %v7279_v62 = vld [vmem:[#allocation11 + $0x9dc] ss:$28 sps:$4 sm:$0xff]  }
 0x2e2   :  { %5469 = vmatprep.subr.bf16.mxu1 %v7210_v6  ;;  %v7271_v60 = vld [vmem:[#allocation11 + $0x9a0] ss:$28 sps:$4 sm:$0xff]   ;;  %v7274_v1 = vld [vmem:[#allocation11 + $0x7e8] ss:$28 sps:$4 sm:$0xff]   ;;  %v7277_v4 = vld [vmem:[#allocation11 + $0x9d8] ss:$28 sps:$4 sm:$0xff]  }
 0x2e3   :  { %5325 = vmatpush1.bf16.msra.mxu0 %v7205_v7  ;;  %v7282_v3 = vld [vmem:[#allocation11 + $0x824] ss:$28 sps:$4 sm:$0xff]   ;;  %v7285_v5 = vld [vmem:[#allocation11 + $0xa14] ss:$28 sps:$4 sm:$0xff]   ;;  %v7288_v7 = vld [vmem:[#allocation11 + $0x85c] ss:$28 sps:$4 sm:$0xff]  }
 0x2e4   :  { %5326 = vmatprep.subr.bf16.mxu0 %v7213_v8  ;;  %v7280_v6 = vld [vmem:[#allocation11 + $0x820] ss:$28 sps:$4 sm:$0xff]   ;;  %v7283_v8 = vld [vmem:[#allocation11 + $0xa10] ss:$28 sps:$4 sm:$0xff]  }
 0x2e5   :  { %5470 = vmatpush1.bf16.msra.mxu1 %v7208_v9  ;;  %v7291_v9 = vld [vmem:[#allocation11 + $0xa4c] ss:$28 sps:$4 sm:$0xff]  }
 0x2e6   :  { %5471 = vmatprep.subr.bf16.mxu1 %v7216_v19  ;;  %v7286_v19 = vld [vmem:[#allocation11 + $0x858] ss:$28 sps:$4 sm:$0xff]  }
 0x2e7   :  { %5327 = vmatpush1.bf16.msra.mxu0 %v7211_v10  ;;  %v7294_v10 = vld [vmem:[#allocation11 + $0x894] ss:$28 sps:$4 sm:$0xff]  }
 0x2e8   :  { %5328 = vmatprep.subr.bf16.mxu0 %v7219_v11  ;;  %v7289_v11 = vld [vmem:[#allocation11 + $0xa48] ss:$28 sps:$4 sm:$0xff]  }
 0x2e9   :  { %5472 = vmatpush1.bf16.msra.mxu1 %v7214_v12  ;;  %v7297_v12 = vld [vmem:[#allocation11 + $0xa84] ss:$28 sps:$4 sm:$0xff]  }
 0x2ea   :  { %5473 = vmatprep.subr.bf16.mxu1 %v7222_v13  ;;  %v7292_v13 = vld [vmem:[#allocation11 + $0x890] ss:$28 sps:$4 sm:$0xff]  }
 0x2eb   :  { %5329 = vmatpush1.bf16.msra.mxu0 %v7217_v14  ;;  %v7300_v14 = vld [vmem:[#allocation11 + $0x8cc] ss:$28 sps:$4 sm:$0xff]  }
 0x2ec   :  { %5330 = vmatprep.subr.bf16.mxu0 %v7225_v15  ;;  %v7295_v15 = vld [vmem:[#allocation11 + $0xa80] ss:$28 sps:$4 sm:$0xff]  }
 0x2ed   :  { %5474 = vmatpush1.bf16.msra.mxu1 %v7220_v16  ;;  %v7303_v16 = vld [vmem:[#allocation11 + $0xabc] ss:$28 sps:$4 sm:$0xff]  }
 0x2ee   :  { %5475 = vmatprep.subr.bf16.mxu1 %v7228_v21  ;;  %v7298_v21 = vld [vmem:[#allocation11 + $0x8c8] ss:$28 sps:$4 sm:$0xff]  }
 0x2ef   :  { %5331 = vmatpush1.bf16.msra.mxu0 %v7223_v24  ;;  %v7306_v24 = vld [vmem:[#allocation11 + $0x904] ss:$28 sps:$4 sm:$0xff]  }
 0x2f0   :  { %5332 = vmatprep.subr.bf16.mxu0 %v7231_v25  ;;  %v7301_v25 = vld [vmem:[#allocation11 + $0xab8] ss:$28 sps:$4 sm:$0xff]  }
 0x2f1   :  { %5476 = vmatpush1.bf16.msra.mxu1 %v7226_v26  ;;  %v7309_v26 = vld [vmem:[#allocation11 + $0xaf4] ss:$28 sps:$4 sm:$0xff]  }
 0x2f2   :  { %5477 = vmatprep.subr.bf16.mxu1 %v7234_v27  ;;  %v7304_v27 = vld [vmem:[#allocation11 + $0x900] ss:$28 sps:$4 sm:$0xff]  }
 0x2f3   :  { %5333 = vmatpush1.bf16.msra.mxu0 %v7229_v28  ;;  %v7312_v28 = vld [vmem:[#allocation11 + $0x93c] ss:$28 sps:$4 sm:$0xff]  }
 0x2f4   :  { %5334 = vmatprep.subr.bf16.mxu0 %v7237_v29  ;;  %v7307_v29 = vld [vmem:[#allocation11 + $0xaf0] ss:$28 sps:$4 sm:$0xff]  }
 0x2f5   :  { %5478 = vmatpush1.bf16.msra.mxu1 %v7232_v30  ;;  %v7315_v30 = vld [vmem:[#allocation11 + $0xb2c] ss:$28 sps:$4 sm:$0xff]  }
 0x2f6   :  { %5479 = vmatprep.subr.bf16.mxu1 %v7240_v31  ;;  %v7310_v31 = vld [vmem:[#allocation11 + $0x938] ss:$28 sps:$4 sm:$0xff]  }
 0x2f7   :  { %5335 = vmatpush1.bf16.msra.mxu0 %v7235_v34  ;;  %v7318_v34 = vld [vmem:[#allocation11 + $0x974] ss:$28 sps:$4 sm:$0xff]  }
 0x2f8   :  { %5336 = vmatprep.subr.bf16.mxu0 %v7243_v18  ;;  %v7313_v18 = vld [vmem:[#allocation11 + $0xb28] ss:$28 sps:$4 sm:$0xff]  }
 0x2f9   :  { %5480 = vmatpush1.bf16.msra.mxu1 %v7238_v35  ;;  %v7321_v35 = vld [vmem:[#allocation11 + $0xb64] ss:$28 sps:$4 sm:$0xff]  }
 0x2fa   :  { %5481 = vmatprep.subr.bf16.mxu1 %v7246_v36  ;;  %v7316_v36 = vld [vmem:[#allocation11 + $0x970] ss:$28 sps:$4 sm:$0xff]  }
 0x2fb   :  { %5337 = vmatpush1.bf16.msra.mxu0 %v7241_v37  ;;  %v7324_v37 = vld [vmem:[#allocation11 + $0x9ac] ss:$28 sps:$4 sm:$0xff]  }
 0x2fc   :  { %5338 = vmatprep.subr.bf16.mxu0 %v7249_v38  ;;  %v7319_v38 = vld [vmem:[#allocation11 + $0xb60] ss:$28 sps:$4 sm:$0xff]  }
 0x2fd   :  { %5482 = vmatpush1.bf16.msra.mxu1 %v7244_v39  ;;  %v7327_v39 = vld [vmem:[#allocation11 + $0xb9c] ss:$28 sps:$4 sm:$0xff]  }
 0x2fe   :  { %5494 = vmatprep.subr.bf16.mxu1 %v7252_v40  ;;  %v7322_v40 = vld [vmem:[#allocation11 + $0x9a8] ss:$28 sps:$4 sm:$0xff]  }
 0x2ff   :  { %5339 = vmatpush1.bf16.msra.mxu0 %v7247_v41  ;;  %v7330_v41 = vld [vmem:[#allocation11 + $0x9e4] ss:$28 sps:$4 sm:$0xff]  }
 0x300   :  { %5484 = vmatmul.mubr.bf16.vlgmr.msra.gmra.mrb[16].mxu1 %v8110_v61  ;;  %5340 = vmatprep.subr.bf16.mxu0 %v7255_v42  ;;  %v7325_v42 = vld [vmem:[#allocation11 + $0xb98] ss:$28 sps:$4 sm:$0xff]  }
 0x301   :  { %5495 = vmatpush1.bf16.msra.mxu1 %v7250_v46  ;;  %5526 = vmatprep.mubr.bf16.mxu1 %v8116_v2  ;;  %v7333_v46 = vld [vmem:[#allocation11 + $0xbd4] ss:$28 sps:$4 sm:$0xff]  }
 0x302   :  { %5496 = vmatprep.subr.bf16.mxu1 %v7258_v49  ;;  %v7328_v49 = vld [vmem:[#allocation11 + $0x9e0] ss:$28 sps:$4 sm:$0xff]  }
 0x303   :  { %5341 = vmatpush1.bf16.msra.mxu0 %v7253_v50  ;;  %v7336_v50 = vld [vmem:[#allocation11 + $0xa1c] ss:$28 sps:$4 sm:$0xff]  }
 0x304   :  { %5342 = vmatprep.subr.bf16.mxu0 %v7261_v51  ;;  %v7331_v51 = vld [vmem:[#allocation11 + $0xbd0] ss:$28 sps:$4 sm:$0xff]  }
 0x305   :  { %5497 = vmatpush1.bf16.msra.mxu1 %v7256_v20  ;;  %v7339_v20 = vld [vmem:[#allocation11 + $0xc0c] ss:$28 sps:$4 sm:$0xff]  }
 0x306   :  { %5498 = vmatprep.subr.bf16.mxu1 %v7264_v52  ;;  %v7334_v52 = vld [vmem:[#allocation11 + $0xa18] ss:$28 sps:$4 sm:$0xff]  }
 0x307   :  { %5343 = vmatpush1.bf16.msra.mxu0 %v7259_v53  ;;  %v7342_v53 = vld [vmem:[#allocation11 + $0xa54] ss:$28 sps:$4 sm:$0xff]  }
 0x308   :  { %5344 = vmatprep.subr.bf16.mxu0 %v7267_v17  ;;  %v7337_v17 = vld [vmem:[#allocation11 + $0xc08] ss:$28 sps:$4 sm:$0xff]  }
 0x309   :  { %5499 = vmatpush1.bf16.msra.mxu1 %v7262_v54  ;;  %v7345_v54 = vld [vmem:[#allocation11 + $0xc44] ss:$28 sps:$4 sm:$0xff]  }
 0x30a   :  { %5500 = vmatprep.subr.bf16.mxu1 %v7270_v55  ;;  %v7340_v55 = vld [vmem:[#allocation11 + $0xa50] ss:$28 sps:$4 sm:$0xff]  }
 0x30b   :  { %5345 = vmatpush1.bf16.msra.mxu0 %v7265_v56  ;;  %v7348_v56 = vld [vmem:[#allocation11 + $0xa8c] ss:$28 sps:$4 sm:$0xff]  }
 0x30c   :  { %5346 = vmatprep.subr.bf16.mxu0 %v7273_v57  ;;  %v7343_v57 = vld [vmem:[#allocation11 + $0xc40] ss:$28 sps:$4 sm:$0xff]  }
 0x30d   :  { %5501 = vmatpush1.bf16.msra.mxu1 %v7268_v58  ;;  %v7351_v58 = vld [vmem:[#allocation11 + $0xc7c] ss:$28 sps:$4 sm:$0xff]  }
 0x30e   :  { %5502 = vmatprep.subr.bf16.mxu1 %v7276_v59  ;;  %v7346_v59 = vld [vmem:[#allocation11 + $0xa88] ss:$28 sps:$4 sm:$0xff]  }
 0x30f   :  { %5347 = vmatpush1.bf16.msra.mxu0 %v7271_v60  ;;  %v7354_v60 = vld [vmem:[#allocation11 + $0xac4] ss:$28 sps:$4 sm:$0xff]  }
 0x310   :  { %5348 = vmatprep.subr.bf16.mxu0 %v7279_v62  ;;  %v7349_v62 = vld [vmem:[#allocation11 + $0xc78] ss:$28 sps:$4 sm:$0xff]  }
 0x311   :  { %5503 = vmatpush1.bf16.msra.mxu1 %v7274_v1  ;;  %v7357_v1 = vld [vmem:[#allocation11 + $0xcb4] ss:$28 sps:$4 sm:$0xff]  }
 0x312   :  { %5504 = vmatprep.subr.bf16.mxu1 %v7282_v3  ;;  %v7352_v3 = vld [vmem:[#allocation11 + $0xac0] ss:$28 sps:$4 sm:$0xff]  }
 0x313   :  { %5349 = vmatpush1.bf16.msra.mxu0 %v7277_v4  ;;  %v7360_v4 = vld [vmem:[#allocation11 + $0xafc] ss:$28 sps:$4 sm:$0xff]  }
 0x314   :  { %5350 = vmatprep.subr.bf16.mxu0 %v7285_v5  ;;  %v7355_v5 = vld [vmem:[#allocation11 + $0xcb0] ss:$28 sps:$4 sm:$0xff]  }
 0x315   :  { %5505 = vmatpush1.bf16.msra.mxu1 %v7280_v6  ;;  %v7363_v6 = vld [vmem:[#allocation11 + $0xcec] ss:$28 sps:$4 sm:$0xff]  }
 0x316   :  { %5506 = vmatprep.subr.bf16.mxu1 %v7288_v7  ;;  %v7358_v7 = vld [vmem:[#allocation11 + $0xaf8] ss:$28 sps:$4 sm:$0xff]  }
 0x317   :  { %5351 = vmatpush1.bf16.msra.mxu0 %v7283_v8  ;;  %v7366_v8 = vld [vmem:[#allocation11 + $0xb34] ss:$28 sps:$4 sm:$0xff]  }
 0x318   :  { %5352 = vmatprep.subr.bf16.mxu0 %v7291_v9  ;;  %v7361_v9 = vld [vmem:[#allocation11 + $0xce8] ss:$28 sps:$4 sm:$0xff]  }
 0x319   :  { %5507 = vmatpush1.bf16.msra.mxu1 %v7286_v19  ;;  %v7369_v19 = vld [vmem:[#allocation11 + $0xd24] ss:$28 sps:$4 sm:$0xff]  }
 0x31a   :  { %5508 = vmatprep.subr.bf16.mxu1 %v7294_v10  ;;  %v7364_v10 = vld [vmem:[#allocation11 + $0xb30] ss:$28 sps:$4 sm:$0xff]  }
 0x31b   :  { %5353 = vmatpush1.bf16.msra.mxu0 %v7289_v11  ;;  %v7372_v11 = vld [vmem:[#allocation11 + $0xb6c] ss:$28 sps:$4 sm:$0xff]  }
 0x31c   :  { %5365 = vmatprep.subr.bf16.mxu0 %v7297_v12  ;;  %v7367_v12 = vld [vmem:[#allocation11 + $0xd20] ss:$28 sps:$4 sm:$0xff]  }
 0x31d   :  { %5509 = vmatpush1.bf16.msra.mxu1 %v7292_v13  ;;  %v7375_v13 = vld [vmem:[#allocation11 + $0xd5c] ss:$28 sps:$4 sm:$0xff]  }
 0x31e   :  { %5355 = vmatmul.mubr.bf16.vlgmr.msra.gmra.mrb[12].mxu0 %v8112_v63  ;;  %5510 = vmatprep.subr.bf16.mxu1 %v7300_v14  ;;  %v721_v14 = vsub.s32 6, %v8042_v43 }
 0x31f   :  { %5366 = vmatpush1.bf16.msra.mxu0 %v7295_v15  ;;  %v7370_v15 = vld [vmem:[#allocation11 + $0xb68] ss:$28 sps:$4 sm:$0xff]  }
 0x320   :  { %5367 = vmatprep.subr.bf16.mxu0 %v7303_v16  ;;  %v725_v16 = vsub.s32 7, %v8042_v43 }
 0x321   :  { %5511 = vmatpush1.bf16.msra.mxu1 %v7298_v21  ;;  %v7378_v21 = vld [vmem:[#allocation11 + $0xba4] ss:$28 sps:$4 sm:$0xff]  }
 0x322   :  { %5512 = vmatprep.subr.bf16.mxu1 %v7306_v24  ;;  %v7373_v24 = vld [vmem:[#allocation11 + $0xd58] ss:$28 sps:$4 sm:$0xff]  }
 0x323   :  { %5368 = vmatpush1.bf16.msra.mxu0 %v7301_v25  ;;  %v7699_v25 = vld [vmem:[#allocation10] sm:$0xff] }
 0x324   :  { %5369 = vmatprep.subr.bf16.mxu0 %v7309_v26  ;;  %v722_v26 = vrot.slane %v7699_v25, %v721_v14 }
 0x325   :  { %5513 = vmatpush1.bf16.msra.mxu1 %v7304_v27  ;;  %v7381_v27 = vld [vmem:[#allocation11 + $0xd94] ss:$28 sps:$4 sm:$0xff]  }
 0x326   :  { %5514 = vmatprep.subr.bf16.mxu1 %v7312_v28  ;;  %v726_v28 = vrot.slane %v7699_v25, %v725_v16  ;;  %v7426_v16 = vld [vmem:[#allocation11 + $0xd64] ss:$28 sps:$4 sm:$0xff]  }
 0x327   :  { %5370 = vmatpush1.bf16.msra.mxu0 %v7307_v29  ;;  %v7376_v29 = vld [vmem:[#allocation11 + $0xba0] ss:$28 sps:$4 sm:$0xff]  }
 0x328   :  { %5371 = vmatprep.subr.bf16.mxu0 %v7315_v30  ;;  %v7384_v30 = vld [vmem:[#allocation11 + $0xbdc] ss:$28 sps:$4 sm:$0xff]  }
 0x329   :  { %5515 = vmatpush1.bf16.msra.mxu1 %v7310_v31  ;;  %v7424_v25 = vld [vmem:[#allocation11 + $0xd60] ss:$28 sps:$4 sm:$0xff]  }
 0x32a   :  { %5516 = vmatprep.subr.bf16.mxu1 %v7318_v34  ;;  %v7379_v34 = vld [vmem:[#allocation11 + $0xd90] ss:$28 sps:$4 sm:$0xff]  }
 0x32b   :  { %5372 = vmatpush1.bf16.msra.mxu0 %v7313_v18 }
 0x32c   :  { %5373 = vmatprep.subr.bf16.mxu0 %v7321_v35 }
 0x32d   :  { %5517 = vmatpush1.bf16.msra.mxu1 %v7316_v36  ;;  %v7387_v36 = vld [vmem:[#allocation11 + $0xdcc] ss:$28 sps:$4 sm:$0xff]  }
 0x32e   :  { %5518 = vmatprep.subr.bf16.mxu1 %v7324_v37 }
 0x32f   :  { %5374 = vmatpush1.bf16.msra.mxu0 %v7319_v38 }
 0x330   :  { %5375 = vmatprep.subr.bf16.mxu0 %v7327_v39  ;;  %v7382_v39 = vld [vmem:[#allocation11 + $0xbd8] ss:$28 sps:$4 sm:$0xff]  }
 0x331   :  { %5519 = vmatpush1.bf16.msra.mxu1 %v7322_v40 }
 0x332   :  { %5520 = vmatprep.subr.bf16.mxu1 %v7330_v41 }
 0x333   :  { %5376 = vmatpush1.bf16.msra.mxu0 %v7325_v42  ;;  %v7390_v42 = vld [vmem:[#allocation11 + $0xc14] ss:$28 sps:$4 sm:$0xff]  }
 0x334   :  { %5377 = vmatprep.subr.bf16.mxu0 %v7333_v46 }
 0x335   :  { %5521 = vmatpush1.bf16.msra.mxu1 %v7328_v49  ;;  %v7385_v49 = vld [vmem:[#allocation11 + $0xdc8] ss:$28 sps:$4 sm:$0xff]  }
 0x336   :  { %5522 = vmatprep.subr.bf16.mxu1 %v7336_v50 }
 0x337   :  { %5378 = vmatpush1.bf16.msra.mxu0 %v7331_v51 }
 0x338   :  { %5379 = vmatprep.subr.bf16.mxu0 %v7339_v20  ;;  %v7393_v20 = vld [vmem:[#allocation11 + $0x14] ss:$28 sps:$4 sm:$0xff]  }
 0x339   :  { %5523 = vmatpush1.bf16.msra.mxu1 %v7334_v52 }
 0x33a   :  { %5524 = vmatprep.subr.bf16.mxu1 %v7342_v53 }
 0x33b   :  { %5380 = vmatpush1.bf16.msra.mxu0 %v7337_v17  ;;  %v7388_v17 = vld [vmem:[#allocation11 + $0xc10] ss:$28 sps:$4 sm:$0xff]  }
 0x33c   :  { %5381 = vmatprep.subr.bf16.mxu0 %v7345_v54 }
 0x33d   :  { %5525 = vmatpush1.bf16.msra.mxu1 %v7340_v55 }
 0x33e   :  { %5537 = vmatprep.subr.bf16.mxu1 %v7348_v56  ;;  %v7391_v56 = vld [vmem:[#allocation11 + $0x10] ss:$28 sps:$4 sm:$0xff]  }
 0x33f   :  { %5382 = vmatpush1.bf16.msra.mxu0 %v7343_v57  ;;  %v7396_v57 = vld [vmem:[#allocation11 + $0xc4c] ss:$28 sps:$4 sm:$0xff]  }
 0x340   :  { %5527 = vmatmul.mubr.bf16.vlgmr.msra.gmra.mrb[16].mxu1 %v8112_v63  ;;  %5383 = vmatprep.subr.bf16.mxu0 %v7351_v58  ;;  %v7399_v58 = vld [vmem:[#allocation11 + $0x4c] ss:$28 sps:$4 sm:$0xff]  }
 0x341   :  { %5538 = vmatpush1.bf16.msra.mxu1 %v7346_v59  ;;  %v7394_v59 = vld [vmem:[#allocation11 + $0xc48] ss:$28 sps:$4 sm:$0xff]  }
 0x342   :  { %5539 = vmatprep.subr.bf16.mxu1 %v7354_v60  ;;  %v7402_v60 = vld [vmem:[#allocation11 + $0xc84] ss:$28 sps:$4 sm:$0xff]  }
 0x343   :  { %5384 = vmatpush1.bf16.msra.mxu0 %v7349_v62  ;;  %v7397_v62 = vld [vmem:[#allocation11 + $0x48] ss:$28 sps:$4 sm:$0xff]  }
 0x344   :  { %5385 = vmatprep.subr.bf16.mxu0 %v7357_v1  ;;  %v7405_v1 = vld [vmem:[#allocation11 + $0x84] ss:$28 sps:$4 sm:$0xff]  }
 0x345   :  { %5540 = vmatpush1.bf16.msra.mxu1 %v7352_v3  ;;  %v7400_v3 = vld [vmem:[#allocation11 + $0xc80] ss:$28 sps:$4 sm:$0xff]  }
 0x346   :  { %5541 = vmatprep.subr.bf16.mxu1 %v7360_v4  ;;  %v7408_v4 = vld [vmem:[#allocation11 + $0xcbc] ss:$28 sps:$4 sm:$0xff]  }
 0x347   :  { %5386 = vmatpush1.bf16.msra.mxu0 %v7355_v5  ;;  %v7403_v5 = vld [vmem:[#allocation11 + $0x80] ss:$28 sps:$4 sm:$0xff]  }
 0x348   :  { %5387 = vmatprep.subr.bf16.mxu0 %v7363_v6  ;;  %v7411_v6 = vld [vmem:[#allocation11 + $0xbc] ss:$28 sps:$4 sm:$0xff]  }
 0x349   :  { %5542 = vmatpush1.bf16.msra.mxu1 %v7358_v7  ;;  %v7406_v7 = vld [vmem:[#allocation11 + $0xcb8] ss:$28 sps:$4 sm:$0xff]  }
 0x34a   :  { %5543 = vmatprep.subr.bf16.mxu1 %v7366_v8  ;;  %v7414_v8 = vld [vmem:[#allocation11 + $0xcf4] ss:$28 sps:$4 sm:$0xff]  }
 0x34b   :  { %5388 = vmatpush1.bf16.msra.mxu0 %v7361_v9  ;;  %v7409_v9 = vld [vmem:[#allocation11 + $0xb8] ss:$28 sps:$4 sm:$0xff]  }
 0x34c   :  { %5389 = vmatprep.subr.bf16.mxu0 %v7369_v19  ;;  %v7417_v19 = vld [vmem:[#allocation11 + $0xf4] ss:$28 sps:$4 sm:$0xff]  }
 0x34d   :  { %5544 = vmatpush1.bf16.msra.mxu1 %v7364_v10  ;;  %v7412_v10 = vld [vmem:[#allocation11 + $0xcf0] ss:$28 sps:$4 sm:$0xff]  }
 0x34e   :  { %5545 = vmatprep.subr.bf16.mxu1 %v7372_v11  ;;  %v7420_v11 = vld [vmem:[#allocation11 + $0xd2c] ss:$28 sps:$4 sm:$0xff]  }
 0x34f   :  { %5390 = vmatpush1.bf16.msra.mxu0 %v7367_v12  ;;  %v7415_v12 = vld [vmem:[#allocation11 + $0xf0] ss:$28 sps:$4 sm:$0xff]  }
 0x350   :  { %5391 = vmatprep.subr.bf16.mxu0 %v7375_v13  ;;  %v7423_v13 = vld [vmem:[#allocation11 + $0x12c] ss:$28 sps:$4 sm:$0xff]  }
 0x351   :  { %5546 = vmatpush1.bf16.msra.mxu1 %v7370_v15  ;;  %v7418_v15 = vld [vmem:[#allocation11 + $0xd28] ss:$28 sps:$4 sm:$0xff]  }
 0x352   :  { %5547 = vmatprep.subr.bf16.mxu1 %v7378_v21  ;;  %v7421_v21 = vld [vmem:[#allocation11 + $0x128] ss:$28 sps:$4 sm:$0xff]  }
 0x353   :  { %5392 = vmatpush1.bf16.msra.mxu0 %v7373_v24  ;;  %v2350_v31 = vpop.f32.mrb[12].mxu1  ;;  %v7429_v24 = vld [vmem:[#allocation11 + $0x164] ss:$28 sps:$4 sm:$0xff]  }
 0x354   :  { %v6901_v18 = vadd.f32 %v2350_v31, %v722_v26  ;;  %v2352_v35 = vpop.f32.mrb[13].mxu1  ;;  %5393 = vmatprep.subr.bf16.mxu0 %v7381_v27  ;;  %v7427_v27 = vld [vmem:[#allocation11 + $0x160] ss:$28 sps:$4 sm:$0xff]   ;;  %v7433_v31 = vld [vmem:[#allocation11 + $0x198] ss:$28 sps:$4 sm:$0xff]  }
 0x355   :  { %v6902_v37 = vadd.f32 %v2352_v35, %v726_v28  ;;  %v2354_v38 = vpop.f32.mrb[14].mxu1  ;;  %5548 = vmatpush1.bf16.msra.mxu1 %v7376_v29  ;;  %v7430_v29 = vld [vmem:[#allocation11 + $0xd98] ss:$28 sps:$4 sm:$0xff]  }
 0x356   :  { %v6903_v40 = vadd.f32 %v2354_v38, %v722_v26  ;;  %v2356_v41 = vpop.f32.mrb[15].mxu1  ;;  %5549 = vmatprep.subr.bf16.mxu1 %v7384_v30  ;;  %v2365_v50 = vmax.f32 %v6901_v18, 0.0  ;;  %v7432_v26 = vld [vmem:[#allocation11 + $0xd9c] ss:$28 sps:$4 sm:$0xff]   ;;  %v7438_v30 = vld [vmem:[#allocation11 + $0xdd4] ss:$28 sps:$4 sm:$0xff]  }
 0x357   :  { %v6904_v46 = vadd.f32 %v2356_v41, %v726_v28  ;;  %5394 = vmatpush1.bf16.msra.mxu0 %v7379_v34  ;;  %v2366_v52 = vmax.f32 %v6902_v37, 0.0  ;;  %v7435_v28 = vld [vmem:[#allocation11 + $0x19c] ss:$28 sps:$4 sm:$0xff]   ;;  %v7441_v34 = vld [vmem:[#allocation11 + $0x1d4] ss:$28 sps:$4 sm:$0xff]  }
 0x358   :  { %v2373_v51 = vmax.f32 %v6903_v40, 0.0  ;;  %5395 = vmatprep.subr.bf16.mxu0 %v7387_v36  ;;  %v7436_v18 = vld [vmem:[#allocation11 + $0xdd0] ss:$28 sps:$4 sm:$0xff]   ;;  %v7442_v35 = vld [vmem:[#allocation11 + $0x1d8] ss:$28 sps:$4 sm:$0xff]  }
 0x359   :  { %v2374_v53 = vmax.f32 %v6904_v46, 0.0  ;;  %5550 = vmatpush1.bf16.msra.mxu1 %v7382_v39  ;;  %v7439_v36 = vld [vmem:[#allocation11 + $0x1d0] ss:$28 sps:$4 sm:$0xff]   ;;  %v7446_v38 = vld [vmem:[#allocation11 + $0x18] ss:$28 sps:$4 sm:$0xff]  }
 0x35a   :  { %v8130_v54 = vpack.c.bf16 %v2373_v51, %v2365_v50  ;;  %5551 = vmatprep.subr.bf16.mxu1 %v7390_v42  ;;  %v7445_v37 = vld [vmem:[#allocation11 + $0x20c] ss:$28 sps:$4 sm:$0xff]   ;;  %v7450_v41 = vld [vmem:[#allocation11 + $0x244] ss:$28 sps:$4 sm:$0xff]   ;;  %v7455_v50 = vld [vmem:[#allocation11 + $0x27c] ss:$28 sps:$4 sm:$0xff]  }
 0x35b   :  { %v8132_v55 = vpack.c.bf16 %v2374_v53, %v2366_v52  ;;  %5396 = vmatpush1.bf16.msra.mxu0 %v7385_v49  ;;  %v7447_v39 = vld [vmem:[#allocation11 + $0x210] ss:$28 sps:$4 sm:$0xff]   ;;  %v7443_v40 = vld [vmem:[#allocation11 + $0x208] ss:$28 sps:$4 sm:$0xff]   ;;  %v7448_v49 = vld [vmem:[#allocation11 + $0x240] ss:$28 sps:$4 sm:$0xff]  }
 0x35c   :  { %5580 = vmatprep.subr.bf16.mxu0 %v7393_v20  ;;  %v7451_v42 = vld [vmem:[#allocation11 + $0x50] ss:$28 sps:$4 sm:$0xff]   ;;  %v7452_v46 = vld [vmem:[#allocation11 + $0x248] ss:$28 sps:$4 sm:$0xff]   ;;  %v7457_v20 = vld [vmem:[#allocation11 + $0x280] ss:$28 sps:$4 sm:$0xff]  }
 0x35d   :  { %5397 = vmatprep.mubr.bf16.mxu0 %v8132_v55  ;;  %5552 = vmatpush1.bf16.msra.mxu1 %v7388_v17  ;;  %v7456_v51 = vld [vmem:[#allocation11 + $0x88] ss:$28 sps:$4 sm:$0xff]   ;;  %v7453_v52 = vld [vmem:[#allocation11 + $0x278] ss:$28 sps:$4 sm:$0xff]   ;;  %v7461_v17 = vld [vmem:[#allocation11 + $0xc0] ss:$28 sps:$4 sm:$0xff]  }
 0x35e   :  { %5569 = vmatprep.mubr.bf16.mxu1 %v8132_v55  ;;  %5398 = vmatmul.mubr.bf16.vlgmr.msra.gmra.mrb[12].mxu0 %v8130_v54  ;;  %v7460_v53 = vld [vmem:[#allocation11 + $0x2b4] ss:$28 sps:$4 sm:$0xff]  }
 0x35f   :  { %5581 = vmatpush1.bf16.msra.mxu0 %v7391_v56  ;;  %5612 = vmatprep.mubr.bf16.mxu0 %v8091_v33  ;;  %v7462_v56 = vld [vmem:[#allocation11 + $0x2b8] ss:$28 sps:$4 sm:$0xff]  }
 0x360   :  { %5553 = vmatprep.subr.bf16.mxu1 %v7396_v57  ;;  %5582 = vmatprep.subr.bf16.mxu0 %v7399_v58  ;;  %v7465_v57 = vld [vmem:[#allocation11 + $0x2ec] ss:$28 sps:$4 sm:$0xff]   ;;  %v7466_v58 = vld [vmem:[#allocation11 + $0xf8] ss:$28 sps:$4 sm:$0xff]  }
 0x361   :  { %5554 = vmatpush1.bf16.msra.mxu1 %v7394_v59  ;;  %v7467_v59 = vld [vmem:[#allocation11 + $0x2f0] ss:$28 sps:$4 sm:$0xff]  }
 0x362   :  { %5555 = vmatprep.subr.bf16.mxu1 %v7402_v60  ;;  %v7463_v60 = vld [vmem:[#allocation11 + $0x2e8] ss:$28 sps:$4 sm:$0xff]  }
 0x363   :  { %5583 = vmatpush1.bf16.msra.mxu0 %v7397_v62  ;;  %v7470_v62 = vld [vmem:[#allocation11 + $0x324] ss:$28 sps:$4 sm:$0xff]  }
 0x364   :  { %5584 = vmatprep.subr.bf16.mxu0 %v7405_v1  ;;  %v7471_v1 = vld [vmem:[#allocation11 + $0x130] ss:$28 sps:$4 sm:$0xff]  }
 0x365   :  { %5556 = vmatpush1.bf16.msra.mxu1 %v7400_v3  ;;  %v7472_v3 = vld [vmem:[#allocation11 + $0x328] ss:$28 sps:$4 sm:$0xff]  }
 0x366   :  { %5557 = vmatprep.subr.bf16.mxu1 %v7408_v4  ;;  %v7468_v4 = vld [vmem:[#allocation11 + $0x320] ss:$28 sps:$4 sm:$0xff]  }
 0x367   :  { %5585 = vmatpush1.bf16.msra.mxu0 %v7403_v5  ;;  %v7475_v5 = vld [vmem:[#allocation11 + $0x35c] ss:$28 sps:$4 sm:$0xff]  }
 0x368   :  { %5586 = vmatprep.subr.bf16.mxu0 %v7411_v6  ;;  %v7476_v6 = vld [vmem:[#allocation11 + $0x168] ss:$28 sps:$4 sm:$0xff]  }
 0x369   :  { %5558 = vmatpush1.bf16.msra.mxu1 %v7406_v7  ;;  %v7477_v7 = vld [vmem:[#allocation11 + $0x360] ss:$28 sps:$4 sm:$0xff]  }
 0x36a   :  { %5559 = vmatprep.subr.bf16.mxu1 %v7414_v8  ;;  %v7473_v8 = vld [vmem:[#allocation11 + $0x358] ss:$28 sps:$4 sm:$0xff]  }
 0x36b   :  { %5587 = vmatpush1.bf16.msra.mxu0 %v7409_v9  ;;  %v7480_v9 = vld [vmem:[#allocation11 + $0x394] ss:$28 sps:$4 sm:$0xff]  }
 0x36c   :  { %5588 = vmatprep.subr.bf16.mxu0 %v7417_v19  ;;  %v7481_v19 = vld [vmem:[#allocation11 + $0x1a0] ss:$28 sps:$4 sm:$0xff]  }
 0x36d   :  { %5560 = vmatpush1.bf16.msra.mxu1 %v7412_v10  ;;  %v7482_v10 = vld [vmem:[#allocation11 + $0x558] ss:$28 sps:$4 sm:$0xff]  }
 0x36e   :  { %5561 = vmatprep.subr.bf16.mxu1 %v7420_v11  ;;  %v7478_v11 = vld [vmem:[#allocation11 + $0x390] ss:$28 sps:$4 sm:$0xff]  }
 0x36f   :  { %5589 = vmatpush1.bf16.msra.mxu0 %v7415_v12  ;;  %v7485_v12 = vld [vmem:[#allocation11 + $0x3cc] ss:$28 sps:$4 sm:$0xff]  }
 0x370   :  { %5590 = vmatprep.subr.bf16.mxu0 %v7423_v13  ;;  %v7486_v13 = vld [vmem:[#allocation11 + $0x398] ss:$28 sps:$4 sm:$0xff]  }
 0x371   :  { %5562 = vmatpush1.bf16.msra.mxu1 %v7418_v15  ;;  %v7487_v15 = vld [vmem:[#allocation11 + $0x590] ss:$28 sps:$4 sm:$0xff]  }
 0x372   :  { %5563 = vmatprep.subr.bf16.mxu1 %v7426_v16  ;;  %v7483_v16 = vld [vmem:[#allocation11 + $0x3c8] ss:$28 sps:$4 sm:$0xff]  }
 0x373   :  { %5591 = vmatpush1.bf16.msra.mxu0 %v7421_v21  ;;  %v7490_v21 = vld [vmem:[#allocation11 + $0x404] ss:$28 sps:$4 sm:$0xff]  }
 0x374   :  { %5592 = vmatprep.subr.bf16.mxu0 %v7429_v24  ;;  %v7491_v24 = vld [vmem:[#allocation11 + $0x3d0] ss:$28 sps:$4 sm:$0xff]  }
 0x375   :  { %5564 = vmatpush1.bf16.msra.mxu1 %v7424_v25  ;;  %v7492_v25 = vld [vmem:[#allocation11 + $0x5c8] ss:$28 sps:$4 sm:$0xff]  }
 0x376   :  { %5565 = vmatprep.subr.bf16.mxu1 %v7432_v26  ;;  %v7488_v26 = vld [vmem:[#allocation11 + $0x400] ss:$28 sps:$4 sm:$0xff]  }
 0x377   :  { %5593 = vmatpush1.bf16.msra.mxu0 %v7427_v27  ;;  %v7495_v27 = vld [vmem:[#allocation11 + $0x43c] ss:$28 sps:$4 sm:$0xff]  }
 0x378   :  { %5594 = vmatprep.subr.bf16.mxu0 %v7435_v28  ;;  %v7496_v28 = vld [vmem:[#allocation11 + $0x408] ss:$28 sps:$4 sm:$0xff]  }
 0x379   :  { %5566 = vmatpush1.bf16.msra.mxu1 %v7430_v29  ;;  %v7497_v29 = vld [vmem:[#allocation11 + $0x600] ss:$28 sps:$4 sm:$0xff]  }
 0x37a   :  { %5567 = vmatprep.subr.bf16.mxu1 %v7438_v30  ;;  %v7493_v30 = vld [vmem:[#allocation11 + $0x438] ss:$28 sps:$4 sm:$0xff]  }
 0x37b   :  { %5595 = vmatpush1.bf16.msra.mxu0 %v7433_v31  ;;  %v7501_v31 = vld [vmem:[#allocation11 + $0x440] ss:$28 sps:$4 sm:$0xff]  }
 0x37c   :  { %5596 = vmatprep.subr.bf16.mxu0 %v7441_v34  ;;  %v7502_v34 = vld [vmem:[#allocation11 + $0x638] ss:$28 sps:$4 sm:$0xff]  }
 0x37d   :  { %5568 = vmatpush1.bf16.msra.mxu1 %v7436_v18  ;;  %v7505_v18 = vld [vmem:[#allocation11 + $0x4ac] ss:$28 sps:$4 sm:$0xff]  }
 0x37e   :  { %6797 = vmatprep.subr.bf16.mxu1 %v7442_v35  ;;  %v7506_v35 = vld [vmem:[#allocation11 + $0x478] ss:$28 sps:$4 sm:$0xff]  }
 0x37f   :  { %5597 = vmatpush1.bf16.msra.mxu0 %v7439_v36  ;;  %v7507_v36 = vld [vmem:[#allocation11 + $0x670] ss:$28 sps:$4 sm:$0xff]  }
 0x380   :  { %5570 = vmatmul.mubr.bf16.vlgmr.msra.gmra.mrb[16].mxu1 %v8130_v54  ;;  %5598 = vmatprep.subr.bf16.mxu0 %v7445_v37  ;;  %v7503_v37 = vld [vmem:[#allocation11 + $0x4a8] ss:$28 sps:$4 sm:$0xff]  }
 0x381   :  { %6798 = vmatpush3.bf16.msra.mxu1 %v7446_v38  ;;  %5784 = vmatprep.mubr.bf16.mxu1 %v8091_v33  ;;  %v7458_v33 = vld [vmem:[#allocation11 + $0x2b0] ss:$28 sps:$4 sm:$0xff]   ;;  %v7510_v38 = vld [vmem:[#allocation11 + $0x4e4] ss:$28 sps:$4 sm:$0xff]  }
 0x382   :  { %6799 = vmatprep.subr.bf16.mxu1 %v7447_v39  ;;  %v7511_v39 = vld [vmem:[#allocation11 + $0x4b0] ss:$28 sps:$4 sm:$0xff]  }
 0x383   :  { %5599 = vmatpush1.bf16.msra.mxu0 %v7443_v40  ;;  %v7512_v40 = vld [vmem:[#allocation11 + $0x6a8] ss:$28 sps:$4 sm:$0xff]  }
 0x384   :  { %5600 = vmatprep.subr.bf16.mxu0 %v7450_v41  ;;  %v7508_v41 = vld [vmem:[#allocation11 + $0x4e0] ss:$28 sps:$4 sm:$0xff]  }
 0x385   :  { %6800 = vmatpush3.bf16.msra.mxu1 %v7451_v42  ;;  %v7515_v42 = vld [vmem:[#allocation11 + $0x51c] ss:$28 sps:$4 sm:$0xff]  }
 0x386   :  { %6801 = vmatprep.subr.bf16.mxu1 %v7452_v46  ;;  %v7516_v46 = vld [vmem:[#allocation11 + $0x4e8] ss:$28 sps:$4 sm:$0xff]  }
 0x387   :  { %5601 = vmatpush1.bf16.msra.mxu0 %v7448_v49  ;;  %v7517_v49 = vld [vmem:[#allocation11 + $0x6e0] ss:$28 sps:$4 sm:$0xff]  }
 0x388   :  { %5602 = vmatprep.subr.bf16.mxu0 %v7455_v50  ;;  %v7513_v50 = vld [vmem:[#allocation11 + $0x518] ss:$28 sps:$4 sm:$0xff]  }
 0x389   :  { %6802 = vmatpush3.bf16.msra.mxu1 %v7456_v51  ;;  %v7520_v51 = vld [vmem:[#allocation11 + $0x554] ss:$28 sps:$4 sm:$0xff]  }
 0x38a   :  { %6803 = vmatprep.subr.bf16.mxu1 %v7457_v20  ;;  %v7521_v20 = vld [vmem:[#allocation11 + $0x520] ss:$28 sps:$4 sm:$0xff]  }
 0x38b   :  { %5603 = vmatpush1.bf16.msra.mxu0 %v7453_v52  ;;  %v7522_v52 = vld [vmem:[#allocation11 + $0x8d8] ss:$28 sps:$4 sm:$0xff]  }
 0x38c   :  { %5604 = vmatprep.subr.bf16.mxu0 %v7460_v53  ;;  %v7518_v53 = vld [vmem:[#allocation11 + $0x550] ss:$28 sps:$4 sm:$0xff]  }
 0x38d   :  { %6804 = vmatpush3.bf16.msra.mxu1 %v7461_v17  ;;  %v7525_v17 = vld [vmem:[#allocation11 + $0x58c] ss:$28 sps:$4 sm:$0xff]  }
 0x38e   :  { %6805 = vmatprep.subr.bf16.mxu1 %v7462_v56  ;;  %v7526_v56 = vld [vmem:[#allocation11 + $0x718] ss:$28 sps:$4 sm:$0xff]  }
 0x38f   :  { %5605 = vmatpush1.bf16.msra.mxu0 %v7458_v33  ;;  %v7527_v33 = vld [vmem:[#allocation11 + $0x910] ss:$28 sps:$4 sm:$0xff]  }
 0x390   :  { %5606 = vmatprep.subr.bf16.mxu0 %v7465_v57  ;;  %v7523_v57 = vld [vmem:[#allocation11 + $0x588] ss:$28 sps:$4 sm:$0xff]  }
 0x391   :  { %6806 = vmatpush3.bf16.msra.mxu1 %v7466_v58  ;;  %v7530_v58 = vld [vmem:[#allocation11 + $0x5c4] ss:$28 sps:$4 sm:$0xff]  }
 0x392   :  { %6807 = vmatprep.subr.bf16.mxu1 %v7467_v59  ;;  %v7531_v59 = vld [vmem:[#allocation11 + $0x750] ss:$28 sps:$4 sm:$0xff]  }
 0x393   :  { %5607 = vmatpush1.bf16.msra.mxu0 %v7463_v60  ;;  %v7532_v60 = vld [vmem:[#allocation11 + $0x948] ss:$28 sps:$4 sm:$0xff]  }
 0x394   :  { %5608 = vmatprep.subr.bf16.mxu0 %v7470_v62  ;;  %v7528_v62 = vld [vmem:[#allocation11 + $0x5c0] ss:$28 sps:$4 sm:$0xff]  }
 0x395   :  { %6808 = vmatpush3.bf16.msra.mxu1 %v7471_v1  ;;  %v7535_v1 = vld [vmem:[#allocation11 + $0x5fc] ss:$28 sps:$4 sm:$0xff]  }
 0x396   :  { %6809 = vmatprep.subr.bf16.mxu1 %v7472_v3  ;;  %v7536_v3 = vld [vmem:[#allocation11 + $0x788] ss:$28 sps:$4 sm:$0xff]  }
 0x397   :  { %5609 = vmatpush1.bf16.msra.mxu0 %v7468_v4  ;;  %v7537_v4 = vld [vmem:[#allocation11 + $0x980] ss:$28 sps:$4 sm:$0xff]  }
 0x398   :  { %5610 = vmatprep.subr.bf16.mxu0 %v7475_v5  ;;  %v7533_v5 = vld [vmem:[#allocation11 + $0x5f8] ss:$28 sps:$4 sm:$0xff]  }
 0x399   :  { %6810 = vmatpush3.bf16.msra.mxu1 %v7476_v6  ;;  %v7540_v6 = vld [vmem:[#allocation11 + $0x634] ss:$28 sps:$4 sm:$0xff]  }
 0x39a   :  { %6811 = vmatprep.subr.bf16.mxu1 %v7477_v7  ;;  %v7541_v7 = vld [vmem:[#allocation11 + $0x7c0] ss:$28 sps:$4 sm:$0xff]  }
 0x39b   :  { %5611 = vmatpush1.bf16.msra.mxu0 %v7473_v8  ;;  %v7542_v8 = vld [vmem:[#allocation11 + $0x9b8] ss:$28 sps:$4 sm:$0xff]  }
 0x39c   :  { %5623 = vmatprep.subr.bf16.mxu0 %v7480_v9  ;;  %v7538_v9 = vld [vmem:[#allocation11 + $0x630] ss:$28 sps:$4 sm:$0xff]  }
 0x39d   :  { %6812 = vmatpush3.bf16.msra.mxu1 %v7481_v19  ;;  %v7545_v19 = vld [vmem:[#allocation11 + $0x66c] ss:$28 sps:$4 sm:$0xff]  }
 0x39e   :  { %5613 = vmatmul.mubr.bf16.vlgmr.msra.gmra.mrb[16].mxu0 %v8089_v32  ;;  %6819 = vmatprep.subr.bf16.mxu1 %v7482_v10  ;;  %v7546_v10 = vld [vmem:[#allocation11 + $0x7f8] ss:$28 sps:$4 sm:$0xff]  }
 0x39f   :  { %5624 = vmatpush1.bf16.msra.mxu0 %v7478_v11  ;;  %5655 = vmatprep.mubr.bf16.mxu0 %v8114_v0  ;;  %v7547_v11 = vld [vmem:[#allocation11 + $0x9f0] ss:$28 sps:$4 sm:$0xff]  }
 0x3a0   :  { %5785 = vmatmul.mubr.bf16.vlgmr.msra.gmra.mrb[20].mxu1 %v8089_v32  ;;  %5625 = vmatprep.subr.bf16.mxu0 %v7485_v12  ;;  %v7500_v32 = vld [vmem:[#allocation11 + $0x474] ss:$28 sps:$4 sm:$0xff]   ;;  %v7543_v12 = vld [vmem:[#allocation11 + $0x668] ss:$28 sps:$4 sm:$0xff]  }
 0x3a1   :  { %6820 = vmatpush3.bf16.msra.mxu1 %v7486_v13  ;;  %5825 = vmatprep.mubr.bf16.mxu1 %v8114_v0  ;;  %v7498_v0 = vld [vmem:[#allocation11 + $0x470] ss:$28 sps:$4 sm:$0xff]   ;;  %v7550_v13 = vld [vmem:[#allocation11 + $0x6a4] ss:$28 sps:$4 sm:$0xff]  }
 0x3a2   :  { %6821 = vmatprep.subr.bf16.mxu1 %v7487_v15  ;;  %v7551_v15 = vld [vmem:[#allocation11 + $0x830] ss:$28 sps:$4 sm:$0xff]  }
 0x3a3   :  { %5626 = vmatpush1.bf16.msra.mxu0 %v7483_v16  ;;  %v7552_v16 = vld [vmem:[#allocation11 + $0xa28] ss:$28 sps:$4 sm:$0xff]  }
 0x3a4   :  { %5627 = vmatprep.subr.bf16.mxu0 %v7490_v21  ;;  %v7548_v21 = vld [vmem:[#allocation11 + $0x6a0] ss:$28 sps:$4 sm:$0xff]  }
 0x3a5   :  { %6822 = vmatpush3.bf16.msra.mxu1 %v7491_v24  ;;  %v7555_v24 = vld [vmem:[#allocation11 + $0x6dc] ss:$28 sps:$4 sm:$0xff]  }
 0x3a6   :  { %6823 = vmatprep.subr.bf16.mxu1 %v7492_v25  ;;  %v7556_v25 = vld [vmem:[#allocation11 + $0x868] ss:$28 sps:$4 sm:$0xff]  }
 0x3a7   :  { %5628 = vmatpush1.bf16.msra.mxu0 %v7488_v26  ;;  %v7557_v26 = vld [vmem:[#allocation11 + $0xa60] ss:$28 sps:$4 sm:$0xff]  }
 0x3a8   :  { %5629 = vmatprep.subr.bf16.mxu0 %v7495_v27  ;;  %v7553_v27 = vld [vmem:[#allocation11 + $0x6d8] ss:$28 sps:$4 sm:$0xff]  }
 0x3a9   :  { %6824 = vmatpush3.bf16.msra.mxu1 %v7496_v28  ;;  %v7560_v28 = vld [vmem:[#allocation11 + $0x714] ss:$28 sps:$4 sm:$0xff]  }
 0x3aa   :  { %6825 = vmatprep.subr.bf16.mxu1 %v7497_v29  ;;  %v7561_v29 = vld [vmem:[#allocation11 + $0x8a0] ss:$28 sps:$4 sm:$0xff]  }
 0x3ab   :  { %5630 = vmatpush1.bf16.msra.mxu0 %v7493_v30  ;;  %v7562_v30 = vld [vmem:[#allocation11 + $0xc58] ss:$28 sps:$4 sm:$0xff]  }
 0x3ac   :  { %5631 = vmatprep.subr.bf16.mxu0 %v7500_v32  ;;  %v7558_v32 = vld [vmem:[#allocation11 + $0x710] ss:$28 sps:$4 sm:$0xff]  }
 0x3ad   :  { %6826 = vmatpush3.bf16.msra.mxu1 %v7501_v31  ;;  %v7565_v31 = vld [vmem:[#allocation11 + $0x74c] ss:$28 sps:$4 sm:$0xff]  }
 0x3ae   :  { %6827 = vmatprep.subr.bf16.mxu1 %v7502_v34  ;;  %v7566_v34 = vld [vmem:[#allocation11 + $0xa98] ss:$28 sps:$4 sm:$0xff]  }
 0x3af   :  { %5632 = vmatpush1.bf16.msra.mxu0 %v7498_v0  ;;  %v7567_v0 = vld [vmem:[#allocation11 + $0xc90] ss:$28 sps:$4 sm:$0xff]  }
 0x3b0   :  { %5633 = vmatprep.subr.bf16.mxu0 %v7505_v18  ;;  %v7563_v18 = vld [vmem:[#allocation11 + $0x748] ss:$28 sps:$4 sm:$0xff]  }
 0x3b1   :  { %6828 = vmatpush3.bf16.msra.mxu1 %v7506_v35  ;;  %v7570_v35 = vld [vmem:[#allocation11 + $0x784] ss:$28 sps:$4 sm:$0xff]  }
 0x3b2   :  { %6829 = vmatprep.subr.bf16.mxu1 %v7507_v36  ;;  %v7571_v36 = vld [vmem:[#allocation11 + $0xad0] ss:$28 sps:$4 sm:$0xff]  }
 0x3b3   :  { %5634 = vmatpush1.bf16.msra.mxu0 %v7503_v37  ;;  %v7572_v37 = vld [vmem:[#allocation11 + $0xcc8] ss:$28 sps:$4 sm:$0xff]  }
 0x3b4   :  { %5635 = vmatprep.subr.bf16.mxu0 %v7510_v38  ;;  %v7568_v38 = vld [vmem:[#allocation11 + $0x780] ss:$28 sps:$4 sm:$0xff]  }
 0x3b5   :  { %6830 = vmatpush3.bf16.msra.mxu1 %v7511_v39  ;;  %v7576_v39 = vld [vmem:[#allocation11 + $0xb08] ss:$28 sps:$4 sm:$0xff]  }
 0x3b6   :  { %6831 = vmatprep.subr.bf16.mxu1 %v7512_v40  ;;  %v7577_v40 = vld [vmem:[#allocation11 + $0xd00] ss:$28 sps:$4 sm:$0xff]  }
 0x3b7   :  { %5636 = vmatpush1.bf16.msra.mxu0 %v7508_v41  ;;  %v7580_v41 = vld [vmem:[#allocation11 + $0x7f4] ss:$28 sps:$4 sm:$0xff]  }
 0x3b8   :  { %5637 = vmatprep.subr.bf16.mxu0 %v7515_v42  ;;  %v7581_v42 = vld [vmem:[#allocation11 + $0xb40] ss:$28 sps:$4 sm:$0xff]  }
 0x3b9   :  { %6832 = vmatpush3.bf16.msra.mxu1 %v7516_v46  ;;  %v7582_v46 = vld [vmem:[#allocation11 + $0xd38] ss:$28 sps:$4 sm:$0xff]  }
 0x3ba   :  { %6833 = vmatprep.subr.bf16.mxu1 %v7517_v49  ;;  %v7578_v49 = vld [vmem:[#allocation11 + $0x7f0] ss:$28 sps:$4 sm:$0xff]  }
 0x3bb   :  { %5638 = vmatpush1.bf16.msra.mxu0 %v7513_v50  ;;  %v7585_v50 = vld [vmem:[#allocation11 + $0x82c] ss:$28 sps:$4 sm:$0xff]  }
 0x3bc   :  { %5639 = vmatprep.subr.bf16.mxu0 %v7520_v51  ;;  %v7586_v51 = vld [vmem:[#allocation11 + $0xb78] ss:$28 sps:$4 sm:$0xff]  }
 0x3bd   :  { %6834 = vmatpush3.bf16.msra.mxu1 %v7521_v20  ;;  %v7587_v20 = vld [vmem:[#allocation11 + $0xd70] ss:$28 sps:$4 sm:$0xff]  }
 0x3be   :  { %6841 = vmatprep.subr.bf16.mxu1 %v7522_v52  ;;  %v7583_v52 = vld [vmem:[#allocation11 + $0x828] ss:$28 sps:$4 sm:$0xff]  }
 0x3bf   :  { %5640 = vmatpush1.bf16.msra.mxu0 %v7518_v53  ;;  %v7590_v53 = vld [vmem:[#allocation11 + $0x864] ss:$28 sps:$4 sm:$0xff]  }
 0x3c0   :  { %5826 = vmatmul.mubr.bf16.vlgmr.msra.gmra.mrb[24].mxu1 %v8110_v61  ;;  %5641 = vmatprep.subr.bf16.mxu0 %v7525_v17  ;;  %v7591_v17 = vld [vmem:[#allocation11 + $0xbb0] ss:$28 sps:$4 sm:$0xff]  }
 0x3c1   :  { %6842 = vmatpush3.bf16.msra.mxu1 %v7526_v56  ;;  %5866 = vmatprep.mubr.bf16.mxu1 %v8116_v2  ;;  %v7592_v56 = vld [vmem:[#allocation11 + $0xda8] ss:$28 sps:$4 sm:$0xff]  }
 0x3c2   :  { %6843 = vmatprep.subr.bf16.mxu1 %v7527_v33  ;;  %v7588_v33 = vld [vmem:[#allocation11 + $0x860] ss:$28 sps:$4 sm:$0xff]  }
 0x3c3   :  { %5642 = vmatpush1.bf16.msra.mxu0 %v7523_v57  ;;  %v7595_v57 = vld [vmem:[#allocation11 + $0x89c] ss:$28 sps:$4 sm:$0xff]  }
 0x3c4   :  { %5643 = vmatprep.subr.bf16.mxu0 %v7530_v58  ;;  %v7596_v58 = vld [vmem:[#allocation11 + $0xbe8] ss:$28 sps:$4 sm:$0xff]  }
 0x3c5   :  { %6844 = vmatpush3.bf16.msra.mxu1 %v7531_v59  ;;  %v7597_v59 = vld [vmem:[#allocation11 + $0xde0] ss:$28 sps:$4 sm:$0xff]  }
 0x3c6   :  { %6845 = vmatprep.subr.bf16.mxu1 %v7532_v60  ;;  %v7593_v60 = vld [vmem:[#allocation11 + $0x898] ss:$28 sps:$4 sm:$0xff]  }
 0x3c7   :  { %5644 = vmatpush1.bf16.msra.mxu0 %v7528_v62  ;;  %v7600_v62 = vld [vmem:[#allocation11 + $0x8d4] ss:$28 sps:$4 sm:$0xff]  }
 0x3c8   :  { %5645 = vmatprep.subr.bf16.mxu0 %v7535_v1  ;;  %v7601_v1 = vld [vmem:[#allocation11 + $0xc20] ss:$28 sps:$4 sm:$0xff]  }
 0x3c9   :  { %6846 = vmatpush3.bf16.msra.mxu1 %v7536_v3  ;;  %v7598_v3 = vld [vmem:[#allocation11 + $0x8d0] ss:$28 sps:$4 sm:$0xff]  }
 0x3ca   :  { %6847 = vmatprep.subr.bf16.mxu1 %v7537_v4  ;;  %v7604_v4 = vld [vmem:[#allocation11 + $0x90c] ss:$28 sps:$4 sm:$0xff]  }
 0x3cb   :  { %5646 = vmatpush1.bf16.msra.mxu0 %v7533_v5  ;;  %v7602_v5 = vld [vmem:[#allocation11 + $0x908] ss:$28 sps:$4 sm:$0xff]  }
 0x3cc   :  { %5647 = vmatprep.subr.bf16.mxu0 %v7540_v6  ;;  %v7607_v6 = vld [vmem:[#allocation11 + $0x944] ss:$28 sps:$4 sm:$0xff]  }
 0x3cd   :  { %6848 = vmatpush3.bf16.msra.mxu1 %v7541_v7  ;;  %v7605_v7 = vld [vmem:[#allocation11 + $0x940] ss:$28 sps:$4 sm:$0xff]  }
 0x3ce   :  { %6849 = vmatprep.subr.bf16.mxu1 %v7542_v8  ;;  %v7610_v8 = vld [vmem:[#allocation11 + $0x97c] ss:$28 sps:$4 sm:$0xff]  }
 0x3cf   :  { %5648 = vmatpush1.bf16.msra.mxu0 %v7538_v9  ;;  %v7608_v9 = vld [vmem:[#allocation11 + $0x978] ss:$28 sps:$4 sm:$0xff]  }
 0x3d0   :  { %5649 = vmatprep.subr.bf16.mxu0 %v7545_v19  ;;  %v7613_v19 = vld [vmem:[#allocation11 + $0x9b4] ss:$28 sps:$4 sm:$0xff]  }
 0x3d1   :  { %6850 = vmatpush3.bf16.msra.mxu1 %v7546_v10  ;;  %v7611_v10 = vld [vmem:[#allocation11 + $0x9b0] ss:$28 sps:$4 sm:$0xff]  }
 0x3d2   :  { %6851 = vmatprep.subr.bf16.mxu1 %v7547_v11  ;;  %v7616_v11 = vld [vmem:[#allocation11 + $0x9ec] ss:$28 sps:$4 sm:$0xff]  }
 0x3d3   :  { %5650 = vmatpush1.bf16.msra.mxu0 %v7543_v12  ;;  %v7614_v12 = vld [vmem:[#allocation11 + $0x9e8] ss:$28 sps:$4 sm:$0xff]  }
 0x3d4   :  { %5651 = vmatprep.subr.bf16.mxu0 %v7550_v13  ;;  %v7619_v13 = vld [vmem:[#allocation11 + $0xa24] ss:$28 sps:$4 sm:$0xff]  }
 0x3d5   :  { %6852 = vmatpush3.bf16.msra.mxu1 %v7551_v15  ;;  %v7617_v15 = vld [vmem:[#allocation11 + $0xa20] ss:$28 sps:$4 sm:$0xff]  }
 0x3d6   :  { %6853 = vmatprep.subr.bf16.mxu1 %v7552_v16  ;;  %v7622_v16 = vld [vmem:[#allocation11 + $0xa5c] ss:$28 sps:$4 sm:$0xff]  }
 0x3d7   :  { %5652 = vmatpush1.bf16.msra.mxu0 %v7548_v21  ;;  %v7620_v21 = vld [vmem:[#allocation11 + $0xa58] ss:$28 sps:$4 sm:$0xff]  }
 0x3d8   :  { %5653 = vmatprep.subr.bf16.mxu0 %v7555_v24  ;;  %v7625_v24 = vld [vmem:[#allocation11 + $0xa94] ss:$28 sps:$4 sm:$0xff]  }
 0x3d9   :  { %6854 = vmatpush3.bf16.msra.mxu1 %v7556_v25  ;;  %v7623_v25 = vld [vmem:[#allocation11 + $0xa90] ss:$28 sps:$4 sm:$0xff]  }
 0x3da   :  { %6855 = vmatprep.subr.bf16.mxu1 %v7557_v26  ;;  %v7628_v26 = vld [vmem:[#allocation11 + $0xacc] ss:$28 sps:$4 sm:$0xff]  }
 0x3db   :  { %5654 = vmatpush1.bf16.msra.mxu0 %v7553_v27  ;;  %v7626_v27 = vld [vmem:[#allocation11 + $0xac8] ss:$28 sps:$4 sm:$0xff]  }
 0x3dc   :  { %5666 = vmatprep.subr.bf16.mxu0 %v7560_v28  ;;  %v7631_v28 = vld [vmem:[#allocation11 + $0xb04] ss:$28 sps:$4 sm:$0xff]  }
 0x3dd   :  { %6856 = vmatpush3.bf16.msra.mxu1 %v7561_v29  ;;  %v7629_v29 = vld [vmem:[#allocation11 + $0xb00] ss:$28 sps:$4 sm:$0xff]  }
 0x3de   :  { %5656 = vmatmul.mubr.bf16.vlgmr.msra.gmra.mrb[16].mxu0 %v8110_v61  ;;  %6863 = vmatprep.subr.bf16.mxu1 %v7562_v30  ;;  %v7575_v61 = vld [vmem:[#allocation11 + $0x7bc] ss:$28 sps:$4 sm:$0xff]  }
 0x3df   :  { %5667 = vmatpush1.bf16.msra.mxu0 %v7558_v32  ;;  %5698 = vmatprep.mubr.bf16.mxu0 %v8116_v2  ;;  %v7573_v2 = vld [vmem:[#allocation11 + $0x7b8] ss:$28 sps:$4 sm:$0xff]  }
 0x3e0   :  { %5867 = vmatmul.mubr.bf16.vlgmr.msra.gmra.mrb[28].mxu1 %v8112_v63  ;;  %5668 = vmatprep.subr.bf16.mxu0 %v7565_v31  ;;  %v7634_v30 = vld [vmem:[#allocation11 + $0xb3c] ss:$28 sps:$4 sm:$0xff]   ;;  %v7637_v31 = vld [vmem:[#allocation11 + $0xb74] ss:$28 sps:$4 sm:$0xff]  }
 0x3e1   :  { %6864 = vmatpush3.bf16.msra.mxu1 %v7566_v34  ;;  %5907 = vmatprep.mubr.bf16.mxu1 %v8132_v55  ;;  %v7632_v32 = vld [vmem:[#allocation11 + $0xb38] ss:$28 sps:$4 sm:$0xff]   ;;  %v7635_v34 = vld [vmem:[#allocation11 + $0xb70] ss:$28 sps:$4 sm:$0xff]  }
 0x3e2   :  { %6865 = vmatprep.subr.bf16.mxu1 %v7567_v0  ;;  %v8153_v0 = vld [vmem:[#allocation13] sm:$0xff] }
 0x3e3   :  { %5669 = vmatpush1.bf16.msra.mxu0 %v7563_v18  ;;  %v7638_v18 = vld [vmem:[#allocation11 + $0xba8] ss:$28 sps:$4 sm:$0xff]  }
 0x3e4   :  { %5670 = vmatprep.subr.bf16.mxu0 %v7570_v35  ;;  %v2904_v35 = vrot.slane %v8153_v0, %v8051_v47 }
 0x3e5   :  { %6866 = vmatpush3.bf16.msra.mxu1 %v7571_v36  ;;  %v7643_v36 = vld [vmem:[#allocation11 + $0xbe4] ss:$28 sps:$4 sm:$0xff]  }
 0x3e6   :  { %6867 = vmatprep.subr.bf16.mxu1 %v7572_v37 }
 0x3e7   :  { %5671 = vmatpush1.bf16.msra.mxu0 %v7568_v38 }
 0x3e8   :  { %5672 = vmatprep.subr.bf16.mxu0 %v7575_v61 }
 0x3e9   :  { %6868 = vmatpush3.bf16.msra.mxu1 %v7576_v39 }
 0x3ea   :  { %6869 = vmatprep.subr.bf16.mxu1 %v7577_v40 }
 0x3eb   :  { %5673 = vmatpush1.bf16.msra.mxu0 %v7573_v2  ;;  %v7641_v2 = vld [vmem:[#allocation11 + $0xbe0] ss:$28 sps:$4 sm:$0xff]  }
 0x3ec   :  { %5674 = vmatprep.subr.bf16.mxu0 %v7580_v41 }
 0x3ed   :  { %6870 = vmatpush3.bf16.msra.mxu1 %v7581_v42 }
 0x3ee   :  { %6871 = vmatprep.subr.bf16.mxu1 %v7582_v46 }
 0x3ef   :  { %5675 = vmatpush1.bf16.msra.mxu0 %v7578_v49  ;;  %v7646_v49 = vld [vmem:[#allocation11 + $0xc1c] ss:$28 sps:$4 sm:$0xff]  }
 0x3f0   :  { %5676 = vmatprep.subr.bf16.mxu0 %v7585_v50 }
 0x3f1   :  { %6872 = vmatpush3.bf16.msra.mxu1 %v7586_v51 }
 0x3f2   :  { %6873 = vmatprep.subr.bf16.mxu1 %v7587_v20  ;;  %v7644_v20 = vld [vmem:[#allocation11 + $0xc18] ss:$28 sps:$4 sm:$0xff]  }
 0x3f3   :  { %5677 = vmatpush1.bf16.msra.mxu0 %v7583_v52  ;;  %v7649_v52 = vld [vmem:[#allocation11 + $0xc54] ss:$28 sps:$4 sm:$0xff]  }
 0x3f4   :  { %5678 = vmatprep.subr.bf16.mxu0 %v7590_v53  ;;  %v7647_v53 = vld [vmem:[#allocation11 + $0xc50] ss:$28 sps:$4 sm:$0xff]  }
 0x3f5   :  { %6874 = vmatpush3.bf16.msra.mxu1 %v7591_v17  ;;  %v7652_v17 = vld [vmem:[#allocation11 + $0xc8c] ss:$28 sps:$4 sm:$0xff]  }
 0x3f6   :  { %6875 = vmatprep.subr.bf16.mxu1 %v7592_v56  ;;  %v7650_v56 = vld [vmem:[#allocation11 + $0xc88] ss:$28 sps:$4 sm:$0xff]  }
 0x3f7   :  { %5679 = vmatpush1.bf16.msra.mxu0 %v7588_v33 }
 0x3f8   :  { %5680 = vmatprep.subr.bf16.mxu0 %v7595_v57  ;;  %v7655_v57 = vld [vmem:[#allocation11 + $0xcc4] ss:$28 sps:$4 sm:$0xff]  }
 0x3f9   :  { %6876 = vmatpush3.bf16.msra.mxu1 %v7596_v58 }
 0x3fa   :  { %6877 = vmatprep.subr.bf16.mxu1 %v7597_v59 }
 0x3fb   :  { %5681 = vmatpush1.bf16.msra.mxu0 %v7593_v60 }
 0x3fc   :  { %5682 = vmatprep.subr.bf16.mxu0 %v7600_v62 }
 0x3fd   :  { %6878 = vmatpush3.bf16.msra.mxu1 %v7601_v1 }
 0x3ff   :  { %5683 = vmatpush1.bf16.msra.mxu0 %v7598_v3 }
 0x400   :  { %5908 = vmatmul.mubr.bf16.vlgmr.msra.gmra.mrb[32].mxu1 %v8130_v54  ;;  %5684 = vmatprep.subr.bf16.mxu0 %v7604_v4 }
 0x403   :  { %5685 = vmatpush1.bf16.msra.mxu0 %v7602_v5  ;;  %v7653_v5 = vld [vmem:[#allocation11 + $0xcc0] ss:$28 sps:$4 sm:$0xff]  }
 0x404   :  { %5686 = vmatprep.subr.bf16.mxu0 %v7607_v6 }
 0x407   :  { %5687 = vmatpush1.bf16.msra.mxu0 %v7605_v7 }
 0x408   :  { %5688 = vmatprep.subr.bf16.mxu0 %v7610_v8  ;;  %v7658_v8 = vld [vmem:[#allocation11 + $0xcfc] ss:$28 sps:$4 sm:$0xff]  }
 0x40b   :  { %5689 = vmatpush1.bf16.msra.mxu0 %v7608_v9 }
 0x40c   :  { %5690 = vmatprep.subr.bf16.mxu0 %v7613_v19 }
 0x40f   :  { %5691 = vmatpush1.bf16.msra.mxu0 %v7611_v10 }
 0x410   :  { %5692 = vmatprep.subr.bf16.mxu0 %v7616_v11  ;;  %v7656_v11 = vld [vmem:[#allocation11 + $0xcf8] ss:$28 sps:$4 sm:$0xff]  }
 0x413   :  { %5693 = vmatpush1.bf16.msra.mxu0 %v7614_v12 }
 0x414   :  { %5694 = vmatprep.subr.bf16.mxu0 %v7619_v13  ;;  %v7661_v13 = vld [vmem:[#allocation11 + $0xd34] ss:$28 sps:$4 sm:$0xff]  }
 0x417   :  { %5695 = vmatpush1.bf16.msra.mxu0 %v7617_v15  ;;  %v7659_v15 = vld [vmem:[#allocation11 + $0xd30] ss:$28 sps:$4 sm:$0xff]  }
 0x418   :  { %5696 = vmatprep.subr.bf16.mxu0 %v7622_v16  ;;  %v7664_v16 = vld [vmem:[#allocation11 + $0xd6c] ss:$28 sps:$4 sm:$0xff]  }
 0x41b   :  { %5697 = vmatpush1.bf16.msra.mxu0 %v7620_v21  ;;  %v7662_v21 = vld [vmem:[#allocation11 + $0xd68] ss:$28 sps:$4 sm:$0xff]  }
 0x41c   :  { %5709 = vmatprep.subr.bf16.mxu0 %v7625_v24  ;;  %v2908_v24 = vrot.slane %v8153_v0, %v8048_v45  ;;  %v7668_v45 = vld [vmem:[#allocation11 + $0xdd8] ss:$28 sps:$4 sm:$0xff]  }
 0x41e   :  { %5699 = vmatmul.mubr.bf16.vlgmr.msra.gmra.mrb[16].mxu0 %v8112_v63  ;;  %v7640_v63 = vld [vmem:[#allocation11 + $0xbac] ss:$28 sps:$4 sm:$0xff]  }
 0x41f   :  { %5710 = vmatpush1.bf16.msra.mxu0 %v7623_v25  ;;  %5741 = vmatprep.mubr.bf16.mxu0 %v8132_v55  ;;  %v2900_v55 = vrot.slane %v8153_v0, %v8045_v44  ;;  %v7667_v25 = vld [vmem:[#allocation11 + $0xda4] ss:$28 sps:$4 sm:$0xff]  }
 0x420   :  { %5711 = vmatprep.subr.bf16.mxu0 %v7628_v26  ;;  %v2912_v26 = vrot.slane %v8153_v0, %v8054_v48 }
 0x423   :  { %5712 = vmatpush1.bf16.msra.mxu0 %v7626_v27 }
 0x424   :  { %5713 = vmatprep.subr.bf16.mxu0 %v7631_v28  ;;  %v7665_v28 = vld [vmem:[#allocation11 + $0xda0] ss:$28 sps:$4 sm:$0xff]  }
 0x427   :  { %5714 = vmatpush1.bf16.msra.mxu0 %v7629_v29 }
 0x428   :  { %5715 = vmatprep.subr.bf16.mxu0 %v7634_v30 }
 0x42b   :  { %5716 = vmatpush1.bf16.msra.mxu0 %v7632_v32  ;;  %v7670_v32 = vld [vmem:[#allocation11 + $0xddc] ss:$28 sps:$4 sm:$0xff]  }
 0x42c   :  { %5717 = vmatprep.subr.bf16.mxu0 %v7637_v31 }
 0x42f   :  { %5718 = vmatpush1.bf16.msra.mxu0 %v7635_v34 }
 0x430   :  { %5719 = vmatprep.subr.bf16.mxu0 %v7640_v63 }
 0x431   :  { %v5399_v37 = vpop.f32.mrb[12].mxu0 }
 0x432   :  { %v6905_v38 = vadd.f32 %v5399_v37, %v2900_v55  ;;  %v5401_v61 = vpop.f32.mrb[13].mxu0 }
 0x433   :  { %v6906_v39 = vadd.f32 %v5401_v61, %v2904_v35  ;;  %5720 = vmatpush1.bf16.msra.mxu0 %v7638_v18  ;;  %v5403_v40 = vpop.f32.mrb[14].mxu0 }
 0x434   :  { %v5916_v41 = vmul.f32 0.5, %v6905_v38  ;;  %v6907_v42 = vadd.f32 %v5403_v40, %v2900_v55  ;;  %v5405_v46 = vpop.f32.mrb[15].mxu0  ;;  %5721 = vmatprep.subr.bf16.mxu0 %v7643_v36 }
 0x435   :  { %v5917_v44 = vmul.f32 0.5, %v6906_v39  ;;  %v6908_v50 = vadd.f32 %v5405_v46, %v2904_v35 }
 0x436   :  { %7671 = vtanh.f32 %v5916_v41  ;;  %v5923_v51 = vmul.f32 0.5, %v6907_v42 }
 0x437   :  { %7673 = vtanh.f32 %v5917_v44  ;;  %v5924_v47 = vmul.f32 0.5, %v6908_v50  ;;  %5722 = vmatpush1.bf16.msra.mxu0 %v7641_v2 }
 0x438   :  { %7675 = vtanh.f32 %v5923_v51  ;;  %5723 = vmatprep.subr.bf16.mxu0 %v7646_v49 }
 0x439   :  { %7677 = vtanh.f32 %v5924_v47 }
 0x43b   :  { %5724 = vmatpush1.bf16.msra.mxu0 %v7644_v20 }
 0x43c   :  { %5725 = vmatprep.subr.bf16.mxu0 %v7649_v52 }
 0x43f   :  { %5726 = vmatpush1.bf16.msra.mxu0 %v7647_v53 }
 0x440   :  { %v7672_v33 = vpop.eup %7671  ;;  %5727 = vmatprep.subr.bf16.mxu0 %v7652_v17 }
 0x441   :  { %v7674_v58 = vpop.eup %7673  ;;  %v5944_v59 = vmul.f32 0.5, %v7672_v33 }
 0x442   :  { %v7676_v60 = vpop.eup %7675  ;;  %v5945_v62 = vmul.f32 0.5, %v7674_v58 }
 0x443   :  { %v7678_v1 = vpop.eup %7677  ;;  %v5958_v3 = vadd.f32 0.5, %v5944_v59  ;;  %v5951_v4 = vmul.f32 0.5, %v7676_v60  ;;  %5728 = vmatpush1.bf16.msra.mxu0 %v7650_v56 }
 0x444   :  { %v5959_v6 = vadd.f32 0.5, %v5945_v62  ;;  %v5952_v7 = vmul.f32 0.5, %v7678_v1  ;;  %5729 = vmatprep.subr.bf16.mxu0 %v7655_v57  ;;  %v2924_v57 = vrot.slane %v8153_v0, %v721_v14 }
 0x445   :  { %v5965_v9 = vadd.f32 0.5, %v5951_v4 }
 0x446   :  { %v6789_v19 = vpack.c.bf16 %v5959_v6, %v5958_v3  ;;  %v5966_v10 = vadd.f32 0.5, %v5952_v7 }
 0x447   :  { %5730 = vmatpush1.bf16.msra.mxu0 %v7653_v5 }
 0x448   :  { %6016 = vst [vmem:[#allocation14] sm:$0xff] %v6789_v19  ;;  %v6793_v12 = vpack.c.bf16 %v5966_v10, %v5965_v9  ;;  %5731 = vmatprep.subr.bf16.mxu0 %v7658_v8 }
 0x44a   :  { %6020 = vst [vmem:[#allocation14 + $0x1c] sm:$0xff] %v6793_v12 }
 0x44b   :  { %5732 = vmatpush1.bf16.msra.mxu0 %v7656_v11 }
 0x44c   :  { %5733 = vmatprep.subr.bf16.mxu0 %v7661_v13 }
 0x44f   :  { %5734 = vmatpush1.bf16.msra.mxu0 %v7659_v15 }
 0x450   :  { %5735 = vmatprep.subr.bf16.mxu0 %v7664_v16 }
 0x453   :  { %5736 = vmatpush1.bf16.msra.mxu0 %v7662_v21  ;;  %v5571_v27 = vpop.f32.mrb[16].mxu1 }
 0x454   :  { %v6909_v29 = vadd.f32 %v5571_v27, %v2908_v24  ;;  %v5573_v30 = vpop.f32.mrb[17].mxu1  ;;  %5737 = vmatprep.subr.bf16.mxu0 %v7667_v25 }
 0x455   :  { %v6910_v31 = vadd.f32 %v5573_v30, %v2912_v26  ;;  %v5575_v34 = vpop.f32.mrb[18].mxu1 }
 0x456   :  { %v5918_v63 = vmul.f32 0.5, %v6909_v29  ;;  %v6911_v55 = vadd.f32 %v5575_v34, %v2908_v24  ;;  %v5577_v18 = vpop.f32.mrb[19].mxu1 }
 0x457   :  { %v5919_v35 = vmul.f32 0.5, %v6910_v31  ;;  %v6912_v36 = vadd.f32 %v5577_v18, %v2912_v26  ;;  %5738 = vmatpush1.bf16.msra.mxu0 %v7665_v28 }
 0x458   :  { %7679 = vtanh.f32 %v5918_v63  ;;  %v5925_v37 = vmul.f32 0.5, %v6911_v55  ;;  %5739 = vmatprep.subr.bf16.mxu0 %v7670_v32 }
 0x459   :  { %7681 = vtanh.f32 %v5919_v35  ;;  %v5926_v48 = vmul.f32 0.5, %v6912_v36 }
 0x45a   :  { %7683 = vtanh.f32 %v5925_v37  ;;  %v2920_v37 = vrot.slane %v8153_v0, %v717_v23 }
 0x45b   :  { %7685 = vtanh.f32 %v5926_v48  ;;  %5740 = vmatpush1.bf16.msra.mxu0 %v7668_v45  ;;  %v2916_v45 = vrot.slane %v8153_v0, %v713_v22 }
 0x45e   :  { %5742 = vmatmul.mubr.bf16.vlgmr.msra.gmra.mrb[16].mxu0 %v8130_v54 }
 0x462   :  { %v7680_v38 = vpop.eup %7679 }
 0x463   :  { %v7682_v61 = vpop.eup %7681  ;;  %v5946_v39 = vmul.f32 0.5, %v7680_v38 }
 0x464   :  { %v7684_v40 = vpop.eup %7683  ;;  %v5947_v2 = vmul.f32 0.5, %v7682_v61 }
 0x465   :  { %v7686_v41 = vpop.eup %7685  ;;  %v5960_v42 = vadd.f32 0.5, %v5946_v39  ;;  %v5953_v46 = vmul.f32 0.5, %v7684_v40 }
 0x466   :  { %v5961_v49 = vadd.f32 0.5, %v5947_v2  ;;  %v5954_v44 = vmul.f32 0.5, %v7686_v41 }
 0x467   :  { %v5967_v50 = vadd.f32 0.5, %v5953_v46 }
 0x468   :  { %v6790_v51 = vpack.c.bf16 %v5961_v49, %v5960_v42  ;;  %v5968_v47 = vadd.f32 0.5, %v5954_v44 }
 0x46a   :  { %6017 = vst [vmem:[#allocation14 + $0x8] sm:$0xff] %v6790_v51  ;;  %v6794_v20 = vpack.c.bf16 %v5968_v47, %v5967_v50 }
 0x46c   :  { %6021 = vst [vmem:[#allocation14 + $0x24] sm:$0xff] %v6794_v20 }
 0x473   :  { %v6813_v52 = vpop.f32.mrb[20].mxu1 }
 0x474   :  { %v6814_v53 = vpop.f32.mrb[21].mxu1 }
 0x475   :  { %v6815_v17 = vadd.f32 %v6814_v53, %v6813_v52  ;;  %v6816_v54 = vpop.f32.mrb[22].mxu1 }
 0x476   :  { %v6817_v56 = vpop.f32.mrb[23].mxu1 }
 0x477   :  { %v6818_v33 = vadd.f32 %v6817_v56, %v6816_v54  ;;  %v5787_v60 = vadd.f32 %v6815_v17, %v2924_v57 }
 0x479   :  { %v5790_v4 = vadd.f32 %v6818_v33, %v2924_v57 }
 0x493   :  { %v6835_v58 = vpop.f32.mrb[24].mxu1 }
 0x494   :  { %v6836_v59 = vpop.f32.mrb[25].mxu1 }
 0x495   :  { %v6837_v62 = vadd.f32 %v6836_v59, %v6835_v58  ;;  %v6838_v1 = vpop.f32.mrb[26].mxu1 }
 0x496   :  { %v6839_v3 = vpop.f32.mrb[27].mxu1 }
 0x497   :  { %v5828_v5 = vadd.f32 %v6837_v62, %v5787_v60  ;;  %v6840_v6 = vadd.f32 %v6839_v3, %v6838_v1 }
 0x499   :  { %v5831_v7 = vadd.f32 %v6840_v6, %v5790_v4 }
 0x4b3   :  { %v6857_v8 = vpop.f32.mrb[28].mxu1 }
 0x4b4   :  { %v6858_v9 = vpop.f32.mrb[29].mxu1 }
 0x4b5   :  { %v6859_v19 = vadd.f32 %v6858_v9, %v6857_v8  ;;  %v6860_v10 = vpop.f32.mrb[30].mxu1 }
 0x4b6   :  { %v6861_v11 = vpop.f32.mrb[31].mxu1 }
 0x4b7   :  { %v5869_v12 = vadd.f32 %v6859_v19, %v5828_v5  ;;  %v6862_v13 = vadd.f32 %v6861_v11, %v6860_v10 }
 0x4b9   :  { %v5872_v15 = vadd.f32 %v6862_v13, %v5831_v7 }
 0x4d3   :  { %v6879_v16 = vpop.f32.mrb[32].mxu1 }
 0x4d4   :  { %v6880_v14 = vpop.f32.mrb[33].mxu1 }
 0x4d5   :  { %v6881_v21 = vadd.f32 %v6880_v14, %v6879_v16  ;;  %v6882_v24 = vpop.f32.mrb[34].mxu1 }
 0x4d6   :  { %v6883_v25 = vpop.f32.mrb[35].mxu1 }
 0x4d7   :  { %v5910_v26 = vadd.f32 %v6881_v21, %v5869_v12  ;;  %v6884_v27 = vadd.f32 %v6883_v25, %v6882_v24 }
 0x4d9   :  { %v5922_v28 = vmul.f32 0.5, %v5910_v26  ;;  %v5913_v29 = vadd.f32 %v6884_v27, %v5872_v15 }
 0x4db   :  { %7687 = vtanh.f32 %v5922_v28  ;;  %v5929_v30 = vmul.f32 0.5, %v5913_v29 }
 0x4dd   :  { %7689 = vtanh.f32 %v5929_v30 }
 0x4e5   :  { %v7688_v32 = vpop.eup %7687 }
 0x4e6   :  { %v5950_v31 = vmul.f32 0.5, %v7688_v32 }
 0x4e7   :  { %v7690_v34 = vpop.eup %7689 }
 0x4e8   :  { %v5964_v63 = vadd.f32 0.5, %v5950_v31  ;;  %v5957_v55 = vmul.f32 0.5, %v7690_v34 }
 0x4ea   :  { %v6792_v18 = vpack.c.bf16 %v5964_v63, %v5964_v63  ;;  %v5971_v35 = vadd.f32 0.5, %v5957_v55 }
 0x4ec   :  { %6019 = vst [vmem:[#allocation14 + $0x18] sm:$0xf] %v6792_v18  ;;  %v6796_v36 = vpack.c.bf16 %v5971_v35, %v5971_v35 }
 0x4ee   :  { %6023 = vst [vmem:[#allocation14 + $0x34] sm:$0xf] %v6796_v36 }
 0x531   :  { %v5743_v48 = vpop.f32.mrb[16].mxu0 }
 0x532   :  { %v6913_v38 = vadd.f32 %v5743_v48, %v2916_v45  ;;  %v5745_v61 = vpop.f32.mrb[17].mxu0 }
 0x533   :  { %v6914_v39 = vadd.f32 %v5745_v61, %v2920_v37  ;;  %v5747_v40 = vpop.f32.mrb[18].mxu0 }
 0x534   :  { %v5920_v2 = vmul.f32 0.5, %v6913_v38  ;;  %v6915_v41 = vadd.f32 %v5747_v40, %v2916_v45  ;;  %v5749_v42 = vpop.f32.mrb[19].mxu0 }
 0x535   :  { %v5921_v46 = vmul.f32 0.5, %v6914_v39  ;;  %v6916_v49 = vadd.f32 %v5749_v42, %v2920_v37 }
 0x536   :  { %7691 = vtanh.f32 %v5920_v2  ;;  %v5927_v44 = vmul.f32 0.5, %v6915_v41 }
 0x537   :  { %7693 = vtanh.f32 %v5921_v46  ;;  %v5928_v50 = vmul.f32 0.5, %v6916_v49 }
 0x538   :  { %7695 = vtanh.f32 %v5927_v44 }
 0x539   :  { %7697 = vtanh.f32 %v5928_v50 }
 0x540   :  { %v7692_v22 = vpop.eup %7691 }
 0x541   :  { %v7694_v43 = vpop.eup %7693  ;;  %v5948_v51 = vmul.f32 0.5, %v7692_v22 }
 0x542   :  { %v7696_v23 = vpop.eup %7695  ;;  %v5949_v0 = vmul.f32 0.5, %v7694_v43 }
 0x543   :  { %v7698_v47 = vpop.eup %7697  ;;  %v5962_v20 = vadd.f32 0.5, %v5948_v51  ;;  %v5955_v52 = vmul.f32 0.5, %v7696_v23 }
 0x544   :  { %v5963_v53 = vadd.f32 0.5, %v5949_v0  ;;  %v5956_v17 = vmul.f32 0.5, %v7698_v47 }
 0x545   :  { %v5969_v54 = vadd.f32 0.5, %v5955_v52 }
 0x546   :  { %v6791_v56 = vpack.c.bf16 %v5963_v53, %v5962_v20  ;;  %v5970_v33 = vadd.f32 0.5, %v5956_v17 }
 0x548   :  { %6018 = vst [vmem:[#allocation14 + $0x10] sm:$0xff] %v6791_v56  ;;  %v6795_v57 = vpack.c.bf16 %v5970_v33, %v5969_v54 }
 0x54a   :  { %6022 = vst [vmem:[#allocation14 + $0x2c] sm:$0xff] %v6795_v57 }
 0x54b   :  { %7865 = shalt.err (!%p7862_p4)
}
 0x54c   :  { %s7866_s21 = scalar_lea.hbm %s8195_s7, 896 }
 0x54d   :  { %p7867_p5 = scmp.ne.s32.totalorder %s8195_s7, %s7866_s21  ;;  %p7870_p6 = scmp.lt.u32.totalorder %s7866_s21, %s8195_s7 }
 0x54f   :  { %p7872_p7 = pnand %p7870_p6, %p7867_p5 }
 0x551   :  { %7875 = shalt.err (!%p7872_p7)
}
 0x552   :  { %6035 = dma.vmem_to_hbm [thread:$0]  %s6030_s18, 896, %s8195_s7, [#allocation4], %s7893_s3, %s7893_s3, %s7894_s15  }
 0x553   :  { %7884 = dma.done.wait [#allocation4], 896  }
 0x554   :  { %7885 = vsyncadd [#allocation4], 4294966400 }
 0x555   :  { %6039 = vsyncpa [#allocation3], 1 }
 0x556   :  { %6040 = vsyncpa [#allocation6], 1 }
 0x557   :  { %6041 = vsyncpa [#allocation9], 1 }
 0x558   :  { %6042 = vsyncpa [#allocation12], 1 }
 0x559   :  { %6043 = vsyncpa [#allocation4], 1 }

</bundles_post_ra>
